<compile_context>
chip_gen: v6e
topology: v6e:2x2x1
jax: 0.10.0
libtpu: 0.0.40
codegen_flags: <defaults>
</compile_context>

<pallas_src>
import jax
import jax.numpy as jnp
from jax import lax
from jax.experimental import pallas as pl
from jax.experimental.pallas import tpu as pltpu

EPS = 1e-5
CP = 128    # lane-padded channel width carried between layers
C0P = 8     # padded input-image channels (3 -> 8)
C3 = 48     # true output channels of conv3
INT0 = 8    # sublane-aligned column where the valid interior starts in activation scratch


# ---------------------------------------------------------------------------
# Fused Pallas kernel: conv1/2/3 (+folded BN +ReLU) + global average pool
# ---------------------------------------------------------------------------
def _conv_bn_relu(src_ref, w_ref, shift, ho, wo, cin, cbase):
    """Stride-2 3x3 conv as 9 shifted matmuls on a zero-padded VMEM activation.

    src_ref: (Hp, Wbuf, cin) zero-padded input; padded column p lives at actual column
             cbase + p (cbase=0 for the host-padded image, cbase=7 for scratch buffers
             whose interior starts at the aligned column INT0=8).
    w_ref:   (9, cin, CP) per-tap weight matrices (tap index = di*3 + dj), BN scale folded in.
    shift:   (1, CP) folded BN/bias shift.
    Returns (ho*wo, CP) float32 activations after bias + ReLU.
    """
    acc = jnp.zeros((ho * wo, CP), jnp.float32)
    for di in range(3):
        for dj in range(3):
            # columns 2c + dj : sublane-strided read; rows di .. di+2*ho-1 : static slice.
            tap = src_ref[di:di + 2 * ho, pl.ds(cbase + dj, wo, 2), :]   # (2*ho, wo, cin)
            # rows 2r + di : free leading-dim reshape + static index (even offsets).
            tap = tap.reshape(ho, 2, wo, cin)[:, 0]                       # (ho, wo, cin)
            patch = tap.reshape(ho * wo, cin)                             # (M, cin)
            acc = acc + jnp.dot(patch, w_ref[di * 3 + dj],
                                preferred_element_type=jnp.float32)
    return jnp.maximum(acc + shift, 0.0)


def convnet_kernel(x_ref, w1_ref, w2_ref, w3_ref, sh_ref, o_ref, act1, act2):
    # Zero the padded activation scratches every grid step (the untouched border IS the
    # conv zero-padding; unconditional so megacore-sharded grids stay correct).
    act1[...] = jnp.zeros_like(act1)
    act2[...] = jnp.zeros_like(act2)

    # Layer 1: (34, 34, 8) -> 16x16xCP, written into act1's aligned interior [1:17, 8:24].
    y1 = _conv_bn_relu(x_ref, w1_ref, sh_ref[0:1, :], 16, 16, C0P, 0)
    act1[1:17, INT0:INT0 + 16, :] = y1.reshape(16, 16, CP)

    # Layer 2: padded (18, 18, CP) view -> 8x8xCP, written into act2's interior [1:9, 8:16].
    y2 = _conv_bn_relu(act1, w2_ref, sh_ref[1:2, :], 8, 8, CP, INT0 - 1)
    act2[1:9, INT0:INT0 + 8, :] = y2.reshape(8, 8, CP)

    # Layer 3: padded (10, 10, CP) view -> 4x8xCP; output width padded to 8 (sublane
    # multiple) so the flatten is layout-free -- columns 4..7 are garbage, masked below.
    y3 = _conv_bn_relu(act2, w3_ref, sh_ref[2:3, :], 4, 8, CP, INT0 - 1)

    # Fused AvgPool2d(4,4) == mean over the 16 valid spatial positions.
    valid = (lax.broadcasted_iota(jnp.int32, (4 * 8, CP), 0) % 8) < 4
    y3 = jnp.where(valid, y3, 0.0)
    o_ref[...] = jnp.sum(y3, axis=0, keepdims=True) * (1.0 / 16.0)


def convnet_forward(x_nchw, folded):
    """Jitted forward. x_nchw: (B, 3, 32, 32). Returns (B, 48)."""
    w1, w2, w3, sh = folded
    B = x_nchw.shape[0]
    x = jnp.transpose(x_nchw, (0, 2, 3, 1)).astype(jnp.float32)          # NCHW -> NHWC
    x = jnp.pad(x, ((0, 0), (1, 1), (1, 1), (0, C0P - x.shape[-1])))      # (B, 34, 34, 8)

    out = pl.pallas_call(
        convnet_kernel,
        out_shape=jax.ShapeDtypeStruct((B, 1, CP), jnp.float32),
        grid=(B,),
        in_specs=[
            pl.BlockSpec((None, 34, 34, C0P), lambda b: (b, 0, 0, 0)),   # per-image input
            pl.BlockSpec((9, C0P, CP), lambda b: (0, 0, 0)),             # w1 (VMEM-resident)
            pl.BlockSpec((9, CP, CP), lambda b: (0, 0, 0)),              # w2 (VMEM-resident)
            pl.BlockSpec((9, CP, CP), lambda b: (0, 0, 0)),              # w3 (VMEM-resident)
            pl.BlockSpec((3, CP), lambda b: (0, 0)),                     # folded BN shifts
        ],
        out_specs=pl.BlockSpec((None, 1, CP), lambda b: (b, 0, 0)),
        scratch_shapes=[
            pltpu.VMEM((18, 24, CP), jnp.float32),   # padded layer-2 input (interior @ col 8)
            pltpu.VMEM((10, 24, CP), jnp.float32),   # padded layer-3 input (interior @ col 8)
        ],
        compiler_params=pltpu.CompilerParams(dimension_semantics=("parallel",)),
    )(x, w1, w2, w3, sh)
    return out[:, 0, :C3]


# ---------------------------------------------------------------------------
# Host-side parameter folding (done once, outside the per-call path)
# ---------------------------------------------------------------------------
def fold_params(params):
    def fold(w, b, gamma, beta, mean, var, cin_pad):
        co, ci, kh, kw = w.shape
        scale = gamma / jnp.sqrt(var + EPS)
        shift = (b - mean) * scale + beta
        # (co, ci, kh, kw) -> (kh*kw, ci, co), tap index = di*3 + dj; fold BN scale in.
        wt = jnp.transpose(w, (2, 3, 1, 0)).reshape(kh * kw, ci, co) * scale[None, None, :]
        wt = jnp.pad(wt, ((0, 0), (0, cin_pad - ci), (0, CP - co)))
        # Pad the shift with zeros so padded lanes stay exactly 0 through ReLU.
        return wt, jnp.pad(shift, (0, CP - co))

    w1, h1 = fold(*params["l1"], C0P)
    w2, h2 = fold(*params["l2"], CP)
    w3, h3 = fold(*params["l3"], CP)
    return (w1, w2, w3, jnp.stack([h1, h2, h3]))


# ---------------------------------------------------------------------------
# Pure-JAX reference (for correctness check)
# ---------------------------------------------------------------------------
def ref_forward(x_nchw, params):
    # TODO(synk): Dropout is inference-mode identity (train-mode RNG masking not modeled).
    x = x_nchw.astype(jnp.float32)
    for layer in ("l1", "l2", "l3"):
        w, b, g, be, m, v = params[layer]
        y = lax.conv_general_dilated(
            x, w, window_strides=(2, 2), padding=((1, 1), (1, 1)),
            dimension_numbers=("NCHW", "OIHW", "NCHW"),
            precision=lax.Precision.HIGHEST)
        y = y + b[None, :, None, None]
        y = (y - m[None, :, None, None]) / jnp.sqrt(v[None, :, None, None] + EPS)
        y = y * g[None, :, None, None] + be[None, :, None, None]
        x = jax.nn.relu(y)
    return jnp.mean(x, axis=(2, 3))                 # AvgPool2d(4,4) on a 4x4 map + flatten


# ---------------------------------------------------------------------------
# Deterministic parameter construction
# ---------------------------------------------------------------------------
def make_params(key):
    def layer(key, cin, cout):
        ks = jax.random.split(key, 6)
        w = 0.1 * jax.random.normal(ks[0], (cout, cin, 3, 3), jnp.float32)
        b = 0.05 * jax.random.normal(ks[1], (cout,), jnp.float32)
        gamma = 1.0 + 0.1 * jax.random.normal(ks[2], (cout,), jnp.float32)
        beta = 0.1 * jax.random.normal(ks[3], (cout,), jnp.float32)
        mean = 0.1 * jax.random.normal(ks[4], (cout,), jnp.float32)
        var = 1.0 + 0.1 * jnp.abs(jax.random.normal(ks[5], (cout,), jnp.float32))
        return (w, b, gamma, beta, mean, var)

    k1, k2, k3 = jax.random.split(key, 3)
    return {"l1": layer(k1, 3, 16), "l2": layer(k2, 16, 32), "l3": layer(k3, 32, 48)}


if __name__ == "__main__":
    key = jax.random.PRNGKey(0)
    pkey, xkey = jax.random.split(key)
    params = make_params(pkey)
    x = jax.random.normal(xkey, (2, 3, 32, 32), jnp.float32)   # NCHW, like PyTorch

    folded = fold_params(params)                    # folded/padded once, out of hot path
    fwd = jax.jit(convnet_forward)
    out = jax.block_until_ready(fwd(x, folded))
    ref = jax.block_until_ready(ref_forward(x, params))

    assert out.shape == (2, 48), out.shape
    err = float(jnp.max(jnp.abs(out - ref)))
    assert jnp.allclose(out, ref, atol=1e-3, rtol=1e-3), err
    print("KERNEL_OK")
</pallas_src>

<mosaic_0001>
module attributes {stable_mosaic.version = 11 : i64} {
  func.func @convnet_kernel(%arg0: i32, %arg1: memref<1x34x34x8xf32, #tpu.memory_space<vmem>>, %arg2: memref<9x8x128xf32, #tpu.memory_space<vmem>>, %arg3: memref<9x128x128xf32, #tpu.memory_space<vmem>>, %arg4: memref<9x128x128xf32, #tpu.memory_space<vmem>>, %arg5: memref<3x128xf32, #tpu.memory_space<vmem>>, %arg6: memref<1x1x128xf32, #tpu.memory_space<vmem>>, %arg7: memref<18x24x128xf32, #tpu.memory_space<vmem>>, %arg8: memref<10x24x128xf32, #tpu.memory_space<vmem>>) attributes {dimension_semantics = [#tpu.dimension_semantics<parallel>], iteration_bounds = array<i64: 2>, scalar_prefetch = 0 : i64, scratch_operands = 2 : i64, tpu.core_type = #tpu.core_type<tc>, window_params = [{transform_indices = @transform_0, window_bounds = array<i64: 1, 34, 34, 8>}, {pipeline_mode = #tpu.pipeline_mode<synchronous>, transform_indices = @transform_1, window_bounds = array<i64: 9, 8, 128>}, {pipeline_mode = #tpu.pipeline_mode<synchronous>, transform_indices = @transform_2, window_bounds = array<i64: 9, 128, 128>}, {pipeline_mode = #tpu.pipeline_mode<synchronous>, transform_indices = @transform_3, window_bounds = array<i64: 9, 128, 128>}, {pipeline_mode = #tpu.pipeline_mode<synchronous>, transform_indices = @transform_4, window_bounds = array<i64: 3, 128>}, {transform_indices = @transform_5, window_bounds = array<i64: 1, 1, 128>}]} {
    %cst = arith.constant 0.000000e+00 : f32
    %0 = vector.broadcast %cst : f32 to vector<18x24x128xf32>
    %c0 = arith.constant 0 : index
    %c0_0 = arith.constant 0 : index
    %c0_1 = arith.constant 0 : index
    %1 = vector.load %arg7[%c0, %c0_0, %c0_1] : memref<18x24x128xf32, #tpu.memory_space<vmem>>, vector<18x24x128xf32>
    tpu.vector_store %arg7[%c0, %c0_0, %c0_1], %0 {strides = array<i32>} : memref<18x24x128xf32, #tpu.memory_space<vmem>>, vector<18x24x128xf32>,
    %cst_2 = arith.constant 0.000000e+00 : f32
    %2 = vector.broadcast %cst_2 : f32 to vector<10x24x128xf32>
    %c0_3 = arith.constant 0 : index
    %c0_4 = arith.constant 0 : index
    %c0_5 = arith.constant 0 : index
    %3 = vector.load %arg8[%c0_3, %c0_4, %c0_5] : memref<10x24x128xf32, #tpu.memory_space<vmem>>, vector<10x24x128xf32>
    tpu.vector_store %arg8[%c0_3, %c0_4, %c0_5], %2 {strides = array<i32>} : memref<10x24x128xf32, #tpu.memory_space<vmem>>, vector<10x24x128xf32>,
    %c0_6 = arith.constant 0 : index
    %c0_7 = arith.constant 0 : index
    %4 = vector.load %arg5[%c0_6, %c0_7] : memref<3x128xf32, #tpu.memory_space<vmem>>, vector<1x128xf32>
    %cst_8 = arith.constant 0.000000e+00 : f32
    %5 = vector.broadcast %cst_8 : f32 to vector<256x128xf32>
    %c0_9 = arith.constant 0 : index
    %c0_10 = arith.constant 0 : index
    %c0_11 = arith.constant 0 : index
    %c0_12 = arith.constant 0 : index
    %6 = tpu.strided_load %arg1[%c0_9, %c0_10, %c0_11, %c0_12] {strides = array<i32: 1, 1, 2, 1>} : memref<1x34x34x8xf32, #tpu.memory_space<vmem>>, vector<1x32x16x8xf32>
    %7 = vector.shape_cast %6 : vector<1x32x16x8xf32> to vector<32x16x8xf32>
    %8 = vector.shape_cast %7 : vector<32x16x8xf32> to vector<16x2x16x8xf32>
    %9 = vector.extract_strided_slice %8 {offsets = [0, 0, 0, 0], sizes = [16, 1, 16, 8], strides = [1, 1, 1, 1]} : vector<16x2x16x8xf32> to vector<16x1x16x8xf32>
    %10 = vector.shape_cast %9 : vector<16x1x16x8xf32> to vector<16x16x8xf32>
    %11 = vector.shape_cast %10 : vector<16x16x8xf32> to vector<256x8xf32>
    %c0_13 = arith.constant 0 : index
    %c0_14 = arith.constant 0 : index
    %c0_15 = arith.constant 0 : index
    %12 = vector.load %arg2[%c0_13, %c0_14, %c0_15] : memref<9x8x128xf32, #tpu.memory_space<vmem>>, vector<1x8x128xf32>
    %13 = vector.shape_cast %12 : vector<1x8x128xf32> to vector<8x128xf32>
    %cst_16 = arith.constant dense<0.000000e+00> : vector<256x128xf32>
    %14 = tpu.matmul %11, %13, %cst_16 {dimension_numbers = #tpu.dot_dimension_numbers<[1], [0], [0], [1], [0, 0, 1, 1], [], []>} : vector<256x8xf32>, vector<8x128xf32>, vector<256x128xf32> -> vector<256x128xf32>
    %15 = arith.addf %5, %14 : vector<256x128xf32>
    %c0_17 = arith.constant 0 : index
    %c0_18 = arith.constant 0 : index
    %c1 = arith.constant 1 : index
    %c0_19 = arith.constant 0 : index
    %16 = tpu.strided_load %arg1[%c0_17, %c0_18, %c1, %c0_19] {strides = array<i32: 1, 1, 2, 1>} : memref<1x34x34x8xf32, #tpu.memory_space<vmem>>, vector<1x32x16x8xf32>
    %17 = vector.shape_cast %16 : vector<1x32x16x8xf32> to vector<32x16x8xf32>
    %18 = vector.shape_cast %17 : vector<32x16x8xf32> to vector<16x2x16x8xf32>
    %19 = vector.extract_strided_slice %18 {offsets = [0, 0, 0, 0], sizes = [16, 1, 16, 8], strides = [1, 1, 1, 1]} : vector<16x2x16x8xf32> to vector<16x1x16x8xf32>
    %20 = vector.shape_cast %19 : vector<16x1x16x8xf32> to vector<16x16x8xf32>
    %21 = vector.shape_cast %20 : vector<16x16x8xf32> to vector<256x8xf32>
    %c1_20 = arith.constant 1 : index
    %c0_21 = arith.constant 0 : index
    %c0_22 = arith.constant 0 : index
    %22 = vector.load %arg2[%c1_20, %c0_21, %c0_22] : memref<9x8x128xf32, #tpu.memory_space<vmem>>, vector<1x8x128xf32>
    %23 = vector.shape_cast %22 : vector<1x8x128xf32> to vector<8x128xf32>
    %cst_23 = arith.constant dense<0.000000e+00> : vector<256x128xf32>
    %24 = tpu.matmul %21, %23, %cst_23 {dimension_numbers = #tpu.dot_dimension_numbers<[1], [0], [0], [1], [0, 0, 1, 1], [], []>} : vector<256x8xf32>, vector<8x128xf32>, vector<256x128xf32> -> vector<256x128xf32>
    %25 = arith.addf %15, %24 : vector<256x128xf32>
    %c0_24 = arith.constant 0 : index
    %c0_25 = arith.constant 0 : index
    %c2 = arith.constant 2 : index
    %c0_26 = arith.constant 0 : index
    %26 = tpu.strided_load %arg1[%c0_24, %c0_25, %c2, %c0_26] {strides = array<i32: 1, 1, 2, 1>} : memref<1x34x34x8xf32, #tpu.memory_space<vmem>>, vector<1x32x16x8xf32>
    %27 = vector.shape_cast %26 : vector<1x32x16x8xf32> to vector<32x16x8xf32>
    %28 = vector.shape_cast %27 : vector<32x16x8xf32> to vector<16x2x16x8xf32>
    %29 = vector.extract_strided_slice %28 {offsets = [0, 0, 0, 0], sizes = [16, 1, 16, 8], strides = [1, 1, 1, 1]} : vector<16x2x16x8xf32> to vector<16x1x16x8xf32>
    %30 = vector.shape_cast %29 : vector<16x1x16x8xf32> to vector<16x16x8xf32>
    %31 = vector.shape_cast %30 : vector<16x16x8xf32> to vector<256x8xf32>
    %c2_27 = arith.constant 2 : index
    %c0_28 = arith.constant 0 : index
    %c0_29 = arith.constant 0 : index
    %32 = vector.load %arg2[%c2_27, %c0_28, %c0_29] : memref<9x8x128xf32, #tpu.memory_space<vmem>>, vector<1x8x128xf32>
    %33 = vector.shape_cast %32 : vector<1x8x128xf32> to vector<8x128xf32>
    %cst_30 = arith.constant dense<0.000000e+00> : vector<256x128xf32>
    %34 = tpu.matmul %31, %33, %cst_30 {dimension_numbers = #tpu.dot_dimension_numbers<[1], [0], [0], [1], [0, 0, 1, 1], [], []>} : vector<256x8xf32>, vector<8x128xf32>, vector<256x128xf32> -> vector<256x128xf32>
    %35 = arith.addf %25, %34 : vector<256x128xf32>
    %c0_31 = arith.constant 0 : index
    %c1_32 = arith.constant 1 : index
    %c0_33 = arith.constant 0 : index
    %c0_34 = arith.constant 0 : index
    %36 = tpu.strided_load %arg1[%c0_31, %c1_32, %c0_33, %c0_34] {strides = array<i32: 1, 1, 2, 1>} : memref<1x34x34x8xf32, #tpu.memory_space<vmem>>, vector<1x32x16x8xf32>
    %37 = vector.shape_cast %36 : vector<1x32x16x8xf32> to vector<32x16x8xf32>
    %38 = vector.shape_cast %37 : vector<32x16x8xf32> to vector<16x2x16x8xf32>
    %39 = vector.extract_strided_slice %38 {offsets = [0, 0, 0, 0], sizes = [16, 1, 16, 8], strides = [1, 1, 1, 1]} : vector<16x2x16x8xf32> to vector<16x1x16x8xf32>
    %40 = vector.shape_cast %39 : vector<16x1x16x8xf32> to vector<16x16x8xf32>
    %41 = vector.shape_cast %40 : vector<16x16x8xf32> to vector<256x8xf32>
    %c3 = arith.constant 3 : index
    %c0_35 = arith.constant 0 : index
    %c0_36 = arith.constant 0 : index
    %42 = vector.load %arg2[%c3, %c0_35, %c0_36] : memref<9x8x128xf32, #tpu.memory_space<vmem>>, vector<1x8x128xf32>
    %43 = vector.shape_cast %42 : vector<1x8x128xf32> to vector<8x128xf32>
    %cst_37 = arith.constant dense<0.000000e+00> : vector<256x128xf32>
    %44 = tpu.matmul %41, %43, %cst_37 {dimension_numbers = #tpu.dot_dimension_numbers<[1], [0], [0], [1], [0, 0, 1, 1], [], []>} : vector<256x8xf32>, vector<8x128xf32>, vector<256x128xf32> -> vector<256x128xf32>
    %45 = arith.addf %35, %44 : vector<256x128xf32>
    %c0_38 = arith.constant 0 : index
    %c1_39 = arith.constant 1 : index
    %c1_40 = arith.constant 1 : index
    %c0_41 = arith.constant 0 : index
    %46 = tpu.strided_load %arg1[%c0_38, %c1_39, %c1_40, %c0_41] {strides = array<i32: 1, 1, 2, 1>} : memref<1x34x34x8xf32, #tpu.memory_space<vmem>>, vector<1x32x16x8xf32>
    %47 = vector.shape_cast %46 : vector<1x32x16x8xf32> to vector<32x16x8xf32>
    %48 = vector.shape_cast %47 : vector<32x16x8xf32> to vector<16x2x16x8xf32>
    %49 = vector.extract_strided_slice %48 {offsets = [0, 0, 0, 0], sizes = [16, 1, 16, 8], strides = [1, 1, 1, 1]} : vector<16x2x16x8xf32> to vector<16x1x16x8xf32>
    %50 = vector.shape_cast %49 : vector<16x1x16x8xf32> to vector<16x16x8xf32>
    %51 = vector.shape_cast %50 : vector<16x16x8xf32> to vector<256x8xf32>
    %c4 = arith.constant 4 : index
    %c0_42 = arith.constant 0 : index
    %c0_43 = arith.constant 0 : index
    %52 = vector.load %arg2[%c4, %c0_42, %c0_43] : memref<9x8x128xf32, #tpu.memory_space<vmem>>, vector<1x8x128xf32>
    %53 = vector.shape_cast %52 : vector<1x8x128xf32> to vector<8x128xf32>
    %cst_44 = arith.constant dense<0.000000e+00> : vector<256x128xf32>
    %54 = tpu.matmul %51, %53, %cst_44 {dimension_numbers = #tpu.dot_dimension_numbers<[1], [0], [0], [1], [0, 0, 1, 1], [], []>} : vector<256x8xf32>, vector<8x128xf32>, vector<256x128xf32> -> vector<256x128xf32>
    %55 = arith.addf %45, %54 : vector<256x128xf32>
    %c0_45 = arith.constant 0 : index
    %c1_46 = arith.constant 1 : index
    %c2_47 = arith.constant 2 : index
    %c0_48 = arith.constant 0 : index
    %56 = tpu.strided_load %arg1[%c0_45, %c1_46, %c2_47, %c0_48] {strides = array<i32: 1, 1, 2, 1>} : memref<1x34x34x8xf32, #tpu.memory_space<vmem>>, vector<1x32x16x8xf32>
    %57 = vector.shape_cast %56 : vector<1x32x16x8xf32> to vector<32x16x8xf32>
    %58 = vector.shape_cast %57 : vector<32x16x8xf32> to vector<16x2x16x8xf32>
    %59 = vector.extract_strided_slice %58 {offsets = [0, 0, 0, 0], sizes = [16, 1, 16, 8], strides = [1, 1, 1, 1]} : vector<16x2x16x8xf32> to vector<16x1x16x8xf32>
    %60 = vector.shape_cast %59 : vector<16x1x16x8xf32> to vector<16x16x8xf32>
    %61 = vector.shape_cast %60 : vector<16x16x8xf32> to vector<256x8xf32>
    %c5 = arith.constant 5 : index
    %c0_49 = arith.constant 0 : index
    %c0_50 = arith.constant 0 : index
    %62 = vector.load %arg2[%c5, %c0_49, %c0_50] : memref<9x8x128xf32, #tpu.memory_space<vmem>>, vector<1x8x128xf32>
    %63 = vector.shape_cast %62 : vector<1x8x128xf32> to vector<8x128xf32>
    %cst_51 = arith.constant dense<0.000000e+00> : vector<256x128xf32>
    %64 = tpu.matmul %61, %63, %cst_51 {dimension_numbers = #tpu.dot_dimension_numbers<[1], [0], [0], [1], [0, 0, 1, 1], [], []>} : vector<256x8xf32>, vector<8x128xf32>, vector<256x128xf32> -> vector<256x128xf32>
    %65 = arith.addf %55, %64 : vector<256x128xf32>
    %c0_52 = arith.constant 0 : index
    %c2_53 = arith.constant 2 : index
    %c0_54 = arith.constant 0 : index
    %c0_55 = arith.constant 0 : index
    %66 = tpu.strided_load %arg1[%c0_52, %c2_53, %c0_54, %c0_55] {strides = array<i32: 1, 1, 2, 1>} : memref<1x34x34x8xf32, #tpu.memory_space<vmem>>, vector<1x32x16x8xf32>
    %67 = vector.shape_cast %66 : vector<1x32x16x8xf32> to vector<32x16x8xf32>
    %68 = vector.shape_cast %67 : vector<32x16x8xf32> to vector<16x2x16x8xf32>
    %69 = vector.extract_strided_slice %68 {offsets = [0, 0, 0, 0], sizes = [16, 1, 16, 8], strides = [1, 1, 1, 1]} : vector<16x2x16x8xf32> to vector<16x1x16x8xf32>
    %70 = vector.shape_cast %69 : vector<16x1x16x8xf32> to vector<16x16x8xf32>
    %71 = vector.shape_cast %70 : vector<16x16x8xf32> to vector<256x8xf32>
    %c6 = arith.constant 6 : index
    %c0_56 = arith.constant 0 : index
    %c0_57 = arith.constant 0 : index
    %72 = vector.load %arg2[%c6, %c0_56, %c0_57] : memref<9x8x128xf32, #tpu.memory_space<vmem>>, vector<1x8x128xf32>
    %73 = vector.shape_cast %72 : vector<1x8x128xf32> to vector<8x128xf32>
    %cst_58 = arith.constant dense<0.000000e+00> : vector<256x128xf32>
    %74 = tpu.matmul %71, %73, %cst_58 {dimension_numbers = #tpu.dot_dimension_numbers<[1], [0], [0], [1], [0, 0, 1, 1], [], []>} : vector<256x8xf32>, vector<8x128xf32>, vector<256x128xf32> -> vector<256x128xf32>
    %75 = arith.addf %65, %74 : vector<256x128xf32>
    %c0_59 = arith.constant 0 : index
    %c2_60 = arith.constant 2 : index
    %c1_61 = arith.constant 1 : index
    %c0_62 = arith.constant 0 : index
    %76 = tpu.strided_load %arg1[%c0_59, %c2_60, %c1_61, %c0_62] {strides = array<i32: 1, 1, 2, 1>} : memref<1x34x34x8xf32, #tpu.memory_space<vmem>>, vector<1x32x16x8xf32>
    %77 = vector.shape_cast %76 : vector<1x32x16x8xf32> to vector<32x16x8xf32>
    %78 = vector.shape_cast %77 : vector<32x16x8xf32> to vector<16x2x16x8xf32>
    %79 = vector.extract_strided_slice %78 {offsets = [0, 0, 0, 0], sizes = [16, 1, 16, 8], strides = [1, 1, 1, 1]} : vector<16x2x16x8xf32> to vector<16x1x16x8xf32>
    %80 = vector.shape_cast %79 : vector<16x1x16x8xf32> to vector<16x16x8xf32>
    %81 = vector.shape_cast %80 : vector<16x16x8xf32> to vector<256x8xf32>
    %c7 = arith.constant 7 : index
    %c0_63 = arith.constant 0 : index
    %c0_64 = arith.constant 0 : index
    %82 = vector.load %arg2[%c7, %c0_63, %c0_64] : memref<9x8x128xf32, #tpu.memory_space<vmem>>, vector<1x8x128xf32>
    %83 = vector.shape_cast %82 : vector<1x8x128xf32> to vector<8x128xf32>
    %cst_65 = arith.constant dense<0.000000e+00> : vector<256x128xf32>
    %84 = tpu.matmul %81, %83, %cst_65 {dimension_numbers = #tpu.dot_dimension_numbers<[1], [0], [0], [1], [0, 0, 1, 1], [], []>} : vector<256x8xf32>, vector<8x128xf32>, vector<256x128xf32> -> vector<256x128xf32>
    %85 = arith.addf %75, %84 : vector<256x128xf32>
    %c0_66 = arith.constant 0 : index
    %c2_67 = arith.constant 2 : index
    %c2_68 = arith.constant 2 : index
    %c0_69 = arith.constant 0 : index
    %86 = tpu.strided_load %arg1[%c0_66, %c2_67, %c2_68, %c0_69] {strides = array<i32: 1, 1, 2, 1>} : memref<1x34x34x8xf32, #tpu.memory_space<vmem>>, vector<1x32x16x8xf32>
    %87 = vector.shape_cast %86 : vector<1x32x16x8xf32> to vector<32x16x8xf32>
    %88 = vector.shape_cast %87 : vector<32x16x8xf32> to vector<16x2x16x8xf32>
    %89 = vector.extract_strided_slice %88 {offsets = [0, 0, 0, 0], sizes = [16, 1, 16, 8], strides = [1, 1, 1, 1]} : vector<16x2x16x8xf32> to vector<16x1x16x8xf32>
    %90 = vector.shape_cast %89 : vector<16x1x16x8xf32> to vector<16x16x8xf32>
    %91 = vector.shape_cast %90 : vector<16x16x8xf32> to vector<256x8xf32>
    %c8 = arith.constant 8 : index
    %c0_70 = arith.constant 0 : index
    %c0_71 = arith.constant 0 : index
    %92 = vector.load %arg2[%c8, %c0_70, %c0_71] : memref<9x8x128xf32, #tpu.memory_space<vmem>>, vector<1x8x128xf32>
    %93 = vector.shape_cast %92 : vector<1x8x128xf32> to vector<8x128xf32>
    %cst_72 = arith.constant dense<0.000000e+00> : vector<256x128xf32>
    %94 = tpu.matmul %91, %93, %cst_72 {dimension_numbers = #tpu.dot_dimension_numbers<[1], [0], [0], [1], [0, 0, 1, 1], [], []>} : vector<256x8xf32>, vector<8x128xf32>, vector<256x128xf32> -> vector<256x128xf32>
    %95 = arith.addf %85, %94 : vector<256x128xf32>
    %96 = vector.broadcast %4 : vector<1x128xf32> to vector<256x128xf32>
    %97 = arith.addf %95, %96 : vector<256x128xf32>
    %cst_73 = arith.constant 0.000000e+00 : f32
    %98 = vector.broadcast %cst_73 : f32 to vector<256x128xf32>
    %99 = arith.maximumf %97, %98 : vector<256x128xf32>
    %100 = vector.shape_cast %99 : vector<256x128xf32> to vector<16x16x128xf32>
    %c1_74 = arith.constant 1 : index
    %c8_75 = arith.constant 8 : index
    %c0_76 = arith.constant 0 : index
    %101 = vector.load %arg7[%c1_74, %c8_75, %c0_76] : memref<18x24x128xf32, #tpu.memory_space<vmem>>, vector<16x16x128xf32>
    tpu.vector_store %arg7[%c1_74, %c8_75, %c0_76], %100 {strides = array<i32>} : memref<18x24x128xf32, #tpu.memory_space<vmem>>, vector<16x16x128xf32>,
    %c1_77 = arith.constant 1 : index
    %c0_78 = arith.constant 0 : index
    %102 = vector.load %arg5[%c1_77, %c0_78] : memref<3x128xf32, #tpu.memory_space<vmem>>, vector<1x128xf32>
    %cst_79 = arith.constant 0.000000e+00 : f32
    %103 = vector.broadcast %cst_79 : f32 to vector<64x128xf32>
    %c0_80 = arith.constant 0 : index
    %c7_81 = arith.constant 7 : index
    %c0_82 = arith.constant 0 : index
    %104 = tpu.strided_load %arg7[%c0_80, %c7_81, %c0_82] {strides = array<i32: 1, 2, 1>} : memref<18x24x128xf32, #tpu.memory_space<vmem>>, vector<16x8x128xf32>
    %105 = vector.shape_cast %104 : vector<16x8x128xf32> to vector<8x2x8x128xf32>
    %106 = vector.extract_strided_slice %105 {offsets = [0, 0, 0, 0], sizes = [8, 1, 8, 128], strides = [1, 1, 1, 1]} : vector<8x2x8x128xf32> to vector<8x1x8x128xf32>
    %107 = vector.shape_cast %106 : vector<8x1x8x128xf32> to vector<8x8x128xf32>
    %108 = vector.shape_cast %107 : vector<8x8x128xf32> to vector<64x128xf32>
    %c0_83 = arith.constant 0 : index
    %c0_84 = arith.constant 0 : index
    %c0_85 = arith.constant 0 : index
    %109 = vector.load %arg3[%c0_83, %c0_84, %c0_85] : memref<9x128x128xf32, #tpu.memory_space<vmem>>, vector<1x128x128xf32>
    %110 = vector.shape_cast %109 : vector<1x128x128xf32> to vector<128x128xf32>
    %cst_86 = arith.constant dense<0.000000e+00> : vector<64x128xf32>
    %111 = tpu.matmul %108, %110, %cst_86 {dimension_numbers = #tpu.dot_dimension_numbers<[1], [0], [0], [1], [0, 0, 1, 1], [], []>} : vector<64x128xf32>, vector<128x128xf32>, vector<64x128xf32> -> vector<64x128xf32>
    %112 = arith.addf %103, %111 : vector<64x128xf32>
    %c0_87 = arith.constant 0 : index
    %c8_88 = arith.constant 8 : index
    %c0_89 = arith.constant 0 : index
    %113 = tpu.strided_load %arg7[%c0_87, %c8_88, %c0_89] {strides = array<i32: 1, 2, 1>} : memref<18x24x128xf32, #tpu.memory_space<vmem>>, vector<16x8x128xf32>
    %114 = vector.shape_cast %113 : vector<16x8x128xf32> to vector<8x2x8x128xf32>
    %115 = vector.extract_strided_slice %114 {offsets = [0, 0, 0, 0], sizes = [8, 1, 8, 128], strides = [1, 1, 1, 1]} : vector<8x2x8x128xf32> to vector<8x1x8x128xf32>
    %116 = vector.shape_cast %115 : vector<8x1x8x128xf32> to vector<8x8x128xf32>
    %117 = vector.shape_cast %116 : vector<8x8x128xf32> to vector<64x128xf32>
    %c1_90 = arith.constant 1 : index
    %c0_91 = arith.constant 0 : index
    %c0_92 = arith.constant 0 : index
    %118 = vector.load %arg3[%c1_90, %c0_91, %c0_92] : memref<9x128x128xf32, #tpu.memory_space<vmem>>, vector<1x128x128xf32>
    %119 = vector.shape_cast %118 : vector<1x128x128xf32> to vector<128x128xf32>
    %cst_93 = arith.constant dense<0.000000e+00> : vector<64x128xf32>
    %120 = tpu.matmul %117, %119, %cst_93 {dimension_numbers = #tpu.dot_dimension_numbers<[1], [0], [0], [1], [0, 0, 1, 1], [], []>} : vector<64x128xf32>, vector<128x128xf32>, vector<64x128xf32> -> vector<64x128xf32>
    %121 = arith.addf %112, %120 : vector<64x128xf32>
    %c0_94 = arith.constant 0 : index
    %c9 = arith.constant 9 : index
    %c0_95 = arith.constant 0 : index
    %122 = tpu.strided_load %arg7[%c0_94, %c9, %c0_95] {strides = array<i32: 1, 2, 1>} : memref<18x24x128xf32, #tpu.memory_space<vmem>>, vector<16x8x128xf32>
    %123 = vector.shape_cast %122 : vector<16x8x128xf32> to vector<8x2x8x128xf32>
    %124 = vector.extract_strided_slice %123 {offsets = [0, 0, 0, 0], sizes = [8, 1, 8, 128], strides = [1, 1, 1, 1]} : vector<8x2x8x128xf32> to vector<8x1x8x128xf32>
    %125 = vector.shape_cast %124 : vector<8x1x8x128xf32> to vector<8x8x128xf32>
    %126 = vector.shape_cast %125 : vector<8x8x128xf32> to vector<64x128xf32>
    %c2_96 = arith.constant 2 : index
    %c0_97 = arith.constant 0 : index
    %c0_98 = arith.constant 0 : index
    %127 = vector.load %arg3[%c2_96, %c0_97, %c0_98] : memref<9x128x128xf32, #tpu.memory_space<vmem>>, vector<1x128x128xf32>
    %128 = vector.shape_cast %127 : vector<1x128x128xf32> to vector<128x128xf32>
    %cst_99 = arith.constant dense<0.000000e+00> : vector<64x128xf32>
    %129 = tpu.matmul %126, %128, %cst_99 {dimension_numbers = #tpu.dot_dimension_numbers<[1], [0], [0], [1], [0, 0, 1, 1], [], []>} : vector<64x128xf32>, vector<128x128xf32>, vector<64x128xf32> -> vector<64x128xf32>
    %130 = arith.addf %121, %129 : vector<64x128xf32>
    %c1_100 = arith.constant 1 : index
    %c7_101 = arith.constant 7 : index
    %c0_102 = arith.constant 0 : index
    %131 = tpu.strided_load %arg7[%c1_100, %c7_101, %c0_102] {strides = array<i32: 1, 2, 1>} : memref<18x24x128xf32, #tpu.memory_space<vmem>>, vector<16x8x128xf32>
    %132 = vector.shape_cast %131 : vector<16x8x128xf32> to vector<8x2x8x128xf32>
    %133 = vector.extract_strided_slice %132 {offsets = [0, 0, 0, 0], sizes = [8, 1, 8, 128], strides = [1, 1, 1, 1]} : vector<8x2x8x128xf32> to vector<8x1x8x128xf32>
    %134 = vector.shape_cast %133 : vector<8x1x8x128xf32> to vector<8x8x128xf32>
    %135 = vector.shape_cast %134 : vector<8x8x128xf32> to vector<64x128xf32>
    %c3_103 = arith.constant 3 : index
    %c0_104 = arith.constant 0 : index
    %c0_105 = arith.constant 0 : index
    %136 = vector.load %arg3[%c3_103, %c0_104, %c0_105] : memref<9x128x128xf32, #tpu.memory_space<vmem>>, vector<1x128x128xf32>
    %137 = vector.shape_cast %136 : vector<1x128x128xf32> to vector<128x128xf32>
    %cst_106 = arith.constant dense<0.000000e+00> : vector<64x128xf32>
    %138 = tpu.matmul %135, %137, %cst_106 {dimension_numbers = #tpu.dot_dimension_numbers<[1], [0], [0], [1], [0, 0, 1, 1], [], []>} : vector<64x128xf32>, vector<128x128xf32>, vector<64x128xf32> -> vector<64x128xf32>
    %139 = arith.addf %130, %138 : vector<64x128xf32>
    %c1_107 = arith.constant 1 : index
    %c8_108 = arith.constant 8 : index
    %c0_109 = arith.constant 0 : index
    %140 = tpu.strided_load %arg7[%c1_107, %c8_108, %c0_109] {strides = array<i32: 1, 2, 1>} : memref<18x24x128xf32, #tpu.memory_space<vmem>>, vector<16x8x128xf32>
    %141 = vector.shape_cast %140 : vector<16x8x128xf32> to vector<8x2x8x128xf32>
    %142 = vector.extract_strided_slice %141 {offsets = [0, 0, 0, 0], sizes = [8, 1, 8, 128], strides = [1, 1, 1, 1]} : vector<8x2x8x128xf32> to vector<8x1x8x128xf32>
    %143 = vector.shape_cast %142 : vector<8x1x8x128xf32> to vector<8x8x128xf32>
    %144 = vector.shape_cast %143 : vector<8x8x128xf32> to vector<64x128xf32>
    %c4_110 = arith.constant 4 : index
    %c0_111 = arith.constant 0 : index
    %c0_112 = arith.constant 0 : index
    %145 = vector.load %arg3[%c4_110, %c0_111, %c0_112] : memref<9x128x128xf32, #tpu.memory_space<vmem>>, vector<1x128x128xf32>
    %146 = vector.shape_cast %145 : vector<1x128x128xf32> to vector<128x128xf32>
    %cst_113 = arith.constant dense<0.000000e+00> : vector<64x128xf32>
    %147 = tpu.matmul %144, %146, %cst_113 {dimension_numbers = #tpu.dot_dimension_numbers<[1], [0], [0], [1], [0, 0, 1, 1], [], []>} : vector<64x128xf32>, vector<128x128xf32>, vector<64x128xf32> -> vector<64x128xf32>
    %148 = arith.addf %139, %147 : vector<64x128xf32>
    %c1_114 = arith.constant 1 : index
    %c9_115 = arith.constant 9 : index
    %c0_116 = arith.constant 0 : index
    %149 = tpu.strided_load %arg7[%c1_114, %c9_115, %c0_116] {strides = array<i32: 1, 2, 1>} : memref<18x24x128xf32, #tpu.memory_space<vmem>>, vector<16x8x128xf32>
    %150 = vector.shape_cast %149 : vector<16x8x128xf32> to vector<8x2x8x128xf32>
    %151 = vector.extract_strided_slice %150 {offsets = [0, 0, 0, 0], sizes = [8, 1, 8, 128], strides = [1, 1, 1, 1]} : vector<8x2x8x128xf32> to vector<8x1x8x128xf32>
    %152 = vector.shape_cast %151 : vector<8x1x8x128xf32> to vector<8x8x128xf32>
    %153 = vector.shape_cast %152 : vector<8x8x128xf32> to vector<64x128xf32>
    %c5_117 = arith.constant 5 : index
    %c0_118 = arith.constant 0 : index
    %c0_119 = arith.constant 0 : index
    %154 = vector.load %arg3[%c5_117, %c0_118, %c0_119] : memref<9x128x128xf32, #tpu.memory_space<vmem>>, vector<1x128x128xf32>
    %155 = vector.shape_cast %154 : vector<1x128x128xf32> to vector<128x128xf32>
    %cst_120 = arith.constant dense<0.000000e+00> : vector<64x128xf32>
    %156 = tpu.matmul %153, %155, %cst_120 {dimension_numbers = #tpu.dot_dimension_numbers<[1], [0], [0], [1], [0, 0, 1, 1], [], []>} : vector<64x128xf32>, vector<128x128xf32>, vector<64x128xf32> -> vector<64x128xf32>
    %157 = arith.addf %148, %156 : vector<64x128xf32>
    %c2_121 = arith.constant 2 : index
    %c7_122 = arith.constant 7 : index
    %c0_123 = arith.constant 0 : index
    %158 = tpu.strided_load %arg7[%c2_121, %c7_122, %c0_123] {strides = array<i32: 1, 2, 1>} : memref<18x24x128xf32, #tpu.memory_space<vmem>>, vector<16x8x128xf32>
    %159 = vector.shape_cast %158 : vector<16x8x128xf32> to vector<8x2x8x128xf32>
    %160 = vector.extract_strided_slice %159 {offsets = [0, 0, 0, 0], sizes = [8, 1, 8, 128], strides = [1, 1, 1, 1]} : vector<8x2x8x128xf32> to vector<8x1x8x128xf32>
    %161 = vector.shape_cast %160 : vector<8x1x8x128xf32> to vector<8x8x128xf32>
    %162 = vector.shape_cast %161 : vector<8x8x128xf32> to vector<64x128xf32>
    %c6_124 = arith.constant 6 : index
    %c0_125 = arith.constant 0 : index
    %c0_126 = arith.constant 0 : index
    %163 = vector.load %arg3[%c6_124, %c0_125, %c0_126] : memref<9x128x128xf32, #tpu.memory_space<vmem>>, vector<1x128x128xf32>
    %164 = vector.shape_cast %163 : vector<1x128x128xf32> to vector<128x128xf32>
    %cst_127 = arith.constant dense<0.000000e+00> : vector<64x128xf32>
    %165 = tpu.matmul %162, %164, %cst_127 {dimension_numbers = #tpu.dot_dimension_numbers<[1], [0], [0], [1], [0, 0, 1, 1], [], []>} : vector<64x128xf32>, vector<128x128xf32>, vector<64x128xf32> -> vector<64x128xf32>
    %166 = arith.addf %157, %165 : vector<64x128xf32>
    %c2_128 = arith.constant 2 : index
    %c8_129 = arith.constant 8 : index
    %c0_130 = arith.constant 0 : index
    %167 = tpu.strided_load %arg7[%c2_128, %c8_129, %c0_130] {strides = array<i32: 1, 2, 1>} : memref<18x24x128xf32, #tpu.memory_space<vmem>>, vector<16x8x128xf32>
    %168 = vector.shape_cast %167 : vector<16x8x128xf32> to vector<8x2x8x128xf32>
    %169 = vector.extract_strided_slice %168 {offsets = [0, 0, 0, 0], sizes = [8, 1, 8, 128], strides = [1, 1, 1, 1]} : vector<8x2x8x128xf32> to vector<8x1x8x128xf32>
    %170 = vector.shape_cast %169 : vector<8x1x8x128xf32> to vector<8x8x128xf32>
    %171 = vector.shape_cast %170 : vector<8x8x128xf32> to vector<64x128xf32>
    %c7_131 = arith.constant 7 : index
    %c0_132 = arith.constant 0 : index
    %c0_133 = arith.constant 0 : index
    %172 = vector.load %arg3[%c7_131, %c0_132, %c0_133] : memref<9x128x128xf32, #tpu.memory_space<vmem>>, vector<1x128x128xf32>
    %173 = vector.shape_cast %172 : vector<1x128x128xf32> to vector<128x128xf32>
    %cst_134 = arith.constant dense<0.000000e+00> : vector<64x128xf32>
    %174 = tpu.matmul %171, %173, %cst_134 {dimension_numbers = #tpu.dot_dimension_numbers<[1], [0], [0], [1], [0, 0, 1, 1], [], []>} : vector<64x128xf32>, vector<128x128xf32>, vector<64x128xf32> -> vector<64x128xf32>
    %175 = arith.addf %166, %174 : vector<64x128xf32>
    %c2_135 = arith.constant 2 : index
    %c9_136 = arith.constant 9 : index
    %c0_137 = arith.constant 0 : index
    %176 = tpu.strided_load %arg7[%c2_135, %c9_136, %c0_137] {strides = array<i32: 1, 2, 1>} : memref<18x24x128xf32, #tpu.memory_space<vmem>>, vector<16x8x128xf32>
    %177 = vector.shape_cast %176 : vector<16x8x128xf32> to vector<8x2x8x128xf32>
    %178 = vector.extract_strided_slice %177 {offsets = [0, 0, 0, 0], sizes = [8, 1, 8, 128], strides = [1, 1, 1, 1]} : vector<8x2x8x128xf32> to vector<8x1x8x128xf32>
    %179 = vector.shape_cast %178 : vector<8x1x8x128xf32> to vector<8x8x128xf32>
    %180 = vector.shape_cast %179 : vector<8x8x128xf32> to vector<64x128xf32>
    %c8_138 = arith.constant 8 : index
    %c0_139 = arith.constant 0 : index
    %c0_140 = arith.constant 0 : index
    %181 = vector.load %arg3[%c8_138, %c0_139, %c0_140] : memref<9x128x128xf32, #tpu.memory_space<vmem>>, vector<1x128x128xf32>
    %182 = vector.shape_cast %181 : vector<1x128x128xf32> to vector<128x128xf32>
    %cst_141 = arith.constant dense<0.000000e+00> : vector<64x128xf32>
    %183 = tpu.matmul %180, %182, %cst_141 {dimension_numbers = #tpu.dot_dimension_numbers<[1], [0], [0], [1], [0, 0, 1, 1], [], []>} : vector<64x128xf32>, vector<128x128xf32>, vector<64x128xf32> -> vector<64x128xf32>
    %184 = arith.addf %175, %183 : vector<64x128xf32>
    %185 = vector.broadcast %102 : vector<1x128xf32> to vector<64x128xf32>
    %186 = arith.addf %184, %185 : vector<64x128xf32>
    %cst_142 = arith.constant 0.000000e+00 : f32
    %187 = vector.broadcast %cst_142 : f32 to vector<64x128xf32>
    %188 = arith.maximumf %186, %187 : vector<64x128xf32>
    %189 = vector.shape_cast %188 : vector<64x128xf32> to vector<8x8x128xf32>
    %c1_143 = arith.constant 1 : index
    %c8_144 = arith.constant 8 : index
    %c0_145 = arith.constant 0 : index
    %190 = vector.load %arg8[%c1_143, %c8_144, %c0_145] : memref<10x24x128xf32, #tpu.memory_space<vmem>>, vector<8x8x128xf32>
    tpu.vector_store %arg8[%c1_143, %c8_144, %c0_145], %189 {strides = array<i32>} : memref<10x24x128xf32, #tpu.memory_space<vmem>>, vector<8x8x128xf32>,
    %c2_146 = arith.constant 2 : index
    %c0_147 = arith.constant 0 : index
    %191 = vector.load %arg5[%c2_146, %c0_147] : memref<3x128xf32, #tpu.memory_space<vmem>>, vector<1x128xf32>
    %cst_148 = arith.constant 0.000000e+00 : f32
    %192 = vector.broadcast %cst_148 : f32 to vector<32x128xf32>
    %c0_149 = arith.constant 0 : index
    %c7_150 = arith.constant 7 : index
    %c0_151 = arith.constant 0 : index
    %193 = tpu.strided_load %arg8[%c0_149, %c7_150, %c0_151] {strides = array<i32: 1, 2, 1>} : memref<10x24x128xf32, #tpu.memory_space<vmem>>, vector<8x8x128xf32>
    %194 = vector.shape_cast %193 : vector<8x8x128xf32> to vector<4x2x8x128xf32>
    %195 = vector.extract_strided_slice %194 {offsets = [0, 0, 0, 0], sizes = [4, 1, 8, 128], strides = [1, 1, 1, 1]} : vector<4x2x8x128xf32> to vector<4x1x8x128xf32>
    %196 = vector.shape_cast %195 : vector<4x1x8x128xf32> to vector<4x8x128xf32>
    %197 = vector.shape_cast %196 : vector<4x8x128xf32> to vector<32x128xf32>
    %c0_152 = arith.constant 0 : index
    %c0_153 = arith.constant 0 : index
    %c0_154 = arith.constant 0 : index
    %198 = vector.load %arg4[%c0_152, %c0_153, %c0_154] : memref<9x128x128xf32, #tpu.memory_space<vmem>>, vector<1x128x128xf32>
    %199 = vector.shape_cast %198 : vector<1x128x128xf32> to vector<128x128xf32>
    %cst_155 = arith.constant dense<0.000000e+00> : vector<32x128xf32>
    %200 = tpu.matmul %197, %199, %cst_155 {dimension_numbers = #tpu.dot_dimension_numbers<[1], [0], [0], [1], [0, 0, 1, 1], [], []>} : vector<32x128xf32>, vector<128x128xf32>, vector<32x128xf32> -> vector<32x128xf32>
    %201 = arith.addf %192, %200 : vector<32x128xf32>
    %c0_156 = arith.constant 0 : index
    %c8_157 = arith.constant 8 : index
    %c0_158 = arith.constant 0 : index
    %202 = tpu.strided_load %arg8[%c0_156, %c8_157, %c0_158] {strides = array<i32: 1, 2, 1>} : memref<10x24x128xf32, #tpu.memory_space<vmem>>, vector<8x8x128xf32>
    %203 = vector.shape_cast %202 : vector<8x8x128xf32> to vector<4x2x8x128xf32>
    %204 = vector.extract_strided_slice %203 {offsets = [0, 0, 0, 0], sizes = [4, 1, 8, 128], strides = [1, 1, 1, 1]} : vector<4x2x8x128xf32> to vector<4x1x8x128xf32>
    %205 = vector.shape_cast %204 : vector<4x1x8x128xf32> to vector<4x8x128xf32>
    %206 = vector.shape_cast %205 : vector<4x8x128xf32> to vector<32x128xf32>
    %c1_159 = arith.constant 1 : index
    %c0_160 = arith.constant 0 : index
    %c0_161 = arith.constant 0 : index
    %207 = vector.load %arg4[%c1_159, %c0_160, %c0_161] : memref<9x128x128xf32, #tpu.memory_space<vmem>>, vector<1x128x128xf32>
    %208 = vector.shape_cast %207 : vector<1x128x128xf32> to vector<128x128xf32>
    %cst_162 = arith.constant dense<0.000000e+00> : vector<32x128xf32>
    %209 = tpu.matmul %206, %208, %cst_162 {dimension_numbers = #tpu.dot_dimension_numbers<[1], [0], [0], [1], [0, 0, 1, 1], [], []>} : vector<32x128xf32>, vector<128x128xf32>, vector<32x128xf32> -> vector<32x128xf32>
    %210 = arith.addf %201, %209 : vector<32x128xf32>
    %c0_163 = arith.constant 0 : index
    %c9_164 = arith.constant 9 : index
    %c0_165 = arith.constant 0 : index
    %211 = tpu.strided_load %arg8[%c0_163, %c9_164, %c0_165] {strides = array<i32: 1, 2, 1>} : memref<10x24x128xf32, #tpu.memory_space<vmem>>, vector<8x8x128xf32>
    %212 = vector.shape_cast %211 : vector<8x8x128xf32> to vector<4x2x8x128xf32>
    %213 = vector.extract_strided_slice %212 {offsets = [0, 0, 0, 0], sizes = [4, 1, 8, 128], strides = [1, 1, 1, 1]} : vector<4x2x8x128xf32> to vector<4x1x8x128xf32>
    %214 = vector.shape_cast %213 : vector<4x1x8x128xf32> to vector<4x8x128xf32>
    %215 = vector.shape_cast %214 : vector<4x8x128xf32> to vector<32x128xf32>
    %c2_166 = arith.constant 2 : index
    %c0_167 = arith.constant 0 : index
    %c0_168 = arith.constant 0 : index
    %216 = vector.load %arg4[%c2_166, %c0_167, %c0_168] : memref<9x128x128xf32, #tpu.memory_space<vmem>>, vector<1x128x128xf32>
    %217 = vector.shape_cast %216 : vector<1x128x128xf32> to vector<128x128xf32>
    %cst_169 = arith.constant dense<0.000000e+00> : vector<32x128xf32>
    %218 = tpu.matmul %215, %217, %cst_169 {dimension_numbers = #tpu.dot_dimension_numbers<[1], [0], [0], [1], [0, 0, 1, 1], [], []>} : vector<32x128xf32>, vector<128x128xf32>, vector<32x128xf32> -> vector<32x128xf32>
    %219 = arith.addf %210, %218 : vector<32x128xf32>
    %c1_170 = arith.constant 1 : index
    %c7_171 = arith.constant 7 : index
    %c0_172 = arith.constant 0 : index
    %220 = tpu.strided_load %arg8[%c1_170, %c7_171, %c0_172] {strides = array<i32: 1, 2, 1>} : memref<10x24x128xf32, #tpu.memory_space<vmem>>, vector<8x8x128xf32>
    %221 = vector.shape_cast %220 : vector<8x8x128xf32> to vector<4x2x8x128xf32>
    %222 = vector.extract_strided_slice %221 {offsets = [0, 0, 0, 0], sizes = [4, 1, 8, 128], strides = [1, 1, 1, 1]} : vector<4x2x8x128xf32> to vector<4x1x8x128xf32>
    %223 = vector.shape_cast %222 : vector<4x1x8x128xf32> to vector<4x8x128xf32>
    %224 = vector.shape_cast %223 : vector<4x8x128xf32> to vector<32x128xf32>
    %c3_173 = arith.constant 3 : index
    %c0_174 = arith.constant 0 : index
    %c0_175 = arith.constant 0 : index
    %225 = vector.load %arg4[%c3_173, %c0_174, %c0_175] : memref<9x128x128xf32, #tpu.memory_space<vmem>>, vector<1x128x128xf32>
    %226 = vector.shape_cast %225 : vector<1x128x128xf32> to vector<128x128xf32>
    %cst_176 = arith.constant dense<0.000000e+00> : vector<32x128xf32>
    %227 = tpu.matmul %224, %226, %cst_176 {dimension_numbers = #tpu.dot_dimension_numbers<[1], [0], [0], [1], [0, 0, 1, 1], [], []>} : vector<32x128xf32>, vector<128x128xf32>, vector<32x128xf32> -> vector<32x128xf32>
    %228 = arith.addf %219, %227 : vector<32x128xf32>
    %c1_177 = arith.constant 1 : index
    %c8_178 = arith.constant 8 : index
    %c0_179 = arith.constant 0 : index
    %229 = tpu.strided_load %arg8[%c1_177, %c8_178, %c0_179] {strides = array<i32: 1, 2, 1>} : memref<10x24x128xf32, #tpu.memory_space<vmem>>, vector<8x8x128xf32>
    %230 = vector.shape_cast %229 : vector<8x8x128xf32> to vector<4x2x8x128xf32>
    %231 = vector.extract_strided_slice %230 {offsets = [0, 0, 0, 0], sizes = [4, 1, 8, 128], strides = [1, 1, 1, 1]} : vector<4x2x8x128xf32> to vector<4x1x8x128xf32>
    %232 = vector.shape_cast %231 : vector<4x1x8x128xf32> to vector<4x8x128xf32>
    %233 = vector.shape_cast %232 : vector<4x8x128xf32> to vector<32x128xf32>
    %c4_180 = arith.constant 4 : index
    %c0_181 = arith.constant 0 : index
    %c0_182 = arith.constant 0 : index
    %234 = vector.load %arg4[%c4_180, %c0_181, %c0_182] : memref<9x128x128xf32, #tpu.memory_space<vmem>>, vector<1x128x128xf32>
    %235 = vector.shape_cast %234 : vector<1x128x128xf32> to vector<128x128xf32>
    %cst_183 = arith.constant dense<0.000000e+00> : vector<32x128xf32>
    %236 = tpu.matmul %233, %235, %cst_183 {dimension_numbers = #tpu.dot_dimension_numbers<[1], [0], [0], [1], [0, 0, 1, 1], [], []>} : vector<32x128xf32>, vector<128x128xf32>, vector<32x128xf32> -> vector<32x128xf32>
    %237 = arith.addf %228, %236 : vector<32x128xf32>
    %c1_184 = arith.constant 1 : index
    %c9_185 = arith.constant 9 : index
    %c0_186 = arith.constant 0 : index
    %238 = tpu.strided_load %arg8[%c1_184, %c9_185, %c0_186] {strides = array<i32: 1, 2, 1>} : memref<10x24x128xf32, #tpu.memory_space<vmem>>, vector<8x8x128xf32>
    %239 = vector.shape_cast %238 : vector<8x8x128xf32> to vector<4x2x8x128xf32>
    %240 = vector.extract_strided_slice %239 {offsets = [0, 0, 0, 0], sizes = [4, 1, 8, 128], strides = [1, 1, 1, 1]} : vector<4x2x8x128xf32> to vector<4x1x8x128xf32>
    %241 = vector.shape_cast %240 : vector<4x1x8x128xf32> to vector<4x8x128xf32>
    %242 = vector.shape_cast %241 : vector<4x8x128xf32> to vector<32x128xf32>
    %c5_187 = arith.constant 5 : index
    %c0_188 = arith.constant 0 : index
    %c0_189 = arith.constant 0 : index
    %243 = vector.load %arg4[%c5_187, %c0_188, %c0_189] : memref<9x128x128xf32, #tpu.memory_space<vmem>>, vector<1x128x128xf32>
    %244 = vector.shape_cast %243 : vector<1x128x128xf32> to vector<128x128xf32>
    %cst_190 = arith.constant dense<0.000000e+00> : vector<32x128xf32>
    %245 = tpu.matmul %242, %244, %cst_190 {dimension_numbers = #tpu.dot_dimension_numbers<[1], [0], [0], [1], [0, 0, 1, 1], [], []>} : vector<32x128xf32>, vector<128x128xf32>, vector<32x128xf32> -> vector<32x128xf32>
    %246 = arith.addf %237, %245 : vector<32x128xf32>
    %c2_191 = arith.constant 2 : index
    %c7_192 = arith.constant 7 : index
    %c0_193 = arith.constant 0 : index
    %247 = tpu.strided_load %arg8[%c2_191, %c7_192, %c0_193] {strides = array<i32: 1, 2, 1>} : memref<10x24x128xf32, #tpu.memory_space<vmem>>, vector<8x8x128xf32>
    %248 = vector.shape_cast %247 : vector<8x8x128xf32> to vector<4x2x8x128xf32>
    %249 = vector.extract_strided_slice %248 {offsets = [0, 0, 0, 0], sizes = [4, 1, 8, 128], strides = [1, 1, 1, 1]} : vector<4x2x8x128xf32> to vector<4x1x8x128xf32>
    %250 = vector.shape_cast %249 : vector<4x1x8x128xf32> to vector<4x8x128xf32>
    %251 = vector.shape_cast %250 : vector<4x8x128xf32> to vector<32x128xf32>
    %c6_194 = arith.constant 6 : index
    %c0_195 = arith.constant 0 : index
    %c0_196 = arith.constant 0 : index
    %252 = vector.load %arg4[%c6_194, %c0_195, %c0_196] : memref<9x128x128xf32, #tpu.memory_space<vmem>>, vector<1x128x128xf32>
    %253 = vector.shape_cast %252 : vector<1x128x128xf32> to vector<128x128xf32>
    %cst_197 = arith.constant dense<0.000000e+00> : vector<32x128xf32>
    %254 = tpu.matmul %251, %253, %cst_197 {dimension_numbers = #tpu.dot_dimension_numbers<[1], [0], [0], [1], [0, 0, 1, 1], [], []>} : vector<32x128xf32>, vector<128x128xf32>, vector<32x128xf32> -> vector<32x128xf32>
    %255 = arith.addf %246, %254 : vector<32x128xf32>
    %c2_198 = arith.constant 2 : index
    %c8_199 = arith.constant 8 : index
    %c0_200 = arith.constant 0 : index
    %256 = tpu.strided_load %arg8[%c2_198, %c8_199, %c0_200] {strides = array<i32: 1, 2, 1>} : memref<10x24x128xf32, #tpu.memory_space<vmem>>, vector<8x8x128xf32>
    %257 = vector.shape_cast %256 : vector<8x8x128xf32> to vector<4x2x8x128xf32>
    %258 = vector.extract_strided_slice %257 {offsets = [0, 0, 0, 0], sizes = [4, 1, 8, 128], strides = [1, 1, 1, 1]} : vector<4x2x8x128xf32> to vector<4x1x8x128xf32>
    %259 = vector.shape_cast %258 : vector<4x1x8x128xf32> to vector<4x8x128xf32>
    %260 = vector.shape_cast %259 : vector<4x8x128xf32> to vector<32x128xf32>
    %c7_201 = arith.constant 7 : index
    %c0_202 = arith.constant 0 : index
    %c0_203 = arith.constant 0 : index
    %261 = vector.load %arg4[%c7_201, %c0_202, %c0_203] : memref<9x128x128xf32, #tpu.memory_space<vmem>>, vector<1x128x128xf32>
    %262 = vector.shape_cast %261 : vector<1x128x128xf32> to vector<128x128xf32>
    %cst_204 = arith.constant dense<0.000000e+00> : vector<32x128xf32>
    %263 = tpu.matmul %260, %262, %cst_204 {dimension_numbers = #tpu.dot_dimension_numbers<[1], [0], [0], [1], [0, 0, 1, 1], [], []>} : vector<32x128xf32>, vector<128x128xf32>, vector<32x128xf32> -> vector<32x128xf32>
    %264 = arith.addf %255, %263 : vector<32x128xf32>
    %c2_205 = arith.constant 2 : index
    %c9_206 = arith.constant 9 : index
    %c0_207 = arith.constant 0 : index
    %265 = tpu.strided_load %arg8[%c2_205, %c9_206, %c0_207] {strides = array<i32: 1, 2, 1>} : memref<10x24x128xf32, #tpu.memory_space<vmem>>, vector<8x8x128xf32>
    %266 = vector.shape_cast %265 : vector<8x8x128xf32> to vector<4x2x8x128xf32>
    %267 = vector.extract_strided_slice %266 {offsets = [0, 0, 0, 0], sizes = [4, 1, 8, 128], strides = [1, 1, 1, 1]} : vector<4x2x8x128xf32> to vector<4x1x8x128xf32>
    %268 = vector.shape_cast %267 : vector<4x1x8x128xf32> to vector<4x8x128xf32>
    %269 = vector.shape_cast %268 : vector<4x8x128xf32> to vector<32x128xf32>
    %c8_208 = arith.constant 8 : index
    %c0_209 = arith.constant 0 : index
    %c0_210 = arith.constant 0 : index
    %270 = vector.load %arg4[%c8_208, %c0_209, %c0_210] : memref<9x128x128xf32, #tpu.memory_space<vmem>>, vector<1x128x128xf32>
    %271 = vector.shape_cast %270 : vector<1x128x128xf32> to vector<128x128xf32>
    %cst_211 = arith.constant dense<0.000000e+00> : vector<32x128xf32>
    %272 = tpu.matmul %269, %271, %cst_211 {dimension_numbers = #tpu.dot_dimension_numbers<[1], [0], [0], [1], [0, 0, 1, 1], [], []>} : vector<32x128xf32>, vector<128x128xf32>, vector<32x128xf32> -> vector<32x128xf32>
    %273 = arith.addf %264, %272 : vector<32x128xf32>
    %274 = vector.broadcast %191 : vector<1x128xf32> to vector<32x128xf32>
    %275 = arith.addf %273, %274 : vector<32x128xf32>
    %cst_212 = arith.constant 0.000000e+00 : f32
    %276 = vector.broadcast %cst_212 : f32 to vector<32x128xf32>
    %277 = arith.maximumf %275, %276 : vector<32x128xf32>
    %278 = tpu.iota {dimensions = array<i32: 0>} : vector<32x128xi32>
    %c8_i32 = arith.constant 8 : i32
    %c0_i32 = arith.constant 0 : i32
    %279 = arith.cmpi eq, %c8_i32, %c0_i32 : i32
    %c1_i32 = arith.constant 1 : i32
    %280 = arith.select %279, %c1_i32, %c8_i32 : i32
    %281 = vector.broadcast %280 : i32 to vector<32x128xi32>
    %282 = arith.remsi %278, %281 : vector<32x128xi32>
    %c0_i32_213 = arith.constant 0 : i32
    %283 = vector.broadcast %c0_i32_213 : i32 to vector<32x128xi32>
    %284 = arith.cmpi ne, %282, %283 : vector<32x128xi32>
    %c0_i32_214 = arith.constant 0 : i32
    %285 = vector.broadcast %c0_i32_214 : i32 to vector<32x128xi32>
    %286 = arith.cmpi slt, %282, %285 : vector<32x128xi32>
    %c0_i32_215 = arith.constant 0 : i32
    %287 = arith.cmpi slt, %280, %c0_i32_215 : i32
    %288 = vector.broadcast %287 : i1 to vector<32x128xi1>
    %289 = vector.broadcast %288 : vector<32x128xi1> to vector<32x128xi1>
    %290 = arith.xori %286, %289 : vector<32x128xi1>
    %291 = arith.andi %290, %284 : vector<32x128xi1>
    %292 = vector.broadcast %280 : i32 to vector<32x128xi32>
    %293 = arith.addi %282, %292 : vector<32x128xi32>
    %294 = arith.select %291, %293, %282 : vector<32x128xi1>, vector<32x128xi32>
    %c4_i32 = arith.constant 4 : i32
    %295 = vector.broadcast %c4_i32 : i32 to vector<32x128xi32>
    %296 = arith.cmpi slt, %294, %295 : vector<32x128xi32>
    %cst_216 = arith.constant 0.000000e+00 : f32
    %297 = vector.broadcast %cst_216 : f32 to vector<32x128xf32>
    %298 = arith.select %296, %277, %297 : vector<32x128xi1>, vector<32x128xf32>
    %cst_217 = arith.constant dense<0.000000e+00> : vector<128xf32>
    %299 = vector.multi_reduction <add>, %298, %cst_217 [0] : vector<32x128xf32> to vector<128xf32>
    %300 = vector.shape_cast %299 : vector<128xf32> to vector<1x128xf32>
    %cst_218 = arith.constant 6.250000e-02 : f32
    %301 = vector.broadcast %cst_218 : f32 to vector<1x128xf32>
    %302 = arith.mulf %300, %301 : vector<1x128xf32>
    %c0_219 = arith.constant 0 : index
    %c0_220 = arith.constant 0 : index
    %c0_221 = arith.constant 0 : index
    %303 = vector.load %arg6[%c0_219, %c0_220, %c0_221] : memref<1x1x128xf32, #tpu.memory_space<vmem>>, vector<1x1x128xf32>
    %304 = vector.shape_cast %303 : vector<1x1x128xf32> to vector<1x128xf32>
    %305 = vector.shape_cast %302 : vector<1x128xf32> to vector<1x1x128xf32>
    tpu.vector_store %arg6[%c0_219, %c0_220, %c0_221], %305 {strides = array<i32>} : memref<1x1x128xf32, #tpu.memory_space<vmem>>, vector<1x1x128xf32>,
    return
  }
  func.func @transform_0(%arg0: i32) -> (i32, i32, i32, i32) {
    %c0_i32 = arith.constant 0 : i32
    %c0_i32_0 = arith.constant 0 : i32
    %c0_i32_1 = arith.constant 0 : i32
    %c0_i32_2 = arith.constant 0 : i32
    return %arg0, %c0_i32, %c0_i32_0, %c0_i32_1 : i32, i32, i32, i32
  }
  func.func @transform_1(%arg0: i32) -> (i32, i32, i32) {
    %c0_i32 = arith.constant 0 : i32
    %c0_i32_0 = arith.constant 0 : i32
    %c0_i32_1 = arith.constant 0 : i32
    %c0_i32_2 = arith.constant 0 : i32
    return %c0_i32, %c0_i32_0, %c0_i32_1 : i32, i32, i32
  }
  func.func @transform_2(%arg0: i32) -> (i32, i32, i32) {
    %c0_i32 = arith.constant 0 : i32
    %c0_i32_0 = arith.constant 0 : i32
    %c0_i32_1 = arith.constant 0 : i32
    %c0_i32_2 = arith.constant 0 : i32
    return %c0_i32, %c0_i32_0, %c0_i32_1 : i32, i32, i32
  }
  func.func @transform_3(%arg0: i32) -> (i32, i32, i32) {
    %c0_i32 = arith.constant 0 : i32
    %c0_i32_0 = arith.constant 0 : i32
    %c0_i32_1 = arith.constant 0 : i32
    %c0_i32_2 = arith.constant 0 : i32
    return %c0_i32, %c0_i32_0, %c0_i32_1 : i32, i32, i32
  }
  func.func @transform_4(%arg0: i32) -> (i32, i32) {
    %c0_i32 = arith.constant 0 : i32
    %c0_i32_0 = arith.constant 0 : i32
    %c0_i32_1 = arith.constant 0 : i32
    return %c0_i32, %c0_i32_0 : i32, i32
  }
  func.func @transform_5(%arg0: i32) -> (i32, i32, i32) {
    %c0_i32 = arith.constant 0 : i32
    %c0_i32_0 = arith.constant 0 : i32
    %c0_i32_1 = arith.constant 0 : i32
    return %arg0, %c0_i32, %c0_i32_0 : i32, i32, i32
  }
}

</mosaic_0001>

<bundles_post_ra>
// kernel: convnet_forward.1
= control target key start
LH: loop header
LB: loop body
LE: loop exit
PB: predicated region body
PF: predicated region fallthrough
CT: control target
= control target key end

     0   :  { %10 = vsyncpa [#allocation5], 0  ;;  %s12088_s0 = inlined_call_operand.vmem [shape: f32[2,34,34,8], index: 0, kind: input, shape index: {}]   ;;  %s12089_s1 = inlined_call_operand.vmem [shape: f32[9,8,128], index: 1, kind: input, shape index: {}]   ;;  %s12090_s2 = inlined_call_operand.vmem [shape: f32[9,128,128], index: 2, kind: input, shape index: {}]   ;;  %s12091_s3 = inlined_call_operand.vmem [shape: f32[9,128,128], index: 3, kind: input, shape index: {}]   ;;  %s12092_s4 = inlined_call_operand.vmem [shape: f32[3,128], index: 4, kind: input, shape index: {}]   ;;  %s12093_s5 = inlined_call_operand.hbm [shape: f32[2,1,128], index: 5, kind: output, shape index: {}]  }
   0x1   :  { %12 = vsyncpa [#allocation5 + $0x1], 0  ;;  %s9741_s18 = smov 0   ;;  %s9743_s19 = smov 0  }
   0x2   :  { %s9745_s20 = smov 0   ;;  %s9747_s21 = smov 0  }
   0x3 LB: > { %s9762_s22 = sadd.s32 4294967295, %s9707_s21   ;;  %s6875_s23 = sadd.s32 4294967294, %s9707_s21   ;;  %s9707_s21 = sphi %s9747_s21, %s12323_s21   ;;  %s9703_s20 = sphi %s9745_s20, %s12322_s20   ;;  %s9699_s19 = sphi %s9743_s19, %s12321_s19   ;;  %s9695_s18 = sphi %s9741_s18, %s12320_s18  }
   0x4   : > { %s9766_s24 = sadd.s32 1, %s9707_s21   ;;  %s135_s25 = sadd.s32 1, %s9703_s20 }
   0x5   : > { %s132_s26 = ssub.s32 %s9707_s21, %s9766_s24  ;;  %p145_p0 = scmp.ne.s32.totalorder %s9703_s20, %s9699_s19 }
   0x6   : > { %p133_p1 = scmp.eq.s32.totalorder %s132_s26, 0  ;;  %p146_p2 = scmp.eq.s32.totalorder %s9762_s22, 1 }
   0x7   : > { %p151_p3 = scmp.ne.s32.totalorder %s9699_s19, %s9695_s18  ;;  %p152_p4 = scmp.eq.s32.totalorder %s6875_s23, 1 }
   0x8   : > { %s9777_s27 = scalar_select %p133_p1, %s9703_s20, %s135_s25  }
   0x9   : > { %p9779_p5 = por %p146_p2, %p145_p0  ;;  %p9783_p6 = por %p152_p4, %p151_p3 }
   0xa   : > { %p6878_p7 = scmp.ge.s32.totalorder %s9707_s21, 1  ;;  %p190_p8 = scmp.lt.s32.totalorder %s9707_s21, 3 }
   0xc   : > { %p191_p9 = pnand %p6878_p7, %p190_p8 }
   0xe   : > { %194 = sbr.rel (%p191_p9) target bundleno = 1261 (0x4ed), region = 40 }
  0x13   : > { %v6943_v0 = vld [vmem:[%s12089_s1 + $0x8] sm:$0xff]  ;;  %v370_v1 = vld [vmem:[%s12089_s1] sm:$0xff]  ;;  %p217_p10 = scmp.lt.s32.totalorder %s9762_s22, 1  ;;  %v7040_v2 = vld [vmem:[%s12089_s1 + $0x10] sm:$0xff]  ;;  %vm437_vm0 = vcmask 64512   ;;  %s215_s25 = sand.u32 1, %s9699_s19  }
  0x14   : > { %8418 = vmatprep.subr.mxu0 %v6943_v0  ;;  %8468 = vmatprep.subr.mxu1 %v370_v1  ;;  %v7105_v3 = vld [vmem:[%s12089_s1 + $0x18] sm:$0xff]  ;;  %v9821_v10 = vld [vmem:[%s12089_s1 + $0x20] sm:$0xff]  ;;  %v9826_v11 = vld [vmem:[%s12089_s1 + $0x28] sm:$0xff]  ;;  %s7722_s26 = sshll.u32 %s9762_s22, 4  ;;  %s216_s30 = scalar_lea.vmem [#allocation4], %s215_s25 }
  0x15   : > { %8419 = vmatpush3.msra.mxu0 %v6943_v0  ;;  %s218_s13 = scalar_select %p217_p10, %s9762_s22, 1  ;;  %8469 = vmatpush3.msra.mxu1 %v370_v1 }
  0x16   : > { %8518 = vmatprep.subr.mxu0 %v7040_v2  ;;  %8568 = vmatprep.subr.mxu1 %v7105_v3  ;;  %s6558_s6 = sshll.u32 %s216_s30, 4  ;;  %s6556_s9 = scalar_lea.hbm %s12093_s5, %s7722_s26  ;;  %s6559_s6 = int_to_ptr.vmem [resolvable:$true] %s6558_s6 }
  0x17   : > { %s9606_s14 = smul.u32 1360, %s218_s13  ;;  %s6546_s10 = scalar_lea.sflag [#allocation5], %s215_s25 }
  0x18   : > { %s9647_s11 = scalar_lea.vmem %s6559_s6, 16  ;;  %s9710_s12 = smov [#allocation4]  }
  0x19   : > { %s9806_s17 = scalar_lea.vmem %s12088_s0, %s9606_s14  ;;  %p9648_p11 = scmp.ne.s32.totalorder %s6559_s6, %s9647_s11 }
  0x1a   : > { %v6911_v4 = vld [vmem:[%s9806_s17 + $0x1] ss:$2 sm:$0xff]  ;;  %v307_v5 = vld [vmem:[%s9806_s17] ss:$2 sm:$0xff]  ;;  %v6912_v6 = vld [vmem:[%s9806_s17 + $0x11] ss:$2 sm:$0xff] }
  0x1b   : > { %8420 = vmatprep.mubr.msk.f32.mxu0 %vm437_vm0, %v6911_v4  ;;  %8470 = vmatprep.mubr.msk.f32.mxu1 %vm437_vm0, %v307_v5  ;;  %v6880_v7 = vld [vmem:[%s9806_s17 + $0x10] ss:$2 sm:$0xff]  ;;  %v6913_v8 = vld [vmem:[%s9806_s17 + $0x51] ss:$2 sm:$0xff]  ;;  %v6914_v12 = vld [vmem:[%s9806_s17 + $0x61] ss:$2 sm:$0xff]  ;;  %p9649_p12 = pnand %p9648_p11, %p9779_p5 }
  0x1c   : > { %v6881_v9 = vld [vmem:[%s9806_s17 + $0x50] ss:$2 sm:$0xff]  ;;  %8421 = vmatmul.mubr.msk.f32.vlgmr.msra.gmra.mxu0 %vm437_vm0, %v6912_v6  ;;  %8471 = vmatmul.mubr.msk.f32.vlgmr.msra.gmra.mxu1 %vm437_vm0, %v6880_v7  ;;  %v6882_v13 = vld [vmem:[%s9806_s17 + $0x60] ss:$2 sm:$0xff]  ;;  %v6915_v14 = vld [vmem:[%s9806_s17 + $0xa1] ss:$2 sm:$0xff] }
  0x1d   : > { %8519 = vmatpush3.msra.mxu0 %v7040_v2  ;;  %8423 = vmatprep.mubr.msk.f32.mxu0 %vm437_vm0, %v6913_v8  ;;  %v6883_v15 = vld [vmem:[%s9806_s17 + $0xa0] ss:$2 sm:$0xff]  ;;  %v6916_v16 = vld [vmem:[%s9806_s17 + $0xb1] ss:$2 sm:$0xff]  ;;  %v6884_v17 = vld [vmem:[%s9806_s17 + $0xb0] ss:$2 sm:$0xff]  ;;  %p9650_p13 = pneg %p9649_p12 }
  0x1e   : > { %8473 = vmatprep.mubr.msk.f32.mxu1 %vm437_vm0, %v6881_v9  ;;  %8569 = vmatpush3.msra.mxu1 %v7105_v3  ;;  %v6917_v18 = vld [vmem:[%s9806_s17 + $0xf1] ss:$2 sm:$0xff]  ;;  %v6885_v19 = vld [vmem:[%s9806_s17 + $0xf0] ss:$2 sm:$0xff]  ;;  %v6918_v20 = vld [vmem:[%s9806_s17 + $0x101] ss:$2 sm:$0xff] }
  0x1f   : > { %8618 = vmatprep.subr.mxu0 %v9821_v10  ;;  %8668 = vmatprep.subr.mxu1 %v9826_v11  ;;  %v6886_v21 = vld [vmem:[%s9806_s17 + $0x100] ss:$2 sm:$0xff]  ;;  %v6919_v22 = vld [vmem:[%s9806_s17 + $0x141] ss:$2 sm:$0xff]  ;;  %v6920_v24 = vld [vmem:[%s9806_s17 + $0x151] ss:$2 sm:$0xff] }
  0x20   : > { %8424 = vmatmul.mubr.msk.f32.gmra.mxu0 %vm437_vm0, %v6914_v12  ;;  %8474 = vmatmul.mubr.msk.f32.gmra.mxu1 %vm437_vm0, %v6882_v13  ;;  %v6887_v23 = vld [vmem:[%s9806_s17 + $0x140] ss:$2 sm:$0xff]  ;;  %v6888_v25 = vld [vmem:[%s9806_s17 + $0x150] ss:$2 sm:$0xff]  ;;  %v6921_v26 = vld [vmem:[%s9806_s17 + $0x191] ss:$2 sm:$0xff] }
  0x21   : > { %8426 = vmatprep.mubr.msk.f32.mxu0 %vm437_vm0, %v6915_v14  ;;  %8476 = vmatprep.mubr.msk.f32.mxu1 %vm437_vm0, %v6883_v15  ;;  %v6889_v27 = vld [vmem:[%s9806_s17 + $0x190] ss:$2 sm:$0xff]  ;;  %v6922_v28 = vld [vmem:[%s9806_s17 + $0x1a1] ss:$2 sm:$0xff]  ;;  %v6890_v29 = vld [vmem:[%s9806_s17 + $0x1a0] ss:$2 sm:$0xff] }
  0x22   : > { %v6923_v30 = vld [vmem:[%s9806_s17 + $0x1e1] ss:$2 sm:$0xff]  ;;  %v6891_v31 = vld [vmem:[%s9806_s17 + $0x1e0] ss:$2 sm:$0xff]  ;;  %v6924_v32 = vld [vmem:[%s9806_s17 + $0x1f1] ss:$2 sm:$0xff] }
  0x23   : > { %v6892_v33 = vld [vmem:[%s9806_s17 + $0x1f0] ss:$2 sm:$0xff]  ;;  %v6925_v34 = vld [vmem:[%s9806_s17 + $0x231] ss:$2 sm:$0xff]  ;;  %v6926_v36 = vld [vmem:[%s9806_s17 + $0x241] ss:$2 sm:$0xff] }
  0x24   : > { %8427 = vmatmul.mubr.msk.f32.gmra.mxu0 %vm437_vm0, %v6916_v16  ;;  %8477 = vmatmul.mubr.msk.f32.gmra.mxu1 %vm437_vm0, %v6884_v17  ;;  %v6893_v35 = vld [vmem:[%s9806_s17 + $0x230] ss:$2 sm:$0xff]  ;;  %v6894_v37 = vld [vmem:[%s9806_s17 + $0x240] ss:$2 sm:$0xff]  ;;  %v6927_v38 = vld [vmem:[%s9806_s17 + $0x281] ss:$2 sm:$0xff] }
  0x25   : > { %8429 = vmatprep.mubr.msk.f32.mxu0 %vm437_vm0, %v6917_v18  ;;  %8479 = vmatprep.mubr.msk.f32.mxu1 %vm437_vm0, %v6885_v19  ;;  %v6895_v39 = vld [vmem:[%s9806_s17 + $0x280] ss:$2 sm:$0xff]  ;;  %v6928_v40 = vld [vmem:[%s9806_s17 + $0x291] ss:$2 sm:$0xff]  ;;  %v6896_v41 = vld [vmem:[%s9806_s17 + $0x290] ss:$2 sm:$0xff] }
  0x26   : > { %v6929_v42 = vld [vmem:[%s9806_s17 + $0x2d1] ss:$2 sm:$0xff]  ;;  %v6897_v43 = vld [vmem:[%s9806_s17 + $0x2d0] ss:$2 sm:$0xff]  ;;  %v6930_v44 = vld [vmem:[%s9806_s17 + $0x2e1] ss:$2 sm:$0xff] }
  0x27   : > { %v6898_v45 = vld [vmem:[%s9806_s17 + $0x2e0] ss:$2 sm:$0xff]  ;;  %v6931_v46 = vld [vmem:[%s9806_s17 + $0x321] ss:$2 sm:$0xff]  ;;  %v6932_v48 = vld [vmem:[%s9806_s17 + $0x331] ss:$2 sm:$0xff] }
  0x28   : > { %8430 = vmatmul.mubr.msk.f32.gmra.mxu0 %vm437_vm0, %v6918_v20  ;;  %8480 = vmatmul.mubr.msk.f32.gmra.mxu1 %vm437_vm0, %v6886_v21  ;;  %v6899_v47 = vld [vmem:[%s9806_s17 + $0x320] ss:$2 sm:$0xff]  ;;  %v6900_v49 = vld [vmem:[%s9806_s17 + $0x330] ss:$2 sm:$0xff]  ;;  %v6933_v50 = vld [vmem:[%s9806_s17 + $0x371] ss:$2 sm:$0xff] }
  0x29   : > { %8432 = vmatprep.mubr.msk.f32.mxu0 %vm437_vm0, %v6919_v22  ;;  %8482 = vmatprep.mubr.msk.f32.mxu1 %vm437_vm0, %v6887_v23  ;;  %v6901_v51 = vld [vmem:[%s9806_s17 + $0x370] ss:$2 sm:$0xff]  ;;  %v6934_v52 = vld [vmem:[%s9806_s17 + $0x381] ss:$2 sm:$0xff]  ;;  %v6902_v53 = vld [vmem:[%s9806_s17 + $0x380] ss:$2 sm:$0xff] }
  0x2a   : > { %v6935_v54 = vld [vmem:[%s9806_s17 + $0x3c1] ss:$2 sm:$0xff]  ;;  %v6903_v55 = vld [vmem:[%s9806_s17 + $0x3c0] ss:$2 sm:$0xff]  ;;  %v6936_v56 = vld [vmem:[%s9806_s17 + $0x3d1] ss:$2 sm:$0xff] }
  0x2b   : > { %v6904_v57 = vld [vmem:[%s9806_s17 + $0x3d0] ss:$2 sm:$0xff]  ;;  %v6937_v58 = vld [vmem:[%s9806_s17 + $0x411] ss:$2 sm:$0xff]  ;;  %v6938_v60 = vld [vmem:[%s9806_s17 + $0x421] ss:$2 sm:$0xff] }
  0x2c   : > { %8433 = vmatmul.mubr.msk.f32.gmra.mxu0 %vm437_vm0, %v6920_v24  ;;  %8483 = vmatmul.mubr.msk.f32.gmra.mxu1 %vm437_vm0, %v6888_v25  ;;  %v6905_v59 = vld [vmem:[%s9806_s17 + $0x410] ss:$2 sm:$0xff]  ;;  %v6906_v61 = vld [vmem:[%s9806_s17 + $0x420] ss:$2 sm:$0xff]  ;;  %v6939_v62 = vld [vmem:[%s9806_s17 + $0x461] ss:$2 sm:$0xff] }
  0x2d   : > { %8435 = vmatprep.mubr.msk.f32.mxu0 %vm437_vm0, %v6921_v26  ;;  %8485 = vmatprep.mubr.msk.f32.mxu1 %vm437_vm0, %v6889_v27  ;;  %v6907_v63 = vld [vmem:[%s9806_s17 + $0x460] ss:$2 sm:$0xff]  ;;  %v6940_v0 = vld [vmem:[%s9806_s17 + $0x471] ss:$2 sm:$0xff]  ;;  %v6908_v1 = vld [vmem:[%s9806_s17 + $0x470] ss:$2 sm:$0xff] }
  0x2e   : > { %v6941_v2 = vld [vmem:[%s9806_s17 + $0x4b1] ss:$2 sm:$0xff]  ;;  %v6909_v3 = vld [vmem:[%s9806_s17 + $0x4b0] ss:$2 sm:$0xff]  ;;  %v6942_v4 = vld [vmem:[%s9806_s17 + $0x4c1] ss:$2 sm:$0xff] }
  0x2f   : > { %v6910_v5 = vld [vmem:[%s9806_s17 + $0x4c0] ss:$2 sm:$0xff]  ;;  %v9961_v14 = vld [vmem:[%s12089_s1 + $0x30] sm:$0xff]  ;;  %v9966_v15 = vld [vmem:[%s12089_s1 + $0x38] sm:$0xff]  ;;  %s9651_s13 = sshll.u32 %s9710_s12, 4  ;;  %s9652_s13 = int_to_ptr.vmem [resolvable:$false] %s9651_s13 }
  0x30   : > { %8436 = vmatmul.mubr.msk.f32.gmra.mxu0 %vm437_vm0, %v6922_v28  ;;  %8486 = vmatmul.mubr.msk.f32.gmra.mxu1 %vm437_vm0, %v6890_v29  ;;  %v7008_v6 = vld [vmem:[%s9806_s17 + $0x2] ss:$2 sm:$0xff]  ;;  %v7009_v8 = vld [vmem:[%s9806_s17 + $0x12] ss:$2 sm:$0xff]  ;;  %s9653_s22 = scalar_lea.vmem %s9652_s13, 32  ;;  %p9654_p0 = scmp.lt.s32.totalorder %s6559_s6, %s9652_s13 }
  0x31   : > { %8438 = vmatprep.mubr.msk.f32.mxu0 %vm437_vm0, %v6923_v30  ;;  %8488 = vmatprep.mubr.msk.f32.mxu1 %vm437_vm0, %v6891_v31  ;;  %v7073_v7 = vld [vmem:[%s9806_s17 + $0x28] ss:$2 sm:$0xff]  ;;  %v7074_v9 = vld [vmem:[%s9806_s17 + $0x38] ss:$2 sm:$0xff]  ;;  %p9655_p1 = scmp.lt.s32.totalorder %s9653_s22, %s9647_s11 }
  0x32   : > { %v7010_v12 = vld [vmem:[%s9806_s17 + $0x52] ss:$2 sm:$0xff]  ;;  %v7011_v16 = vld [vmem:[%s9806_s17 + $0x62] ss:$2 sm:$0xff] }
  0x33   : > { %v7075_v13 = vld [vmem:[%s9806_s17 + $0x78] ss:$2 sm:$0xff]  ;;  %v7076_v17 = vld [vmem:[%s9806_s17 + $0x88] ss:$2 sm:$0xff]  ;;  %p9656_p2 = por %p9655_p1, %p9654_p0 }
  0x34   : > { %8439 = vmatmul.mubr.msk.f32.gmra.mxu0 %vm437_vm0, %v6924_v32  ;;  %8489 = vmatmul.mubr.msk.f32.gmra.mxu1 %vm437_vm0, %v6892_v33  ;;  %v7012_v18 = vld [vmem:[%s9806_s17 + $0xa2] ss:$2 sm:$0xff]  ;;  %v7017_v26 = vld [vmem:[%s9806_s17 + $0x152] ss:$2 sm:$0xff] }
  0x35   : > { %8441 = vmatprep.mubr.msk.f32.mxu0 %vm437_vm0, %v6925_v34  ;;  %8491 = vmatprep.mubr.msk.f32.mxu1 %vm437_vm0, %v6893_v35  ;;  %v7077_v19 = vld [vmem:[%s9806_s17 + $0xc8] ss:$2 sm:$0xff]  ;;  %v7078_v20 = vld [vmem:[%s9806_s17 + $0xd8] ss:$2 sm:$0xff]  ;;  %p9657_p3 = pnand %p9656_p2, %p9650_p13 }
  0x36   : > { %v7079_v21 = vld [vmem:[%s9806_s17 + $0x118] ss:$2 sm:$0xff]  ;;  %v7080_v23 = vld [vmem:[%s9806_s17 + $0x128] ss:$2 sm:$0xff] }
  0x37   : > { %v7015_v22 = vld [vmem:[%s9806_s17 + $0x102] ss:$2 sm:$0xff]  ;;  %v7018_v28 = vld [vmem:[%s9806_s17 + $0x192] ss:$2 sm:$0xff] }
  0x38   : > { %8442 = vmatmul.mubr.msk.f32.gmra.mxu0 %vm437_vm0, %v6926_v36  ;;  %8492 = vmatmul.mubr.msk.f32.gmra.mxu1 %vm437_vm0, %v6894_v37  ;;  %v7016_v24 = vld [vmem:[%s9806_s17 + $0x142] ss:$2 sm:$0xff]  ;;  %v7021_v34 = vld [vmem:[%s9806_s17 + $0x1f2] ss:$2 sm:$0xff] }
  0x39   : > { %8444 = vmatprep.mubr.msk.f32.mxu0 %vm437_vm0, %v6927_v38  ;;  %8494 = vmatprep.mubr.msk.f32.mxu1 %vm437_vm0, %v6895_v39  ;;  %v7081_v25 = vld [vmem:[%s9806_s17 + $0x168] ss:$2 sm:$0xff]  ;;  %v7082_v27 = vld [vmem:[%s9806_s17 + $0x178] ss:$2 sm:$0xff] }
  0x3a   : > { %v7083_v29 = vld [vmem:[%s9806_s17 + $0x1b8] ss:$2 sm:$0xff]  ;;  %v7084_v31 = vld [vmem:[%s9806_s17 + $0x1c8] ss:$2 sm:$0xff] }
  0x3b   : > { %v7019_v30 = vld [vmem:[%s9806_s17 + $0x1a2] ss:$2 sm:$0xff]  ;;  %v7022_v36 = vld [vmem:[%s9806_s17 + $0x232] ss:$2 sm:$0xff] }
  0x3c   : > { %8445 = vmatmul.mubr.msk.f32.gmra.mxu0 %vm437_vm0, %v6928_v40  ;;  %8495 = vmatmul.mubr.msk.f32.gmra.mxu1 %vm437_vm0, %v6896_v41  ;;  %v7020_v32 = vld [vmem:[%s9806_s17 + $0x1e2] ss:$2 sm:$0xff] }
  0x3d   : > { %8447 = vmatprep.mubr.msk.f32.mxu0 %vm437_vm0, %v6929_v42  ;;  %8497 = vmatprep.mubr.msk.f32.mxu1 %vm437_vm0, %v6897_v43  ;;  %v7085_v33 = vld [vmem:[%s9806_s17 + $0x208] ss:$2 sm:$0xff]  ;;  %v7086_v35 = vld [vmem:[%s9806_s17 + $0x218] ss:$2 sm:$0xff] }
  0x3e   : > { %v7087_v37 = vld [vmem:[%s9806_s17 + $0x258] ss:$2 sm:$0xff]  ;;  %v7088_v39 = vld [vmem:[%s9806_s17 + $0x268] ss:$2 sm:$0xff] }
  0x3f   : > { %v7023_v38 = vld [vmem:[%s9806_s17 + $0x242] ss:$2 sm:$0xff]  ;;  %v7025_v42 = vld [vmem:[%s9806_s17 + $0x292] ss:$2 sm:$0xff] }
  0x40   : > { %8448 = vmatmul.mubr.msk.f32.gmra.mxu0 %vm437_vm0, %v6930_v44  ;;  %8498 = vmatmul.mubr.msk.f32.gmra.mxu1 %vm437_vm0, %v6898_v45  ;;  %v7024_v40 = vld [vmem:[%s9806_s17 + $0x282] ss:$2 sm:$0xff]  ;;  %v7026_v44 = vld [vmem:[%s9806_s17 + $0x2d2] ss:$2 sm:$0xff] }
  0x41   : > { %8450 = vmatprep.mubr.msk.f32.mxu0 %vm437_vm0, %v6931_v46  ;;  %8500 = vmatprep.mubr.msk.f32.mxu1 %vm437_vm0, %v6899_v47  ;;  %v7089_v41 = vld [vmem:[%s9806_s17 + $0x2a8] ss:$2 sm:$0xff]  ;;  %v7090_v43 = vld [vmem:[%s9806_s17 + $0x2b8] ss:$2 sm:$0xff] }
  0x42   : > { %v7091_v45 = vld [vmem:[%s9806_s17 + $0x2f8] ss:$2 sm:$0xff]  ;;  %v7092_v47 = vld [vmem:[%s9806_s17 + $0x308] ss:$2 sm:$0xff] }
  0x43   : > { %v7027_v46 = vld [vmem:[%s9806_s17 + $0x2e2] ss:$2 sm:$0xff] }
  0x44   : > { %8451 = vmatmul.mubr.msk.f32.gmra.mxu0 %vm437_vm0, %v6932_v48  ;;  %8501 = vmatmul.mubr.msk.f32.gmra.mxu1 %vm437_vm0, %v6900_v49  ;;  %v7028_v48 = vld [vmem:[%s9806_s17 + $0x322] ss:$2 sm:$0xff] }
  0x45   : > { %8453 = vmatprep.mubr.msk.f32.mxu0 %vm437_vm0, %v6933_v50  ;;  %8503 = vmatprep.mubr.msk.f32.mxu1 %vm437_vm0, %v6901_v51  ;;  %v7093_v49 = vld [vmem:[%s9806_s17 + $0x348] ss:$2 sm:$0xff]  ;;  %v7094_v51 = vld [vmem:[%s9806_s17 + $0x358] ss:$2 sm:$0xff] }
  0x46   : > { %v7029_v50 = vld [vmem:[%s9806_s17 + $0x332] ss:$2 sm:$0xff] }
  0x48   : > { %8454 = vmatmul.mubr.msk.f32.gmra.mxu0 %vm437_vm0, %v6934_v52  ;;  %8504 = vmatmul.mubr.msk.f32.gmra.mxu1 %vm437_vm0, %v6902_v53  ;;  %v7030_v52 = vld [vmem:[%s9806_s17 + $0x372] ss:$2 sm:$0xff] }
  0x49   : > { %8456 = vmatprep.mubr.msk.f32.mxu0 %vm437_vm0, %v6935_v54  ;;  %8506 = vmatprep.mubr.msk.f32.mxu1 %vm437_vm0, %v6903_v55  ;;  %v7095_v53 = vld [vmem:[%s9806_s17 + $0x398] ss:$2 sm:$0xff]  ;;  %v7096_v55 = vld [vmem:[%s9806_s17 + $0x3a8] ss:$2 sm:$0xff] }
  0x4a   : > { %v7031_v54 = vld [vmem:[%s9806_s17 + $0x382] ss:$2 sm:$0xff] }
  0x4c   : > { %8457 = vmatmul.mubr.msk.f32.gmra.mxu0 %vm437_vm0, %v6936_v56  ;;  %8507 = vmatmul.mubr.msk.f32.gmra.mxu1 %vm437_vm0, %v6904_v57  ;;  %v7032_v56 = vld [vmem:[%s9806_s17 + $0x3c2] ss:$2 sm:$0xff] }
  0x4d   : > { %8459 = vmatprep.mubr.msk.f32.mxu0 %vm437_vm0, %v6937_v58  ;;  %8509 = vmatprep.mubr.msk.f32.mxu1 %vm437_vm0, %v6905_v59  ;;  %v7097_v57 = vld [vmem:[%s9806_s17 + $0x3e8] ss:$2 sm:$0xff]  ;;  %v7098_v59 = vld [vmem:[%s9806_s17 + $0x3f8] ss:$2 sm:$0xff] }
  0x4e   : > { %v7033_v58 = vld [vmem:[%s9806_s17 + $0x3d2] ss:$2 sm:$0xff] }
  0x50   : > { %8460 = vmatmul.mubr.msk.f32.gmra.mxu0 %vm437_vm0, %v6938_v60  ;;  %8510 = vmatmul.mubr.msk.f32.gmra.mxu1 %vm437_vm0, %v6906_v61  ;;  %v7034_v60 = vld [vmem:[%s9806_s17 + $0x412] ss:$2 sm:$0xff] }
  0x51   : > { %8462 = vmatprep.mubr.msk.f32.mxu0 %vm437_vm0, %v6939_v62  ;;  %8512 = vmatprep.mubr.msk.f32.mxu1 %vm437_vm0, %v6907_v63  ;;  %v7099_v61 = vld [vmem:[%s9806_s17 + $0x438] ss:$2 sm:$0xff]  ;;  %v7100_v63 = vld [vmem:[%s9806_s17 + $0x448] ss:$2 sm:$0xff] }
  0x52   : > { %v7035_v62 = vld [vmem:[%s9806_s17 + $0x422] ss:$2 sm:$0xff] }
  0x54   : > { %8463 = vmatmul.mubr.msk.f32.gmra.mxu0 %vm437_vm0, %v6940_v0  ;;  %8513 = vmatmul.mubr.msk.f32.gmra.mxu1 %vm437_vm0, %v6908_v1  ;;  %v7036_v0 = vld [vmem:[%s9806_s17 + $0x462] ss:$2 sm:$0xff] }
  0x55   : > { %8465 = vmatprep.mubr.msk.f32.mxu0 %vm437_vm0, %v6941_v2  ;;  %8515 = vmatprep.mubr.msk.f32.mxu1 %vm437_vm0, %v6909_v3  ;;  %v7101_v1 = vld [vmem:[%s9806_s17 + $0x488] ss:$2 sm:$0xff]  ;;  %v7102_v3 = vld [vmem:[%s9806_s17 + $0x498] ss:$2 sm:$0xff] }
  0x56   : > { %v7037_v2 = vld [vmem:[%s9806_s17 + $0x472] ss:$2 sm:$0xff] }
  0x58   : > { %8466 = vmatmul.mubr.msk.f32.gmra.mxu0 %vm437_vm0, %v6942_v4  ;;  %8516 = vmatmul.mubr.msk.f32.gmra.mxu1 %vm437_vm0, %v6910_v5  ;;  %v7038_v4 = vld [vmem:[%s9806_s17 + $0x4b2] ss:$2 sm:$0xff] }
  0x59   : > { %8520 = vmatprep.mubr.msk.f32.mxu0 %vm437_vm0, %v7008_v6  ;;  %8570 = vmatprep.mubr.msk.f32.mxu1 %vm437_vm0, %v7073_v7  ;;  %v7103_v5 = vld [vmem:[%s9806_s17 + $0x4d8] ss:$2 sm:$0xff]  ;;  %v7104_v7 = vld [vmem:[%s9806_s17 + $0x4e8] ss:$2 sm:$0xff] }
  0x5a   : > { %v7039_v6 = vld [vmem:[%s9806_s17 + $0x4c2] ss:$2 sm:$0xff] }
  0x5c   : > { %8521 = vmatmul.mubr.msk.f32.vlgmr.msra.gmra.mxu0 %vm437_vm0, %v7009_v8  ;;  %8571 = vmatmul.mubr.msk.f32.vlgmr.msra.gmra.mxu1 %vm437_vm0, %v7074_v9  ;;  %v7138_v8 = vld [vmem:[%s9806_s17 + $0x29] ss:$2 sm:$0xff]  ;;  %v7203_v9 = vld [vmem:[%s9806_s17 + $0x2a] ss:$2 sm:$0xff] }
  0x5d   : > { %8619 = vmatpush3.msra.mxu0 %v9821_v10  ;;  %8523 = vmatprep.mubr.msk.f32.mxu0 %vm437_vm0, %v7010_v12  ;;  %v7013_v10 = vld [vmem:[%s9806_s17 + $0xb2] ss:$2 sm:$0xff]  ;;  %v7139_v12 = vld [vmem:[%s9806_s17 + $0x39] ss:$2 sm:$0xff] }
  0x5e   : > { %8573 = vmatprep.mubr.msk.f32.mxu1 %vm437_vm0, %v7075_v13  ;;  %8669 = vmatpush3.msra.mxu1 %v9826_v11  ;;  %v7014_v11 = vld [vmem:[%s9806_s17 + $0xf2] ss:$2 sm:$0xff] }
  0x5f   : > { %8718 = vmatprep.subr.mxu0 %v9961_v14  ;;  %8768 = vmatprep.subr.mxu1 %v9966_v15  ;;  %v7204_v13 = vld [vmem:[%s9806_s17 + $0x3a] ss:$2 sm:$0xff] }
  0x60   : > { %8524 = vmatmul.mubr.msk.f32.gmra.mxu0 %vm437_vm0, %v7011_v16  ;;  %8574 = vmatmul.mubr.msk.f32.gmra.mxu1 %vm437_vm0, %v7076_v17  ;;  %v7140_v16 = vld [vmem:[%s9806_s17 + $0x79] ss:$2 sm:$0xff]  ;;  %v7205_v17 = vld [vmem:[%s9806_s17 + $0x7a] ss:$2 sm:$0xff] }
  0x61   : > { %8526 = vmatprep.mubr.msk.f32.mxu0 %vm437_vm0, %v7012_v18  ;;  %8576 = vmatprep.mubr.msk.f32.mxu1 %vm437_vm0, %v7077_v19  ;;  %v10103_v18 = vld [vmem:[%s12089_s1 + $0x40] sm:$0xff]  ;;  %v7141_v19 = vld [vmem:[%s9806_s17 + $0x89] ss:$2 sm:$0xff] }
  0x64   : > { %8527 = vmatmul.mubr.msk.f32.gmra.mxu0 %vm437_vm0, %v7013_v10  ;;  %8577 = vmatmul.mubr.msk.f32.gmra.mxu1 %vm437_vm0, %v7078_v20  ;;  %v7206_v10 = vld [vmem:[%s9806_s17 + $0x8a] ss:$2 sm:$0xff]  ;;  %v7142_v20 = vld [vmem:[%s9806_s17 + $0xc9] ss:$2 sm:$0xff] }
  0x65   : > { %8529 = vmatprep.mubr.msk.f32.mxu0 %vm437_vm0, %v7014_v11  ;;  %8579 = vmatprep.mubr.msk.f32.mxu1 %vm437_vm0, %v7079_v21  ;;  %v7207_v11 = vld [vmem:[%s9806_s17 + $0xca] ss:$2 sm:$0xff]  ;;  %v7208_v21 = vld [vmem:[%s9806_s17 + $0xda] ss:$2 sm:$0xff] }
  0x68   : > { %8530 = vmatmul.mubr.msk.f32.gmra.mxu0 %vm437_vm0, %v7015_v22  ;;  %8580 = vmatmul.mubr.msk.f32.gmra.mxu1 %vm437_vm0, %v7080_v23  ;;  %v7144_v22 = vld [vmem:[%s9806_s17 + $0x119] ss:$2 sm:$0xff]  ;;  %v7209_v23 = vld [vmem:[%s9806_s17 + $0x11a] ss:$2 sm:$0xff] }
  0x69   : > { %8532 = vmatprep.mubr.msk.f32.mxu0 %vm437_vm0, %v7016_v24  ;;  %8582 = vmatprep.mubr.msk.f32.mxu1 %vm437_vm0, %v7081_v25  ;;  %v7210_v24 = vld [vmem:[%s9806_s17 + $0x12a] ss:$2 sm:$0xff]  ;;  %v7146_v25 = vld [vmem:[%s9806_s17 + $0x169] ss:$2 sm:$0xff] }
  0x6c   : > { %8533 = vmatmul.mubr.msk.f32.gmra.mxu0 %vm437_vm0, %v7017_v26  ;;  %8583 = vmatmul.mubr.msk.f32.gmra.mxu1 %vm437_vm0, %v7082_v27  ;;  %v7211_v26 = vld [vmem:[%s9806_s17 + $0x16a] ss:$2 sm:$0xff]  ;;  %v7147_v27 = vld [vmem:[%s9806_s17 + $0x179] ss:$2 sm:$0xff] }
  0x6d   : > { %8535 = vmatprep.mubr.msk.f32.mxu0 %vm437_vm0, %v7018_v28  ;;  %8585 = vmatprep.mubr.msk.f32.mxu1 %vm437_vm0, %v7083_v29  ;;  %v7212_v28 = vld [vmem:[%s9806_s17 + $0x17a] ss:$2 sm:$0xff]  ;;  %v7148_v29 = vld [vmem:[%s9806_s17 + $0x1b9] ss:$2 sm:$0xff] }
  0x70   : > { %8536 = vmatmul.mubr.msk.f32.gmra.mxu0 %vm437_vm0, %v7019_v30  ;;  %8586 = vmatmul.mubr.msk.f32.gmra.mxu1 %vm437_vm0, %v7084_v31  ;;  %v7213_v30 = vld [vmem:[%s9806_s17 + $0x1ba] ss:$2 sm:$0xff]  ;;  %v7149_v31 = vld [vmem:[%s9806_s17 + $0x1c9] ss:$2 sm:$0xff] }
  0x71   : > { %8538 = vmatprep.mubr.msk.f32.mxu0 %vm437_vm0, %v7020_v32  ;;  %8588 = vmatprep.mubr.msk.f32.mxu1 %vm437_vm0, %v7085_v33  ;;  %v7214_v32 = vld [vmem:[%s9806_s17 + $0x1ca] ss:$2 sm:$0xff]  ;;  %v7150_v33 = vld [vmem:[%s9806_s17 + $0x209] ss:$2 sm:$0xff] }
  0x74   : > { %8539 = vmatmul.mubr.msk.f32.gmra.mxu0 %vm437_vm0, %v7021_v34  ;;  %8589 = vmatmul.mubr.msk.f32.gmra.mxu1 %vm437_vm0, %v7086_v35  ;;  %v7215_v34 = vld [vmem:[%s9806_s17 + $0x20a] ss:$2 sm:$0xff]  ;;  %v7151_v35 = vld [vmem:[%s9806_s17 + $0x219] ss:$2 sm:$0xff] }
  0x75   : > { %8541 = vmatprep.mubr.msk.f32.mxu0 %vm437_vm0, %v7022_v36  ;;  %8591 = vmatprep.mubr.msk.f32.mxu1 %vm437_vm0, %v7087_v37  ;;  %v7216_v36 = vld [vmem:[%s9806_s17 + $0x21a] ss:$2 sm:$0xff]  ;;  %v7152_v37 = vld [vmem:[%s9806_s17 + $0x259] ss:$2 sm:$0xff] }
  0x78   : > { %8542 = vmatmul.mubr.msk.f32.gmra.mxu0 %vm437_vm0, %v7023_v38  ;;  %8592 = vmatmul.mubr.msk.f32.gmra.mxu1 %vm437_vm0, %v7088_v39  ;;  %v7217_v38 = vld [vmem:[%s9806_s17 + $0x25a] ss:$2 sm:$0xff]  ;;  %v7153_v39 = vld [vmem:[%s9806_s17 + $0x269] ss:$2 sm:$0xff] }
  0x79   : > { %8544 = vmatprep.mubr.msk.f32.mxu0 %vm437_vm0, %v7024_v40  ;;  %8594 = vmatprep.mubr.msk.f32.mxu1 %vm437_vm0, %v7089_v41  ;;  %v7218_v40 = vld [vmem:[%s9806_s17 + $0x26a] ss:$2 sm:$0xff]  ;;  %v7154_v41 = vld [vmem:[%s9806_s17 + $0x2a9] ss:$2 sm:$0xff] }
  0x7c   : > { %8545 = vmatmul.mubr.msk.f32.gmra.mxu0 %vm437_vm0, %v7025_v42  ;;  %8595 = vmatmul.mubr.msk.f32.gmra.mxu1 %vm437_vm0, %v7090_v43  ;;  %v7219_v42 = vld [vmem:[%s9806_s17 + $0x2aa] ss:$2 sm:$0xff]  ;;  %v7155_v43 = vld [vmem:[%s9806_s17 + $0x2b9] ss:$2 sm:$0xff] }
  0x7d   : > { %8547 = vmatprep.mubr.msk.f32.mxu0 %vm437_vm0, %v7026_v44  ;;  %8597 = vmatprep.mubr.msk.f32.mxu1 %vm437_vm0, %v7091_v45  ;;  %v7220_v44 = vld [vmem:[%s9806_s17 + $0x2ba] ss:$2 sm:$0xff]  ;;  %v7156_v45 = vld [vmem:[%s9806_s17 + $0x2f9] ss:$2 sm:$0xff] }
  0x80   : > { %8548 = vmatmul.mubr.msk.f32.gmra.mxu0 %vm437_vm0, %v7027_v46  ;;  %8598 = vmatmul.mubr.msk.f32.gmra.mxu1 %vm437_vm0, %v7092_v47  ;;  %v7221_v46 = vld [vmem:[%s9806_s17 + $0x2fa] ss:$2 sm:$0xff]  ;;  %v7157_v47 = vld [vmem:[%s9806_s17 + $0x309] ss:$2 sm:$0xff] }
  0x81   : > { %8550 = vmatprep.mubr.msk.f32.mxu0 %vm437_vm0, %v7028_v48  ;;  %8600 = vmatprep.mubr.msk.f32.mxu1 %vm437_vm0, %v7093_v49  ;;  %v7222_v48 = vld [vmem:[%s9806_s17 + $0x30a] ss:$2 sm:$0xff]  ;;  %v7158_v49 = vld [vmem:[%s9806_s17 + $0x349] ss:$2 sm:$0xff] }
  0x84   : > { %8551 = vmatmul.mubr.msk.f32.gmra.mxu0 %vm437_vm0, %v7029_v50  ;;  %8601 = vmatmul.mubr.msk.f32.gmra.mxu1 %vm437_vm0, %v7094_v51  ;;  %v7223_v50 = vld [vmem:[%s9806_s17 + $0x34a] ss:$2 sm:$0xff]  ;;  %v7159_v51 = vld [vmem:[%s9806_s17 + $0x359] ss:$2 sm:$0xff] }
  0x85   : > { %8553 = vmatprep.mubr.msk.f32.mxu0 %vm437_vm0, %v7030_v52  ;;  %8603 = vmatprep.mubr.msk.f32.mxu1 %vm437_vm0, %v7095_v53  ;;  %v7224_v52 = vld [vmem:[%s9806_s17 + $0x35a] ss:$2 sm:$0xff]  ;;  %v7160_v53 = vld [vmem:[%s9806_s17 + $0x399] ss:$2 sm:$0xff] }
  0x88   : > { %8554 = vmatmul.mubr.msk.f32.gmra.mxu0 %vm437_vm0, %v7031_v54  ;;  %8604 = vmatmul.mubr.msk.f32.gmra.mxu1 %vm437_vm0, %v7096_v55  ;;  %v7225_v54 = vld [vmem:[%s9806_s17 + $0x39a] ss:$2 sm:$0xff]  ;;  %v7161_v55 = vld [vmem:[%s9806_s17 + $0x3a9] ss:$2 sm:$0xff] }
  0x89   : > { %8556 = vmatprep.mubr.msk.f32.mxu0 %vm437_vm0, %v7032_v56  ;;  %8606 = vmatprep.mubr.msk.f32.mxu1 %vm437_vm0, %v7097_v57  ;;  %v7226_v56 = vld [vmem:[%s9806_s17 + $0x3aa] ss:$2 sm:$0xff]  ;;  %v7162_v57 = vld [vmem:[%s9806_s17 + $0x3e9] ss:$2 sm:$0xff] }
  0x8c   : > { %8557 = vmatmul.mubr.msk.f32.gmra.mxu0 %vm437_vm0, %v7033_v58  ;;  %8607 = vmatmul.mubr.msk.f32.gmra.mxu1 %vm437_vm0, %v7098_v59  ;;  %v7227_v58 = vld [vmem:[%s9806_s17 + $0x3ea] ss:$2 sm:$0xff]  ;;  %v7163_v59 = vld [vmem:[%s9806_s17 + $0x3f9] ss:$2 sm:$0xff] }
  0x8d   : > { %8559 = vmatprep.mubr.msk.f32.mxu0 %vm437_vm0, %v7034_v60  ;;  %8609 = vmatprep.mubr.msk.f32.mxu1 %vm437_vm0, %v7099_v61  ;;  %v7228_v60 = vld [vmem:[%s9806_s17 + $0x3fa] ss:$2 sm:$0xff]  ;;  %v7164_v61 = vld [vmem:[%s9806_s17 + $0x439] ss:$2 sm:$0xff] }
  0x90   : > { %8560 = vmatmul.mubr.msk.f32.gmra.mxu0 %vm437_vm0, %v7035_v62  ;;  %8610 = vmatmul.mubr.msk.f32.gmra.mxu1 %vm437_vm0, %v7100_v63  ;;  %v7229_v62 = vld [vmem:[%s9806_s17 + $0x43a] ss:$2 sm:$0xff]  ;;  %v7165_v63 = vld [vmem:[%s9806_s17 + $0x449] ss:$2 sm:$0xff] }
  0x91   : > { %8562 = vmatprep.mubr.msk.f32.mxu0 %vm437_vm0, %v7036_v0  ;;  %8612 = vmatprep.mubr.msk.f32.mxu1 %vm437_vm0, %v7101_v1  ;;  %v7230_v0 = vld [vmem:[%s9806_s17 + $0x44a] ss:$2 sm:$0xff]  ;;  %v7166_v1 = vld [vmem:[%s9806_s17 + $0x489] ss:$2 sm:$0xff] }
  0x94   : > { %8563 = vmatmul.mubr.msk.f32.gmra.mxu0 %vm437_vm0, %v7037_v2  ;;  %8613 = vmatmul.mubr.msk.f32.gmra.mxu1 %vm437_vm0, %v7102_v3  ;;  %v7231_v2 = vld [vmem:[%s9806_s17 + $0x48a] ss:$2 sm:$0xff]  ;;  %v7167_v3 = vld [vmem:[%s9806_s17 + $0x499] ss:$2 sm:$0xff] }
  0x95   : > { %8565 = vmatprep.mubr.msk.f32.mxu0 %vm437_vm0, %v7038_v4  ;;  %8615 = vmatprep.mubr.msk.f32.mxu1 %vm437_vm0, %v7103_v5  ;;  %v7232_v4 = vld [vmem:[%s9806_s17 + $0x49a] ss:$2 sm:$0xff]  ;;  %v7168_v5 = vld [vmem:[%s9806_s17 + $0x4d9] ss:$2 sm:$0xff] }
  0x98   : > { %8566 = vmatmul.mubr.msk.f32.gmra.mxu0 %vm437_vm0, %v7039_v6  ;;  %8616 = vmatmul.mubr.msk.f32.gmra.mxu1 %vm437_vm0, %v7104_v7  ;;  %v7233_v6 = vld [vmem:[%s9806_s17 + $0x4da] ss:$2 sm:$0xff]  ;;  %v7169_v7 = vld [vmem:[%s9806_s17 + $0x4e9] ss:$2 sm:$0xff] }
  0x99   : > { %8620 = vmatprep.mubr.msk.f32.mxu0 %vm437_vm0, %v7138_v8  ;;  %8670 = vmatprep.mubr.msk.f32.mxu1 %vm437_vm0, %v7203_v9  ;;  %v7234_v8 = vld [vmem:[%s9806_s17 + $0x4ea] ss:$2 sm:$0xff] }
  0x9a   : > { %v7268_v9 = vld [vmem:[%s9806_s17 + $0x50] ss:$2 sm:$0xff] }
  0x9c   : > { %8621 = vmatmul.mubr.msk.f32.vlgmr.msra.gmra.mxu0 %vm437_vm0, %v7139_v12  ;;  %8671 = vmatmul.mubr.msk.f32.vlgmr.msra.gmra.mxu1 %vm437_vm0, %v7204_v13  ;;  %v7333_v12 = vld [vmem:[%s9806_s17 + $0x51] ss:$2 sm:$0xff]  ;;  %v7269_v13 = vld [vmem:[%s9806_s17 + $0x60] ss:$2 sm:$0xff] }
  0x9d   : > { %8719 = vmatpush3.msra.mxu0 %v9961_v14  ;;  %8623 = vmatprep.mubr.msk.f32.mxu0 %vm437_vm0, %v7140_v16  ;;  %v7143_v14 = vld [vmem:[%s9806_s17 + $0xd9] ss:$2 sm:$0xff] }
  0x9e   : > { %8673 = vmatprep.mubr.msk.f32.mxu1 %vm437_vm0, %v7205_v17  ;;  %8769 = vmatpush3.msra.mxu1 %v9966_v15  ;;  %v7145_v15 = vld [vmem:[%s9806_s17 + $0x129] ss:$2 sm:$0xff]  ;;  %v7270_v17 = vld [vmem:[%s9806_s17 + $0xa0] ss:$2 sm:$0xff] }
  0x9f   : > { %8818 = vmatprep.subr.mxu0 %v10103_v18  ;;  %v7334_v16 = vld [vmem:[%s9806_s17 + $0x61] ss:$2 sm:$0xff] }
  0xa0   : > { %8624 = vmatmul.mubr.msk.f32.gmra.mxu0 %vm437_vm0, %v7141_v19  ;;  %8674 = vmatmul.mubr.msk.f32.gmra.mxu1 %vm437_vm0, %v7206_v10  ;;  %v7335_v19 = vld [vmem:[%s9806_s17 + $0xa1] ss:$2 sm:$0xff] }
  0xa1   : > { %8626 = vmatprep.mubr.msk.f32.mxu0 %vm437_vm0, %v7142_v20  ;;  %8676 = vmatprep.mubr.msk.f32.mxu1 %vm437_vm0, %v7207_v11 }
  0xa4   : > { %8627 = vmatmul.mubr.msk.f32.gmra.mxu0 %vm437_vm0, %v7143_v14  ;;  %8677 = vmatmul.mubr.msk.f32.gmra.mxu1 %vm437_vm0, %v7208_v21  ;;  %v7271_v14 = vld [vmem:[%s9806_s17 + $0xb0] ss:$2 sm:$0xff]  ;;  %v7336_v21 = vld [vmem:[%s9806_s17 + $0xb1] ss:$2 sm:$0xff] }
  0xa5   : > { %8629 = vmatprep.mubr.msk.f32.mxu0 %vm437_vm0, %v7144_v22  ;;  %8679 = vmatprep.mubr.msk.f32.mxu1 %vm437_vm0, %v7209_v23 }
  0xa8   : > { %8630 = vmatmul.mubr.msk.f32.gmra.mxu0 %vm437_vm0, %v7145_v15  ;;  %8680 = vmatmul.mubr.msk.f32.gmra.mxu1 %vm437_vm0, %v7210_v24  ;;  %v7272_v15 = vld [vmem:[%s9806_s17 + $0xf0] ss:$2 sm:$0xff]  ;;  %v7337_v24 = vld [vmem:[%s9806_s17 + $0xf1] ss:$2 sm:$0xff] }
  0xa9   : > { %8632 = vmatprep.mubr.msk.f32.mxu0 %vm437_vm0, %v7146_v25  ;;  %8682 = vmatprep.mubr.msk.f32.mxu1 %vm437_vm0, %v7211_v26 }
  0xac   : > { %8633 = vmatmul.mubr.msk.f32.gmra.mxu0 %vm437_vm0, %v7147_v27  ;;  %8683 = vmatmul.mubr.msk.f32.gmra.mxu1 %vm437_vm0, %v7212_v28  ;;  %v7273_v28 = vld [vmem:[%s9806_s17 + $0x100] ss:$2 sm:$0xff] }
  0xad   : > { %8635 = vmatprep.mubr.msk.f32.mxu0 %vm437_vm0, %v7148_v29  ;;  %8685 = vmatprep.mubr.msk.f32.mxu1 %vm437_vm0, %v7213_v30  ;;  %v7338_v29 = vld [vmem:[%s9806_s17 + $0x101] ss:$2 sm:$0xff] }
  0xb0   : > { %8636 = vmatmul.mubr.msk.f32.gmra.mxu0 %vm437_vm0, %v7149_v31  ;;  %8686 = vmatmul.mubr.msk.f32.gmra.mxu1 %vm437_vm0, %v7214_v32  ;;  %v7274_v32 = vld [vmem:[%s9806_s17 + $0x140] ss:$2 sm:$0xff] }
  0xb1   : > { %8638 = vmatprep.mubr.msk.f32.mxu0 %vm437_vm0, %v7150_v33  ;;  %8688 = vmatprep.mubr.msk.f32.mxu1 %vm437_vm0, %v7215_v34  ;;  %v7339_v33 = vld [vmem:[%s9806_s17 + $0x141] ss:$2 sm:$0xff] }
  0xb4   : > { %8639 = vmatmul.mubr.msk.f32.gmra.mxu0 %vm437_vm0, %v7151_v35  ;;  %8689 = vmatmul.mubr.msk.f32.gmra.mxu1 %vm437_vm0, %v7216_v36 }
  0xb5   : > { %8641 = vmatprep.mubr.msk.f32.mxu0 %vm437_vm0, %v7152_v37  ;;  %8691 = vmatprep.mubr.msk.f32.mxu1 %vm437_vm0, %v7217_v38  ;;  %v7275_v38 = vld [vmem:[%s9806_s17 + $0x150] ss:$2 sm:$0xff] }
  0xb8   : > { %8642 = vmatmul.mubr.msk.f32.gmra.mxu0 %vm437_vm0, %v7153_v39  ;;  %8692 = vmatmul.mubr.msk.f32.gmra.mxu1 %vm437_vm0, %v7218_v40  ;;  %v7340_v39 = vld [vmem:[%s9806_s17 + $0x151] ss:$2 sm:$0xff] }
  0xb9   : > { %8644 = vmatprep.mubr.msk.f32.mxu0 %vm437_vm0, %v7154_v41  ;;  %8694 = vmatprep.mubr.msk.f32.mxu1 %vm437_vm0, %v7219_v42  ;;  %v7276_v42 = vld [vmem:[%s9806_s17 + $0x190] ss:$2 sm:$0xff] }
  0xbc   : > { %8645 = vmatmul.mubr.msk.f32.gmra.mxu0 %vm437_vm0, %v7155_v43  ;;  %8695 = vmatmul.mubr.msk.f32.gmra.mxu1 %vm437_vm0, %v7220_v44  ;;  %v7341_v43 = vld [vmem:[%s9806_s17 + $0x191] ss:$2 sm:$0xff] }
  0xbd   : > { %8647 = vmatprep.mubr.msk.f32.mxu0 %vm437_vm0, %v7156_v45  ;;  %8697 = vmatprep.mubr.msk.f32.mxu1 %vm437_vm0, %v7221_v46 }
  0xc0   : > { %8648 = vmatmul.mubr.msk.f32.gmra.mxu0 %vm437_vm0, %v7157_v47  ;;  %8698 = vmatmul.mubr.msk.f32.gmra.mxu1 %vm437_vm0, %v7222_v48  ;;  %v7277_v48 = vld [vmem:[%s9806_s17 + $0x1a0] ss:$2 sm:$0xff] }
  0xc1   : > { %8650 = vmatprep.mubr.msk.f32.mxu0 %vm437_vm0, %v7158_v49  ;;  %8700 = vmatprep.mubr.msk.f32.mxu1 %vm437_vm0, %v7223_v50  ;;  %v7342_v49 = vld [vmem:[%s9806_s17 + $0x1a1] ss:$2 sm:$0xff] }
  0xc4   : > { %8651 = vmatmul.mubr.msk.f32.gmra.mxu0 %vm437_vm0, %v7159_v51  ;;  %8701 = vmatmul.mubr.msk.f32.gmra.mxu1 %vm437_vm0, %v7224_v52  ;;  %v7278_v52 = vld [vmem:[%s9806_s17 + $0x1e0] ss:$2 sm:$0xff] }
  0xc5   : > { %8653 = vmatprep.mubr.msk.f32.mxu0 %vm437_vm0, %v7160_v53  ;;  %8703 = vmatprep.mubr.msk.f32.mxu1 %vm437_vm0, %v7225_v54  ;;  %v7343_v53 = vld [vmem:[%s9806_s17 + $0x1e1] ss:$2 sm:$0xff] }
  0xc8   : > { %8654 = vmatmul.mubr.msk.f32.gmra.mxu0 %vm437_vm0, %v7161_v55  ;;  %8704 = vmatmul.mubr.msk.f32.gmra.mxu1 %vm437_vm0, %v7226_v56 }
  0xc9   : > { %8656 = vmatprep.mubr.msk.f32.mxu0 %vm437_vm0, %v7162_v57  ;;  %8706 = vmatprep.mubr.msk.f32.mxu1 %vm437_vm0, %v7227_v58  ;;  %v7279_v58 = vld [vmem:[%s9806_s17 + $0x1f0] ss:$2 sm:$0xff] }
  0xcc   : > { %8657 = vmatmul.mubr.msk.f32.gmra.mxu0 %vm437_vm0, %v7163_v59  ;;  %8707 = vmatmul.mubr.msk.f32.gmra.mxu1 %vm437_vm0, %v7228_v60  ;;  %v7344_v59 = vld [vmem:[%s9806_s17 + $0x1f1] ss:$2 sm:$0xff] }
  0xcd   : > { %8659 = vmatprep.mubr.msk.f32.mxu0 %vm437_vm0, %v7164_v61  ;;  %8709 = vmatprep.mubr.msk.f32.mxu1 %vm437_vm0, %v7229_v62  ;;  %v7280_v62 = vld [vmem:[%s9806_s17 + $0x230] ss:$2 sm:$0xff] }
  0xd0   : > { %8660 = vmatmul.mubr.msk.f32.gmra.mxu0 %vm437_vm0, %v7165_v63  ;;  %8710 = vmatmul.mubr.msk.f32.gmra.mxu1 %vm437_vm0, %v7230_v0  ;;  %v7345_v63 = vld [vmem:[%s9806_s17 + $0x231] ss:$2 sm:$0xff] }
  0xd1   : > { %8662 = vmatprep.mubr.msk.f32.mxu0 %vm437_vm0, %v7166_v1  ;;  %8712 = vmatprep.mubr.msk.f32.mxu1 %vm437_vm0, %v7231_v2 }
  0xd4   : > { %8663 = vmatmul.mubr.msk.f32.gmra.mxu0 %vm437_vm0, %v7167_v3  ;;  %8713 = vmatmul.mubr.msk.f32.gmra.mxu1 %vm437_vm0, %v7232_v4  ;;  %v7281_v4 = vld [vmem:[%s9806_s17 + $0x240] ss:$2 sm:$0xff] }
  0xd5   : > { %8665 = vmatprep.mubr.msk.f32.mxu0 %vm437_vm0, %v7168_v5  ;;  %8715 = vmatprep.mubr.msk.f32.mxu1 %vm437_vm0, %v7233_v6  ;;  %v7346_v5 = vld [vmem:[%s9806_s17 + $0x241] ss:$2 sm:$0xff] }
  0xd8   : > { %8666 = vmatmul.mubr.msk.f32.gmra.mxu0 %vm437_vm0, %v7169_v7  ;;  %8716 = vmatmul.mubr.msk.f32.gmra.mxu1 %vm437_vm0, %v7234_v8  ;;  %v7282_v8 = vld [vmem:[%s9806_s17 + $0x280] ss:$2 sm:$0xff] }
  0xd9   : > { %8720 = vmatprep.mubr.msk.f32.mxu0 %vm437_vm0, %v7268_v9  ;;  %8770 = vmatprep.mubr.msk.f32.mxu1 %vm437_vm0, %v7333_v12  ;;  %v7347_v9 = vld [vmem:[%s9806_s17 + $0x281] ss:$2 sm:$0xff] }
  0xdc   : > { %v8422_v10 = vpop.f32.mrf.mxu0  ;;  %v8472_v20 = vpop.f32.mrf.mxu1  ;;  %8721 = vmatmul.mubr.msk.f32.vlgmr.msra.gmra.mxu0 %vm437_vm0, %v7269_v13  ;;  %8771 = vmatmul.mubr.msk.f32.vlgmr.msra.gmra.mxu1 %vm437_vm0, %v7334_v16 }
  0xdd   : > { %v10236_v11 = vadd.f32 %v8472_v20, %v8422_v10  ;;  %8819 = vmatpush3.msra.mxu0 %v10103_v18  ;;  %8723 = vmatprep.mubr.msk.f32.mxu0 %vm437_vm0, %v7270_v17  ;;  %v7348_v10 = vld [vmem:[%s9806_s17 + $0x291] ss:$2 sm:$0xff] }
  0xde   : > { %v600_v22 = vpop.f32.mrf.mxu0  ;;  %v921_v23 = vpop.f32.mrf.mxu1  ;;  %8773 = vmatprep.mubr.msk.f32.mxu1 %vm437_vm0, %v7335_v19  ;;  %v7283_v19 = vld [vmem:[%s9806_s17 + $0x290] ss:$2 sm:$0xff] }
  0xdf   : > { %v10245_v25 = vadd.f32 %v921_v23, %v600_v22  ;;  %v7349_v22 = vld [vmem:[%s9806_s17 + $0x2d1] ss:$2 sm:$0xff] }
  0xe0   : > { %v8425_v26 = vpop.f32.mrf.mxu0  ;;  %v8475_v27 = vpop.f32.mrf.mxu1  ;;  %8724 = vmatmul.mubr.msk.f32.gmra.mxu0 %vm437_vm0, %v7271_v14  ;;  %8774 = vmatmul.mubr.msk.f32.gmra.mxu1 %vm437_vm0, %v7336_v21  ;;  %v7284_v21 = vld [vmem:[%s9806_s17 + $0x2d0] ss:$2 sm:$0xff] }
  0xe1   : > { %v10249_v18 = vadd.f32 %v8475_v27, %v8425_v26  ;;  %8726 = vmatprep.mubr.msk.f32.mxu0 %vm437_vm0, %v7272_v15  ;;  %8776 = vmatprep.mubr.msk.f32.mxu1 %vm437_vm0, %v7337_v24  ;;  %v7285_v27 = vld [vmem:[%s9806_s17 + $0x2e0] ss:$2 sm:$0xff] }
  0xe2   : > { %v610_v30 = vpop.f32.mrf.mxu0  ;;  %v931_v31 = vpop.f32.mrf.mxu1 }
  0xe3   : > { %v10257_v34 = vadd.f32 %v931_v31, %v610_v30  ;;  %v7286_v31 = vld [vmem:[%s9806_s17 + $0x320] ss:$2 sm:$0xff] }
  0xe4   : > { %v8428_v35 = vpop.f32.mrf.mxu0  ;;  %v8478_v36 = vpop.f32.mrf.mxu1  ;;  %8727 = vmatmul.mubr.msk.f32.gmra.mxu0 %vm437_vm0, %v7273_v28  ;;  %8777 = vmatmul.mubr.msk.f32.gmra.mxu1 %vm437_vm0, %v7338_v29  ;;  %v7350_v28 = vld [vmem:[%s9806_s17 + $0x2e1] ss:$2 sm:$0xff] }
  0xe5   : > { %v10261_v37 = vadd.f32 %v8478_v36, %v8428_v35  ;;  %8729 = vmatprep.mubr.msk.f32.mxu0 %vm437_vm0, %v7274_v32  ;;  %8779 = vmatprep.mubr.msk.f32.mxu1 %vm437_vm0, %v7339_v33  ;;  %v7351_v32 = vld [vmem:[%s9806_s17 + $0x321] ss:$2 sm:$0xff] }
  0xe6   : > { %v620_v40 = vpop.f32.mrf.mxu0  ;;  %v941_v41 = vpop.f32.mrf.mxu1 }
  0xe7   : > { %v10269_v44 = vadd.f32 %v941_v41, %v620_v40  ;;  %v7352_v40 = vld [vmem:[%s9806_s17 + $0x331] ss:$2 sm:$0xff] }
  0xe8   : > { %v8431_v45 = vpop.f32.mrf.mxu0  ;;  %v8481_v46 = vpop.f32.mrf.mxu1  ;;  %8730 = vmatmul.mubr.msk.f32.gmra.mxu0 %vm437_vm0, %v7275_v38  ;;  %8780 = vmatmul.mubr.msk.f32.gmra.mxu1 %vm437_vm0, %v7340_v39  ;;  %v7287_v39 = vld [vmem:[%s9806_s17 + $0x330] ss:$2 sm:$0xff] }
  0xe9   : > { %v10273_v47 = vadd.f32 %v8481_v46, %v8431_v45  ;;  %8732 = vmatprep.mubr.msk.f32.mxu0 %vm437_vm0, %v7276_v42  ;;  %8782 = vmatprep.mubr.msk.f32.mxu1 %vm437_vm0, %v7341_v43  ;;  %v7288_v43 = vld [vmem:[%s9806_s17 + $0x370] ss:$2 sm:$0xff]  ;;  %v7353_v45 = vld [vmem:[%s9806_s17 + $0x371] ss:$2 sm:$0xff] }
  0xea   : > { %v630_v50 = vpop.f32.mrf.mxu0  ;;  %v951_v51 = vpop.f32.mrf.mxu1 }
  0xeb   : > { %v10281_v54 = vadd.f32 %v951_v51, %v630_v50  ;;  %v7289_v50 = vld [vmem:[%s9806_s17 + $0x380] ss:$2 sm:$0xff]  ;;  %v7354_v51 = vld [vmem:[%s9806_s17 + $0x381] ss:$2 sm:$0xff] }
  0xec   : > { %v8434_v55 = vpop.f32.mrf.mxu0  ;;  %v8484_v56 = vpop.f32.mrf.mxu1  ;;  %8733 = vmatmul.mubr.msk.f32.gmra.mxu0 %vm437_vm0, %v7277_v48  ;;  %8783 = vmatmul.mubr.msk.f32.gmra.mxu1 %vm437_vm0, %v7342_v49 }
  0xed   : > { %v10285_v57 = vadd.f32 %v8484_v56, %v8434_v55  ;;  %8735 = vmatprep.mubr.msk.f32.mxu0 %vm437_vm0, %v7278_v52  ;;  %8785 = vmatprep.mubr.msk.f32.mxu1 %vm437_vm0, %v7343_v53  ;;  %v7290_v55 = vld [vmem:[%s9806_s17 + $0x3c0] ss:$2 sm:$0xff]  ;;  %v7355_v56 = vld [vmem:[%s9806_s17 + $0x3c1] ss:$2 sm:$0xff] }
  0xee   : > { %v640_v60 = vpop.f32.mrf.mxu0  ;;  %v961_v61 = vpop.f32.mrf.mxu1 }
  0xef   : > { %v10293_v0 = vadd.f32 %v961_v61, %v640_v60  ;;  %v7291_v61 = vld [vmem:[%s9806_s17 + $0x3d0] ss:$2 sm:$0xff] }
  0xf0   : > { %v8437_v1 = vpop.f32.mrf.mxu0  ;;  %v8487_v2 = vpop.f32.mrf.mxu1  ;;  %8736 = vmatmul.mubr.msk.f32.gmra.mxu0 %vm437_vm0, %v7279_v58  ;;  %8786 = vmatmul.mubr.msk.f32.gmra.mxu1 %vm437_vm0, %v7344_v59 }
  0xf1   : > { %v10297_v3 = vadd.f32 %v8487_v2, %v8437_v1  ;;  %8738 = vmatprep.mubr.msk.f32.mxu0 %vm437_vm0, %v7280_v62  ;;  %8788 = vmatprep.mubr.msk.f32.mxu1 %vm437_vm0, %v7345_v63  ;;  %v7356_v62 = vld [vmem:[%s9806_s17 + $0x3d1] ss:$2 sm:$0xff]  ;;  %v7292_v2 = vld [vmem:[%s9806_s17 + $0x410] ss:$2 sm:$0xff] }
  0xf2   : > { %v650_v6 = vpop.f32.mrf.mxu0  ;;  %v971_v7 = vpop.f32.mrf.mxu1 }
  0xf3   : > { %v10305_v12 = vadd.f32 %v971_v7, %v650_v6 }
  0xf4   : > { %v8440_v13 = vpop.f32.mrf.mxu0  ;;  %v8490_v16 = vpop.f32.mrf.mxu1  ;;  %8739 = vmatmul.mubr.msk.f32.gmra.mxu0 %vm437_vm0, %v7281_v4  ;;  %8789 = vmatmul.mubr.msk.f32.gmra.mxu1 %vm437_vm0, %v7346_v5  ;;  %v7357_v4 = vld [vmem:[%s9806_s17 + $0x411] ss:$2 sm:$0xff] }
  0xf5   : > { %v10309_v17 = vadd.f32 %v8490_v16, %v8440_v13  ;;  %8741 = vmatprep.mubr.msk.f32.mxu0 %vm437_vm0, %v7282_v8  ;;  %8791 = vmatprep.mubr.msk.f32.mxu1 %vm437_vm0, %v7347_v9  ;;  %v7293_v8 = vld [vmem:[%s9806_s17 + $0x420] ss:$2 sm:$0xff]  ;;  %v7358_v9 = vld [vmem:[%s9806_s17 + $0x421] ss:$2 sm:$0xff] }
  0xf6   : > { %v660_v20 = vpop.f32.mrf.mxu0  ;;  %v981_v14 = vpop.f32.mrf.mxu1 }
  0xf7   : > { %v10317_v23 = vadd.f32 %v981_v14, %v660_v20 }
  0xf8   : > { %v8443_v15 = vpop.f32.mrf.mxu0  ;;  %v8493_v24 = vpop.f32.mrf.mxu1  ;;  %8742 = vmatmul.mubr.msk.f32.gmra.mxu0 %vm437_vm0, %v7283_v19  ;;  %8792 = vmatmul.mubr.msk.f32.gmra.mxu1 %vm437_vm0, %v7348_v10  ;;  %v7294_v19 = vld [vmem:[%s9806_s17 + $0x460] ss:$2 sm:$0xff]  ;;  %v7359_v10 = vld [vmem:[%s9806_s17 + $0x461] ss:$2 sm:$0xff] }
  0xf9   : > { %v10321_v26 = vadd.f32 %v8493_v24, %v8443_v15  ;;  %8744 = vmatprep.mubr.msk.f32.mxu0 %vm437_vm0, %v7284_v21  ;;  %8794 = vmatprep.mubr.msk.f32.mxu1 %vm437_vm0, %v7349_v22  ;;  %v7295_v22 = vld [vmem:[%s9806_s17 + $0x470] ss:$2 sm:$0xff]  ;;  %v7360_v15 = vld [vmem:[%s9806_s17 + $0x471] ss:$2 sm:$0xff] }
  0xfa   : > { %v670_v29 = vpop.f32.mrf.mxu0  ;;  %v991_v30 = vpop.f32.mrf.mxu1 }
  0xfb   : > { %v10329_v33 = vadd.f32 %v991_v30, %v670_v29  ;;  %v7361_v29 = vld [vmem:[%s9806_s17 + $0x4b1] ss:$2 sm:$0xff] }
  0xfc   : > { %v8446_v35 = vpop.f32.mrf.mxu0  ;;  %v8496_v36 = vpop.f32.mrf.mxu1  ;;  %8745 = vmatmul.mubr.msk.f32.gmra.mxu0 %vm437_vm0, %v7285_v27  ;;  %8795 = vmatmul.mubr.msk.f32.gmra.mxu1 %vm437_vm0, %v7350_v28  ;;  %v7296_v28 = vld [vmem:[%s9806_s17 + $0x4b0] ss:$2 sm:$0xff] }
  0xfd   : > { %v10333_v38 = vadd.f32 %v8496_v36, %v8446_v35  ;;  %8747 = vmatprep.mubr.msk.f32.mxu0 %vm437_vm0, %v7286_v31  ;;  %8797 = vmatprep.mubr.msk.f32.mxu1 %vm437_vm0, %v7351_v32  ;;  %v7297_v35 = vld [vmem:[%s9806_s17 + $0x4c0] ss:$2 sm:$0xff]  ;;  %v7362_v36 = vld [vmem:[%s9806_s17 + $0x4c1] ss:$2 sm:$0xff] }
  0xfe   : > { %v10339_v41 = vpop.f32.mrf.mxu0  ;;  %v10341_v42 = vpop.f32.mrf.mxu1 }
 0x100   : > { %v8449_v46 = vpop.f32.mrf.mxu0  ;;  %v8499_v48 = vpop.f32.mrf.mxu1  ;;  %8748 = vmatmul.mubr.msk.f32.gmra.mxu0 %vm437_vm0, %v7287_v39  ;;  %8798 = vmatmul.mubr.msk.f32.gmra.mxu1 %vm437_vm0, %v7352_v40 }
 0x101   : > { %v10347_v49 = vadd.f32 %v8499_v48, %v8449_v46  ;;  %8750 = vmatprep.mubr.msk.f32.mxu0 %vm437_vm0, %v7288_v43  ;;  %8800 = vmatprep.mubr.msk.f32.mxu1 %vm437_vm0, %v7353_v45  ;;  %v7298_v43 = vld [vmem:[%s9806_s17 + $0x500] ss:$2 sm:$0xff]  ;;  %v7363_v45 = vld [vmem:[%s9806_s17 + $0x501] ss:$2 sm:$0xff] }
 0x102   : > { %v10353_v52 = vpop.f32.mrf.mxu0  ;;  %v10355_v53 = vpop.f32.mrf.mxu1 }
 0x104   : > { %v8452_v58 = vpop.f32.mrf.mxu0  ;;  %v8502_v59 = vpop.f32.mrf.mxu1  ;;  %8751 = vmatmul.mubr.msk.f32.gmra.mxu0 %vm437_vm0, %v7289_v50  ;;  %8801 = vmatmul.mubr.msk.f32.gmra.mxu1 %vm437_vm0, %v7354_v51  ;;  %v7299_v51 = vld [vmem:[%s9806_s17 + $0x510] ss:$2 sm:$0xff] }
 0x105   : > { %v10361_v60 = vadd.f32 %v8502_v59, %v8452_v58  ;;  %8753 = vmatprep.mubr.msk.f32.mxu0 %vm437_vm0, %v7290_v55  ;;  %8803 = vmatprep.mubr.msk.f32.mxu1 %vm437_vm0, %v7355_v56  ;;  %v7364_v55 = vld [vmem:[%s9806_s17 + $0x511] ss:$2 sm:$0xff]  ;;  %v7398_v59 = vld [vmem:[%s9806_s17 + $0x52] ss:$2 sm:$0xff] }
 0x106   : > { %v10367_v63 = vpop.f32.mrf.mxu0  ;;  %v10369_v1 = vpop.f32.mrf.mxu1 }
 0x108   : > { %v8455_v5 = vpop.f32.mrf.mxu0  ;;  %v8505_v6 = vpop.f32.mrf.mxu1  ;;  %8754 = vmatmul.mubr.msk.f32.gmra.mxu0 %vm437_vm0, %v7291_v61  ;;  %8804 = vmatmul.mubr.msk.f32.gmra.mxu1 %vm437_vm0, %v7356_v62 }
 0x109   : > { %v10375_v7 = vadd.f32 %v8505_v6, %v8455_v5  ;;  %8756 = vmatprep.mubr.msk.f32.mxu0 %vm437_vm0, %v7292_v2  ;;  %8806 = vmatprep.mubr.msk.f32.mxu1 %vm437_vm0, %v7357_v4  ;;  %v7399_v4 = vld [vmem:[%s9806_s17 + $0x62] ss:$2 sm:$0xff] }
 0x10a   : > { %v10381_v13 = vpop.f32.mrf.mxu0  ;;  %v10383_v16 = vpop.f32.mrf.mxu1 }
 0x10c   : > { %v8458_v20 = vpop.f32.mrf.mxu0  ;;  %v8508_v14 = vpop.f32.mrf.mxu1  ;;  %8757 = vmatmul.mubr.msk.f32.gmra.mxu0 %vm437_vm0, %v7293_v8  ;;  %8807 = vmatmul.mubr.msk.f32.gmra.mxu1 %vm437_vm0, %v7358_v9  ;;  %v7400_v8 = vld [vmem:[%s9806_s17 + $0xa2] ss:$2 sm:$0xff] }
 0x10d   : > { %v10389_v21 = vadd.f32 %v8508_v14, %v8458_v20  ;;  %8759 = vmatprep.mubr.msk.f32.mxu0 %vm437_vm0, %v7294_v19  ;;  %8809 = vmatprep.mubr.msk.f32.mxu1 %vm437_vm0, %v7359_v10  ;;  %v7401_v20 = vld [vmem:[%s9806_s17 + $0xb2] ss:$2 sm:$0xff] }
 0x10e   : > { %v10395_v24 = vpop.f32.mrf.mxu0  ;;  %v10397_v27 = vpop.f32.mrf.mxu1 }
 0x110   : > { %v8461_v30 = vpop.f32.mrf.mxu0  ;;  %v8511_v31 = vpop.f32.mrf.mxu1  ;;  %8760 = vmatmul.mubr.msk.f32.gmra.mxu0 %vm437_vm0, %v7295_v22  ;;  %8810 = vmatmul.mubr.msk.f32.gmra.mxu1 %vm437_vm0, %v7360_v15  ;;  %v7402_v15 = vld [vmem:[%s9806_s17 + $0xf2] ss:$2 sm:$0xff] }
 0x111   : > { %v10403_v32 = vadd.f32 %v8511_v31, %v8461_v30  ;;  %8762 = vmatprep.mubr.msk.f32.mxu0 %vm437_vm0, %v7296_v28  ;;  %8812 = vmatprep.mubr.msk.f32.mxu1 %vm437_vm0, %v7361_v29 }
 0x112   : > { %v10409_v39 = vpop.f32.mrf.mxu0  ;;  %v10411_v40 = vpop.f32.mrf.mxu1 }
 0x114   : > { %v8464_v46 = vpop.f32.mrf.mxu0  ;;  %v8514_v48 = vpop.f32.mrf.mxu1  ;;  %8763 = vmatmul.mubr.msk.f32.gmra.mxu0 %vm437_vm0, %v7297_v35  ;;  %8813 = vmatmul.mubr.msk.f32.gmra.mxu1 %vm437_vm0, %v7362_v36  ;;  %v7403_v35 = vld [vmem:[%s9806_s17 + $0x102] ss:$2 sm:$0xff] }
 0x115   : > { %v10417_v50 = vadd.f32 %v8514_v48, %v8464_v46  ;;  %8765 = vmatprep.mubr.msk.f32.mxu0 %vm437_vm0, %v7298_v43  ;;  %8815 = vmatprep.mubr.msk.f32.mxu1 %vm437_vm0, %v7363_v45  ;;  %v7404_v45 = vld [vmem:[%s9806_s17 + $0x142] ss:$2 sm:$0xff] }
 0x116   : > { %v10423_v56 = vpop.f32.mrf.mxu0  ;;  %v10425_v58 = vpop.f32.mrf.mxu1 }
 0x118   : > { %v8467_v61 = vpop.f32.mrf.mxu0  ;;  %v8517_v62 = vpop.f32.mrf.mxu1  ;;  %8766 = vmatmul.mubr.msk.f32.gmra.mxu0 %vm437_vm0, %v7299_v51  ;;  %8816 = vmatmul.mubr.msk.f32.gmra.mxu1 %vm437_vm0, %v7364_v55  ;;  %v7405_v55 = vld [vmem:[%s9806_s17 + $0x152] ss:$2 sm:$0xff] }
 0x119   : > { %v10430_v2 = vadd.f32 %v8517_v62, %v8467_v61  ;;  %8820 = vmatprep.mubr.msk.f32.mxu0 %vm437_vm0, %v7398_v59  ;;  %v7406_v62 = vld [vmem:[%s9806_s17 + $0x192] ss:$2 sm:$0xff] }
 0x11a   : > { %v10434_v5 = vpop.f32.mrf.mxu0  ;;  %v10436_v6 = vpop.f32.mrf.mxu1 }
 0x11c   : > { %v8522_v9 = vpop.f32.mrf.mxu0  ;;  %8821 = vmatmul.mubr.msk.f32.vlgmr.msra.gmra.mxu0 %vm437_vm0, %v7399_v4  ;;  %v8572_v19 = vpop.f32.mrf.mxu1 }
 0x11d   : > { %v1468_v10 = vadd.f32 %v8522_v9, %v10236_v11  ;;  %8823 = vmatprep.mubr.msk.f32.mxu0 %vm437_vm0, %v7400_v8 }
 0x11e   : > { %v1308_v14 = vpop.f32.mrf.mxu0  ;;  %v10443_v22 = vpop.f32.mrf.mxu1 }
 0x11f   : > { %v10447_v28 = vadd.f32 %v1308_v14, %v10245_v25  ;;  %v10449_v29 = vadd.f32 %v8572_v19, %v1468_v10  ;;  %v7407_v19 = vld [vmem:[%s9806_s17 + $0x1a2] ss:$2 sm:$0xff] }
 0x120   : > { %v8525_v30 = vpop.f32.mrf.mxu0  ;;  %8824 = vmatmul.mubr.msk.f32.gmra.mxu0 %vm437_vm0, %v7401_v20  ;;  %v8575_v31 = vpop.f32.mrf.mxu1  ;;  %v7408_v14 = vld [vmem:[%s9806_s17 + $0x1e2] ss:$2 sm:$0xff] }
 0x121   : > { %v1470_v11 = vadd.f32 %v8525_v30, %v10249_v18  ;;  %8826 = vmatprep.mubr.msk.f32.mxu0 %vm437_vm0, %v7402_v15 }
 0x122   : > { %v1318_v36 = vpop.f32.mrf.mxu0  ;;  %v10455_v43 = vpop.f32.mrf.mxu1 }
 0x123   : > { %v10459_v25 = vadd.f32 %v1318_v36, %v10257_v34  ;;  %v10461_v46 = vadd.f32 %v8575_v31, %v1470_v11  ;;  %v7409_v11 = vld [vmem:[%s9806_s17 + $0x1f2] ss:$2 sm:$0xff] }
 0x124   : > { %v8528_v48 = vpop.f32.mrf.mxu0  ;;  %8827 = vmatmul.mubr.msk.f32.gmra.mxu0 %vm437_vm0, %v7403_v35  ;;  %v8578_v51 = vpop.f32.mrf.mxu1 }
 0x125   : > { %v1472_v18 = vadd.f32 %v8528_v48, %v10261_v37  ;;  %8829 = vmatprep.mubr.msk.f32.mxu0 %vm437_vm0, %v7404_v45  ;;  %v7410_v45 = vld [vmem:[%s9806_s17 + $0x232] ss:$2 sm:$0xff] }
 0x126   : > { %v1328_v59 = vpop.f32.mrf.mxu0  ;;  %v10467_v61 = vpop.f32.mrf.mxu1 }
 0x127   : > { %v10471_v34 = vadd.f32 %v1328_v59, %v10269_v44  ;;  %v10473_v4 = vadd.f32 %v8578_v51, %v1472_v18 }
 0x128   : > { %v8531_v8 = vpop.f32.mrf.mxu0  ;;  %8830 = vmatmul.mubr.msk.f32.gmra.mxu0 %vm437_vm0, %v7405_v55  ;;  %v8581_v9 = vpop.f32.mrf.mxu1  ;;  %v7411_v55 = vld [vmem:[%s9806_s17 + $0x242] ss:$2 sm:$0xff] }
 0x129   : > { %v1474_v37 = vadd.f32 %v8531_v8, %v10273_v47  ;;  %8832 = vmatprep.mubr.msk.f32.mxu0 %vm437_vm0, %v7406_v62  ;;  %v7412_v8 = vld [vmem:[%s9806_s17 + $0x282] ss:$2 sm:$0xff] }
 0x12a   : > { %v1338_v10 = vpop.f32.mrf.mxu0  ;;  %v10479_v20 = vpop.f32.mrf.mxu1 }
 0x12b   : > { %v10483_v44 = vadd.f32 %v1338_v10, %v10281_v54  ;;  %v10485_v15 = vadd.f32 %v8581_v9, %v1474_v37  ;;  %v7413_v10 = vld [vmem:[%s9806_s17 + $0x292] ss:$2 sm:$0xff] }
 0x12c   : > { %v8534_v30 = vpop.f32.mrf.mxu0  ;;  %8833 = vmatmul.mubr.msk.f32.gmra.mxu0 %vm437_vm0, %v7407_v19  ;;  %v8584_v31 = vpop.f32.mrf.mxu1 }
 0x12d   : > { %v1476_v47 = vadd.f32 %v8534_v30, %v10285_v57  ;;  %8835 = vmatprep.mubr.msk.f32.mxu0 %vm437_vm0, %v7408_v14 }
 0x12e   : > { %v1348_v35 = vpop.f32.mrf.mxu0  ;;  %v10491_v36 = vpop.f32.mrf.mxu1 }
 0x12f   : > { %v10495_v54 = vadd.f32 %v1348_v35, %v10293_v0  ;;  %v10497_v48 = vadd.f32 %v8584_v31, %v1476_v47  ;;  %v7414_v31 = vld [vmem:[%s9806_s17 + $0x2d2] ss:$2 sm:$0xff] }
 0x130   : > { %v8537_v51 = vpop.f32.mrf.mxu0  ;;  %8836 = vmatmul.mubr.msk.f32.gmra.mxu0 %vm437_vm0, %v7409_v11  ;;  %v8587_v18 = vpop.f32.mrf.mxu1 }
 0x131   : > { %v1478_v57 = vadd.f32 %v8537_v51, %v10297_v3  ;;  %8838 = vmatprep.mubr.msk.f32.mxu0 %vm437_vm0, %v7410_v45  ;;  %v7415_v45 = vld [vmem:[%s9806_s17 + $0x2e2] ss:$2 sm:$0xff] }
 0x132   : > { %v1358_v59 = vpop.f32.mrf.mxu0  ;;  %v10503_v62 = vpop.f32.mrf.mxu1 }
 0x133   : > { %12100 = vst [vmem:[#allocation7_spill] sm:$0xff] %v10503_v62  ;;  %v10507_v0 = vadd.f32 %v1358_v59, %v10305_v12  ;;  %v10509_v9 = vadd.f32 %v8587_v18, %v1478_v57  ;;  %v7416_v57 = vld [vmem:[%s9806_s17 + $0x322] ss:$2 sm:$0xff] }
 0x134   : > { %v8540_v37 = vpop.f32.mrf.mxu0  ;;  %8839 = vmatmul.mubr.msk.f32.gmra.mxu0 %vm437_vm0, %v7411_v55  ;;  %v8590_v19 = vpop.f32.mrf.mxu1 }
 0x135   : > { %12101 = vst [vmem:[#allocation8_spill] sm:$0xff] %v10507_v0  ;;  %v1480_v3 = vadd.f32 %v8540_v37, %v10309_v17  ;;  %8841 = vmatprep.mubr.msk.f32.mxu0 %vm437_vm0, %v7412_v8  ;;  %v7417_v37 = vld [vmem:[%s9806_s17 + $0x332] ss:$2 sm:$0xff] }
 0x136   : > { %v1368_v14 = vpop.f32.mrf.mxu0  ;;  %v10515_v30 = vpop.f32.mrf.mxu1 }
 0x137   : > { %12102 = vst [vmem:[#allocation9_spill] sm:$0xff] %v10515_v30  ;;  %v10519_v12 = vadd.f32 %v1368_v14, %v10317_v23  ;;  %v10521_v47 = vadd.f32 %v8590_v19, %v1480_v3  ;;  %v7482_v30 = vld [vmem:[%s12090_s2 + $0x110] sm:$0xff] }
 0x138   : > { %v8543_v11 = vpop.f32.mrf.mxu0  ;;  %8842 = vmatmul.mubr.msk.f32.gmra.mxu0 %vm437_vm0, %v7413_v10  ;;  %v8593_v35 = vpop.f32.mrf.mxu1  ;;  %v7418_v10 = vld [vmem:[%s9806_s17 + $0x372] ss:$2 sm:$0xff] }
 0x139   : > { %12103 = vst [vmem:[#allocation10_spill] sm:$0xff] %v10519_v12  ;;  %v1482_v17 = vadd.f32 %v8543_v11, %v10321_v26  ;;  %8844 = vmatprep.mubr.msk.f32.mxu0 %vm437_vm0, %v7414_v31 }
 0x13a   : > { %v1378_v51 = vpop.f32.mrf.mxu0  ;;  %v10527_v18 = vpop.f32.mrf.mxu1 }
 0x13b   : > { %12104 = vst [vmem:[#allocation11_spill] sm:$0xff] %v10527_v18  ;;  %v10531_v23 = vadd.f32 %v1378_v51, %v10329_v33  ;;  %v10533_v55 = vadd.f32 %v8593_v35, %v1482_v17  ;;  %v7484_v18 = vld [vmem:[%s12090_s2 + $0x120] sm:$0xff] }
 0x13c   : > { %v8546_v59 = vpop.f32.mrf.mxu0  ;;  %8845 = vmatmul.mubr.msk.f32.gmra.mxu0 %vm437_vm0, %v7415_v45  ;;  %v8596_v8 = vpop.f32.mrf.mxu1  ;;  %v7420_v45 = vld [vmem:[%s9806_s17 + $0x3c2] ss:$2 sm:$0xff] }
 0x13d   : > { %12105 = vst [vmem:[#allocation12_spill] sm:$0xff] %v10531_v23  ;;  %v1484_v26 = vadd.f32 %v8546_v59, %v10333_v38  ;;  %8847 = vmatprep.mubr.msk.f32.mxu0 %vm437_vm0, %v7416_v57  ;;  %v7419_v38 = vld [vmem:[%s9806_s17 + $0x382] ss:$2 sm:$0xff] }
 0x13e   : > { %v10539_v19 = vpop.f32.mrf.mxu0  ;;  %v10541_v3 = vpop.f32.mrf.mxu1 }
 0x13f   : > { %12106 = vst [vmem:[#allocation13_spill] sm:$0xff] %v10539_v19  ;;  %12107 = vst [vmem:[#allocation14_spill] sm:$0xff] %v10541_v3  ;;  %v10544_v33 = vadd.f32 %v8596_v8, %v1484_v26  ;;  %v7479_v26 = vld [vmem:[%s12090_s2 + $0xf8] sm:$0xff] }
 0x140   : > { %v8549_v14 = vpop.f32.mrf.mxu0  ;;  %8848 = vmatmul.mubr.msk.f32.gmra.mxu0 %vm437_vm0, %v7417_v37  ;;  %v8599_v31 = vpop.f32.mrf.mxu1  ;;  %8868 = vmatprep.subr.mxu1 %v7479_v26 }
 0x141   : > { %v1486_v11 = vadd.f32 %v8549_v14, %v10347_v49  ;;  %8850 = vmatprep.mubr.msk.f32.mxu0 %vm437_vm0, %v7418_v10  ;;  %v7421_v49 = vld [vmem:[%s9806_s17 + $0x3d2] ss:$2 sm:$0xff]  ;;  %8869 = vmatpush3.msra.mxu1 %v7479_v26 }
 0x142   : > { %v10550_v35 = vpop.f32.mrf.mxu0  ;;  %v10552_v17 = vpop.f32.mrf.mxu1  ;;  %v7422_v14 = vld [vmem:[%s9806_s17 + $0x412] ss:$2 sm:$0xff] }
 0x143   : > { %12108 = vst [vmem:[#allocation15_spill] sm:$0xff] %v10550_v35  ;;  %12109 = vst [vmem:[#allocation16_spill] sm:$0xff] %v10552_v17  ;;  %v10555_v51 = vadd.f32 %v8599_v31, %v1486_v11 }
 0x144   : > { %v8552_v57 = vpop.f32.mrf.mxu0  ;;  %8851 = vmatmul.mubr.msk.f32.gmra.mxu0 %vm437_vm0, %v7419_v38  ;;  %v8602_v59 = vpop.f32.mrf.mxu1 }
 0x145   : > { %v1488_v8 = vadd.f32 %v8552_v57, %v10361_v60  ;;  %8853 = vmatprep.mubr.msk.f32.mxu0 %vm437_vm0, %v7420_v45  ;;  %v7423_v45 = vld [vmem:[%s9806_s17 + $0x422] ss:$2 sm:$0xff] }
 0x146   : > { %v10564_v37 = vpop.f32.mrf.mxu0  ;;  %v10566_v10 = vpop.f32.mrf.mxu1  ;;  %v7478_v57 = vld [vmem:[%s12090_s2 + $0xf0] sm:$0xff] }
 0x147   : > { %12110 = vst [vmem:[#allocation17_spill] sm:$0xff] %v10564_v37  ;;  %12111 = vst [vmem:[#allocation18_spill] sm:$0xff] %v10566_v10  ;;  %v10569_v31 = vadd.f32 %v8602_v59, %v1488_v8  ;;  %v7424_v8 = vld [vmem:[%s9806_s17 + $0x462] ss:$2 sm:$0xff]  ;;  %8870 = vmatprep.subr.mxu1 %v7478_v57 }
 0x148   : > { %v8555_v11 = vpop.f32.mrf.mxu0  ;;  %8854 = vmatmul.mubr.msk.f32.gmra.mxu0 %vm437_vm0, %v7421_v49  ;;  %v8605_v60 = vpop.f32.mrf.mxu1  ;;  %8871 = vmatpush3.msra.mxu1 %v7478_v57  ;;  %v7495_v57 = vld [vmem:[%s12090_s2 + $0x178] sm:$0xff]  ;;  %v7486_v37 = vld [vmem:[%s12090_s2 + $0x130] sm:$0xff] }
 0x149   : > { %v1490_v38 = vadd.f32 %v8555_v11, %v10375_v7  ;;  %8856 = vmatprep.mubr.msk.f32.mxu0 %vm437_vm0, %v7422_v14  ;;  %v7425_v11 = vld [vmem:[%s9806_s17 + $0x472] ss:$2 sm:$0xff]  ;;  %8956 = vmatprep.subr.mxu0 %v7495_v57 }
 0x14a   : > { %v10578_v10 = vpop.f32.mrf.mxu0  ;;  %v10580_v59 = vpop.f32.mrf.mxu1  ;;  %8957 = vmatpush3.msra.mxu0 %v7495_v57  ;;  %v7429_v57 = vld [vmem:[%s9806_s17 + $0x512] ss:$2 sm:$0xff] }
 0x14b   : > { %12112 = vst [vmem:[#allocation19_spill] sm:$0xff] %v10578_v10  ;;  %12113 = vst [vmem:[#allocation20_spill] sm:$0xff] %v10580_v59  ;;  %v10583_v26 = vadd.f32 %v8605_v60, %v1490_v38  ;;  %v7477_v10 = vld [vmem:[%s12090_s2 + $0xe8] sm:$0xff]  ;;  %v7426_v60 = vld [vmem:[%s9806_s17 + $0x4b2] ss:$2 sm:$0xff] }
 0x14c   : > { %v8558_v49 = vpop.f32.mrf.mxu0  ;;  %8857 = vmatmul.mubr.msk.f32.gmra.mxu0 %vm437_vm0, %v7423_v45  ;;  %v8608_v7 = vpop.f32.mrf.mxu1  ;;  %8872 = vmatprep.subr.mxu1 %v7477_v10 }
 0x14d   : > { %v1492_v14 = vadd.f32 %v8558_v49, %v10389_v21  ;;  %8859 = vmatprep.mubr.msk.f32.mxu0 %vm437_vm0, %v7424_v8  ;;  %8873 = vmatpush3.msra.mxu1 %v7477_v10  ;;  %v7427_v49 = vld [vmem:[%s9806_s17 + $0x4c2] ss:$2 sm:$0xff] }
 0x14e   : > { %v10592_v59 = vpop.f32.mrf.mxu0  ;;  %v10594_v17 = vpop.f32.mrf.mxu1 }
 0x14f   : > { %12114 = vst [vmem:[#allocation21_spill] sm:$0xff] %v10592_v59  ;;  %12115 = vst [vmem:[#allocation22_spill] sm:$0xff] %v10594_v17  ;;  %v10597_v38 = vadd.f32 %v8608_v7, %v1492_v14  ;;  %v7476_v17 = vld [vmem:[%s12090_s2 + $0xe0] sm:$0xff] }
 0x150   : > { %v8561_v45 = vpop.f32.mrf.mxu0  ;;  %8860 = vmatmul.mubr.msk.f32.gmra.mxu0 %vm437_vm0, %v7425_v11  ;;  %v8611_v21 = vpop.f32.mrf.mxu1  ;;  %v7428_v14 = vld [vmem:[%s9806_s17 + $0x502] ss:$2 sm:$0xff]  ;;  %8874 = vmatprep.subr.mxu1 %v7476_v17 }
 0x151   : > { %v1494_v8 = vadd.f32 %v8561_v45, %v10403_v32  ;;  %8862 = vmatprep.mubr.msk.f32.mxu0 %vm437_vm0, %v7426_v60  ;;  %v7494_v32 = vld [vmem:[%s12090_s2 + $0x170] sm:$0xff]  ;;  %8875 = vmatpush3.msra.mxu1 %v7476_v17 }
 0x152   : > { %v10609_v10 = vpop.f32.mrf.mxu0  ;;  %v10611_v7 = vpop.f32.mrf.mxu1  ;;  %8958 = vmatprep.subr.mxu0 %v7494_v32 }
 0x153   : > { %12116 = vst [vmem:[#allocation23_spill] sm:$0xff] %v10609_v10  ;;  %12117 = vst [vmem:[#allocation24_spill] sm:$0xff] %v10611_v7  ;;  %v10617_v11 = vadd.f32 %v8611_v21, %v1494_v8  ;;  %v7493_v10 = vld [vmem:[%s12090_s2 + $0x168] sm:$0xff]  ;;  %v7475_v21 = vld [vmem:[%s12090_s2 + $0xd8] sm:$0xff]  ;;  %8959 = vmatpush3.msra.mxu0 %v7494_v32 }
 0x154   : > { %v8564_v60 = vpop.f32.mrf.mxu0  ;;  %8863 = vmatmul.mubr.msk.f32.gmra.mxu0 %vm437_vm0, %v7427_v49  ;;  %v8614_v45 = vpop.f32.mrf.mxu1  ;;  %8876 = vmatprep.subr.mxu1 %v7475_v21  ;;  %v7492_v49 = vld [vmem:[%s12090_s2 + $0x160] sm:$0xff]  ;;  %v7491_v32 = vld [vmem:[%s12090_s2 + $0x158] sm:$0xff] }
 0x155   : > { %v1496_v7 = vadd.f32 %v8564_v60, %v10417_v50  ;;  %8865 = vmatprep.mubr.msk.f32.mxu0 %vm437_vm0, %v7428_v14  ;;  %8960 = vmatprep.subr.mxu0 %v7493_v10 }
 0x156   : > { %v10629_v17 = vpop.f32.mrf.mxu0  ;;  %v10631_v8 = vpop.f32.mrf.mxu1  ;;  %8877 = vmatpush3.msra.mxu1 %v7475_v21  ;;  %8961 = vmatpush3.msra.mxu0 %v7493_v10  ;;  %v7490_v10 = vld [vmem:[%s12090_s2 + $0x150] sm:$0xff] }
 0x157   : > { %12118 = vst [vmem:[#allocation25_spill] sm:$0xff] %v10629_v17  ;;  %12119 = vst [vmem:[#allocation26_spill] sm:$0xff] %v10631_v8  ;;  %v10636_v59 = vadd.f32 %v8614_v45, %v1496_v7  ;;  %8962 = vmatprep.subr.mxu0 %v7492_v49  ;;  %v7474_v8 = vld [vmem:[%s12090_s2 + $0xd0] sm:$0xff] }
 0x158   : > { %v8567_v50 = vpop.f32.mrf.mxu0  ;;  %8866 = vmatmul.mubr.msk.f32.gmra.mxu0 %vm437_vm0, %v7429_v57  ;;  %v8617_v14 = vpop.f32.mrf.mxu1  ;;  %8878 = vmatprep.subr.mxu1 %v7474_v8 }
 0x159   : > { %v1498_v60 = vadd.f32 %v8567_v50, %v10430_v2  ;;  %8963 = vmatpush3.msra.mxu0 %v7492_v49  ;;  %8879 = vmatpush3.msra.mxu1 %v7474_v8  ;;  %v7473_v49 = vld [vmem:[%s12090_s2 + $0xc8] sm:$0xff] }
 0x15a   : > { %v10646_v7 = vpop.f32.mrf.mxu0  ;;  %v10648_v45 = vpop.f32.mrf.mxu1  ;;  %8964 = vmatprep.subr.mxu0 %v7491_v32  ;;  %v7489_v50 = vld [vmem:[%s12090_s2 + $0x148] sm:$0xff]  ;;  %8880 = vmatprep.subr.mxu1 %v7473_v49 }
 0x15b   : > { %12120 = vst [vmem:[#allocation27_spill] sm:$0xff] %v10646_v7  ;;  %12121 = vst [vmem:[#allocation28_spill] sm:$0xff] %v10648_v45  ;;  %v10653_v57 = vadd.f32 %v8617_v14, %v1498_v60  ;;  %8965 = vmatpush3.msra.mxu0 %v7491_v32  ;;  %v9709_v32 = vmov 0.0   ;;  %8881 = vmatpush3.msra.mxu1 %v7473_v49  ;;  %v7488_v60 = vld [vmem:[%s12090_s2 + $0x140] sm:$0xff]  ;;  %v7471_v49 = vld [vmem:[%s12090_s2 + $0xb8] sm:$0xff] }
 0x15c   : > { %v8622_v2 = vpop.f32.mrf.mxu0  ;;  %v10655_v21 = vpop.f32.mrf.mxu1  ;;  %8966 = vmatprep.subr.mxu0 %v7490_v10  ;;  %222 = vst [vmem:[#allocation2] sm:$0xff] %v9709_v32  ;;  %223 = vst [vmem:[#allocation2 + $0x8] sm:$0xff] %v9709_v32 }
 0x15d   : > { %v10664_v45 = vadd.f32 %v8622_v2, %v10449_v29  ;;  %8967 = vmatpush3.msra.mxu0 %v7490_v10  ;;  %224 = vst [vmem:[#allocation2 + $0x10] sm:$0xff] %v9709_v32  ;;  %225 = vst [vmem:[#allocation2 + $0x18] sm:$0xff] %v9709_v32  ;;  %v7472_v29 = vld [vmem:[%s12090_s2 + $0xc0] sm:$0xff] }
 0x15e   : > { %v10666_v14 = vpop.f32.mrf.mxu0  ;;  %v10668_v8 = vpop.f32.mrf.mxu1  ;;  %228 = vst [vmem:[#allocation2 + $0x30] sm:$0xff] %v9709_v32  ;;  %231 = vst [vmem:[#allocation2 + $0x48] sm:$0xff] %v9709_v32  ;;  %8968 = vmatprep.subr.mxu0 %v7489_v50  ;;  %8882 = vmatprep.subr.mxu1 %v7472_v29 }
 0x15f   : > { %234 = vst [vmem:[#allocation2 + $0x60] sm:$0xff] %v9709_v32  ;;  %237 = vst [vmem:[#allocation2 + $0x78] sm:$0xff] %v9709_v32  ;;  %8969 = vmatpush3.msra.mxu0 %v7489_v50  ;;  %8883 = vmatpush3.msra.mxu1 %v7472_v29  ;;  %v7470_v29 = vld [vmem:[%s12090_s2 + $0xb0] sm:$0xff] }
 0x160   : > { %240 = vst [vmem:[#allocation2 + $0x90] sm:$0xff] %v9709_v32  ;;  %243 = vst [vmem:[#allocation2 + $0xa8] sm:$0xff] %v9709_v32  ;;  %v8625_v10 = vpop.f32.mrf.mxu0  ;;  %v10676_v2 = vpop.f32.mrf.mxu1  ;;  %8970 = vmatprep.subr.mxu0 %v7488_v60  ;;  %8884 = vmatprep.subr.mxu1 %v7471_v49 }
 0x161   : > { %246 = vst [vmem:[#allocation2 + $0xc0] sm:$0xff] %v9709_v32  ;;  %249 = vst [vmem:[#allocation2 + $0xd8] sm:$0xff] %v9709_v32  ;;  %v10685_v7 = vadd.f32 %v8625_v10, %v10461_v46  ;;  %8971 = vmatpush3.msra.mxu0 %v7488_v60  ;;  %8885 = vmatpush3.msra.mxu1 %v7471_v49  ;;  %v7469_v60 = vld [vmem:[%s12090_s2 + $0xa8] sm:$0xff] }
 0x162   : > { %252 = vst [vmem:[#allocation2 + $0xf0] sm:$0xff] %v9709_v32  ;;  %255 = vst [vmem:[#allocation2 + $0x108] sm:$0xff] %v9709_v32  ;;  %v10687_v50 = vpop.f32.mrf.mxu0  ;;  %v10689_v17 = vpop.f32.mrf.mxu1  ;;  %8886 = vmatprep.subr.mxu1 %v7470_v29  ;;  %v7485_v49 = vld [vmem:[%s12090_s2 + $0x128] sm:$0xff] }
 0x163   : > { %258 = vst [vmem:[#allocation2 + $0x120] sm:$0xff] %v9709_v32  ;;  %261 = vst [vmem:[#allocation2 + $0x138] sm:$0xff] %v9709_v32  ;;  %8887 = vmatpush3.msra.mxu1 %v7470_v29  ;;  %v7468_v29 = vld [vmem:[%s12090_s2 + $0xa0] sm:$0xff] }
 0x164   : > { %264 = vst [vmem:[#allocation2 + $0x150] sm:$0xff] %v9709_v32  ;;  %267 = vst [vmem:[#allocation2 + $0x168] sm:$0xff] %v9709_v32  ;;  %v8628_v46 = vpop.f32.mrf.mxu0  ;;  %v10697_v10 = vpop.f32.mrf.mxu1  ;;  %8888 = vmatprep.subr.mxu1 %v7469_v60 }
 0x165   : > { %270 = vst [vmem:[#allocation2 + $0x180] sm:$0xff] %v9709_v32  ;;  %276 = vst [vmem:[#allocation3] sm:$0xff] %v9709_v32  ;;  %v10706_v35 = vadd.f32 %v8628_v46, %v10473_v4  ;;  %8889 = vmatpush3.msra.mxu1 %v7469_v60  ;;  %v7483_v60 = vld [vmem:[%s12090_s2 + $0x118] sm:$0xff] }
 0x166   : > { %277 = vst [vmem:[#allocation3 + $0x8] sm:$0xff] %v9709_v32  ;;  %278 = vst [vmem:[#allocation3 + $0x10] sm:$0xff] %v9709_v32  ;;  %v10710_v3 = vpop.f32.mrf.mxu1  ;;  %8890 = vmatprep.subr.mxu1 %v7468_v29 }
 0x167   : > { %279 = vst [vmem:[#allocation3 + $0x18] sm:$0xff] %v9709_v32  ;;  %281 = vst [vmem:[#allocation3 + $0x28] sm:$0xff] %v9709_v32  ;;  %8891 = vmatpush3.msra.mxu1 %v7468_v29  ;;  %v7466_v29 = vld [vmem:[%s12090_s2 + $0x90] sm:$0xff] }
 0x168   : > { %282 = vst [vmem:[#allocation3 + $0x30] sm:$0xff] %v9709_v32  ;;  %284 = vst [vmem:[#allocation3 + $0x40] sm:$0xff] %v9709_v32  ;;  %v10718_v46 = vpop.f32.mrf.mxu1 }
 0x169   : > { %285 = vst [vmem:[#allocation3 + $0x48] sm:$0xff] %v9709_v32  ;;  %287 = vst [vmem:[#allocation3 + $0x58] sm:$0xff] %v9709_v32 }
 0x16a   : > { %288 = vst [vmem:[#allocation3 + $0x60] sm:$0xff] %v9709_v32  ;;  %290 = vst [vmem:[#allocation3 + $0x70] sm:$0xff] %v9709_v32  ;;  %v10731_v19 = vpop.f32.mrf.mxu1 }
 0x16b   : > { %291 = vst [vmem:[#allocation3 + $0x78] sm:$0xff] %v9709_v32  ;;  %293 = vst [vmem:[#allocation3 + $0x88] sm:$0xff] %v9709_v32 }
 0x16c   : > { %294 = vst [vmem:[#allocation3 + $0x90] sm:$0xff] %v9709_v32  ;;  %296 = vst [vmem:[#allocation3 + $0xa0] sm:$0xff] %v9709_v32 }
 0x16d   : > { %297 = vst [vmem:[#allocation3 + $0xa8] sm:$0xff] %v9709_v32  ;;  %299 = vst [vmem:[#allocation3 + $0xb8] sm:$0xff] %v9709_v32 }
 0x16e   : > { %300 = vst [vmem:[#allocation3 + $0xc0] sm:$0xff] %v9709_v32  ;;  %302 = vst [vmem:[#allocation3 + $0xd0] sm:$0xff] %v9709_v32  ;;  %v7487_v32 = vld [vmem:[%s12090_s2 + $0x138] sm:$0xff] }
 0x16f   : > { %8972 = vmatprep.subr.mxu0 %v7487_v32  ;;  %12122 = vst [vmem:[#allocation29_spill] sm:$0xff] %v10718_v46  ;;  %12123 = vst [vmem:[#allocation30_spill] sm:$0xff] %v10731_v19 }
 0x170   : > { %8973 = vmatpush3.msra.mxu0 %v7487_v32  ;;  %v10708_v32 = vpop.f32.mrf.mxu0 }
 0x171   : > { %8974 = vmatprep.subr.mxu0 %v7486_v37 }
 0x172   : > { %8975 = vmatpush3.msra.mxu0 %v7486_v37  ;;  %v8631_v4 = vpop.f32.mrf.mxu0  ;;  %v7467_v37 = vld [vmem:[%s12090_s2 + $0x98] sm:$0xff] }
 0x173   : > { %8976 = vmatprep.subr.mxu0 %v7485_v49  ;;  %v10727_v23 = vadd.f32 %v8631_v4, %v10485_v15  ;;  %8892 = vmatprep.subr.mxu1 %v7467_v37  ;;  %v10739_v4 = vpop.f32.mrf.mxu1 }
 0x174   : > { %8977 = vmatpush3.msra.mxu0 %v7485_v49  ;;  %v10729_v49 = vpop.f32.mrf.mxu0  ;;  %8893 = vmatpush3.msra.mxu1 %v7467_v37  ;;  %12124 = vst [vmem:[#allocation31_spill] sm:$0xff] %v10739_v4  ;;  %v7481_v37 = vld [vmem:[%s12090_s2 + $0x108] sm:$0xff]  ;;  %v7480_v4 = vld [vmem:[%s12090_s2 + $0x100] sm:$0xff] }
 0x175   : > { %8978 = vmatprep.subr.mxu0 %v7484_v18  ;;  %8894 = vmatprep.subr.mxu1 %v7466_v29  ;;  %v10752_v19 = vpop.f32.mrf.mxu1 }
 0x176   : > { %8979 = vmatpush3.msra.mxu0 %v7484_v18  ;;  %v8634_v15 = vpop.f32.mrf.mxu0  ;;  %8895 = vmatpush3.msra.mxu1 %v7466_v29  ;;  %v7465_v18 = vld [vmem:[%s12090_s2 + $0x88] sm:$0xff]  ;;  %12127 = vst [vmem:[#allocation34_spill] sm:$0xff] %v10752_v19  ;;  %v7464_v29 = vld [vmem:[%s12090_s2 + $0x80] sm:$0xff] }
 0x177   : > { %8980 = vmatprep.subr.mxu0 %v7483_v60  ;;  %v10748_v12 = vadd.f32 %v8634_v15, %v10497_v48  ;;  %8896 = vmatprep.subr.mxu1 %v7465_v18  ;;  %v4148_v48 = vld [vmem:[#allocation2 + $0x8] ss:$2 sm:$0xff]  ;;  %v4391_v15 = vld [vmem:[#allocation2 + $0x9] ss:$2 sm:$0xff] }
 0x178   : > { %8981 = vmatpush3.msra.mxu0 %v7483_v60  ;;  %v10750_v60 = vpop.f32.mrf.mxu0  ;;  %8897 = vmatpush3.msra.mxu1 %v7465_v18 }
 0x179   : > { %8982 = vmatprep.subr.mxu0 %v7482_v30  ;;  %12125 = vst [vmem:[#allocation32_spill] sm:$0xff] %v10748_v12  ;;  %12126 = vst [vmem:[#allocation33_spill] sm:$0xff] %v10750_v60  ;;  %8898 = vmatprep.subr.mxu1 %v7464_v29  ;;  %v10760_v12 = vpop.f32.mrf.mxu1 }
 0x17a   : > { %8983 = vmatpush3.msra.mxu0 %v7482_v30  ;;  %v8637_v30 = vpop.f32.mrf.mxu0  ;;  %12128 = vst [vmem:[#allocation35_spill] sm:$0xff] %v10760_v12  ;;  %8899 = vmatpush3.msra.mxu1 %v7464_v29 }
 0x17b   : > { %8984 = vmatprep.subr.mxu0 %v7481_v37  ;;  %v10763_v19 = vadd.f32 %v8637_v30, %v10509_v9  ;;  %8900 = vmatprep.mubr.f32.mxu1 %v4148_v48  ;;  %v10767_v60 = vpop.f32.mrf.mxu1 }
 0x17c   : > { %8985 = vmatpush3.msra.mxu0 %v7481_v37  ;;  %v10765_v18 = vpop.f32.mrf.mxu0  ;;  %12131 = vst [vmem:[#allocation38_spill] sm:$0xff] %v10767_v60  ;;  %8988 = vmatprep.mubr.f32.mxu0 %v4391_v15 }
 0x17d   : > { %8986 = vmatprep.subr.mxu0 %v7480_v4  ;;  %12129 = vst [vmem:[#allocation36_spill] sm:$0xff] %v10763_v19  ;;  %12130 = vst [vmem:[#allocation37_spill] sm:$0xff] %v10765_v18  ;;  %v10769_v37 = vpop.f32.mrf.mxu1 }
 0x17e   : > { %8987 = vmatpush3.msra.mxu0 %v7480_v4  ;;  %v8640_v62 = vpop.f32.mrf.mxu0  ;;  %12132 = vst [vmem:[#allocation39_spill] sm:$0xff] %v10769_v37 }
 0x17f   : > { %v10772_v0 = vadd.f32 %v8640_v62, %v10521_v47  ;;  %v10776_v12 = vpop.f32.mrf.mxu1 }
 0x180   : > { %v10774_v46 = vpop.f32.mrf.mxu0  ;;  %12135 = vst [vmem:[#allocation42_spill] sm:$0xff] %v10776_v12 }
 0x181   : > { %12133 = vst [vmem:[#allocation40_spill] sm:$0xff] %v10772_v0  ;;  %12134 = vst [vmem:[#allocation41_spill] sm:$0xff] %v10774_v46  ;;  %v10778_v9 = vpop.f32.mrf.mxu1 }
 0x182   : > { %v8643_v29 = vpop.f32.mrf.mxu0  ;;  %12136 = vst [vmem:[#allocation43_spill] sm:$0xff] %v10778_v9 }
 0x183   : > { %v10781_v4 = vadd.f32 %v8643_v29, %v10533_v55  ;;  %v10785_v30 = vpop.f32.mrf.mxu1 }
 0x184   : > { %v10783_v48 = vpop.f32.mrf.mxu0  ;;  %12139 = vst [vmem:[#allocation46_spill] sm:$0xff] %v10785_v30 }
 0x185   : > { %12137 = vst [vmem:[#allocation44_spill] sm:$0xff] %v10781_v4  ;;  %12138 = vst [vmem:[#allocation45_spill] sm:$0xff] %v10783_v48  ;;  %v10787_v60 = vpop.f32.mrf.mxu1 }
 0x186   : > { %v8646_v15 = vpop.f32.mrf.mxu0  ;;  %12140 = vst [vmem:[#allocation47_spill] sm:$0xff] %v10787_v60  ;;  %v10808_v60 = vld [vmem:[%s12090_s2 + $0x78] sm:$0xff] }
 0x187   : > { %v10790_v62 = vadd.f32 %v8646_v15, %v10544_v33  ;;  %v10794_v37 = vpop.f32.mrf.mxu1  ;;  %12148 = vst [vmem:[#allocation55_spill] sm:$0xff] %v10808_v60  ;;  %v10813_v33 = vld [vmem:[%s12090_s2 + $0x278] sm:$0xff]  ;;  %8912 = vmatprep.subr.mxu1 %v10808_v60 }
 0x188   : > { %v10792_v47 = vpop.f32.mrf.mxu0  ;;  %12143 = vst [vmem:[#allocation50_spill] sm:$0xff] %v10794_v37  ;;  %12149 = vst [vmem:[#allocation56_spill] sm:$0xff] %v10813_v33  ;;  %9044 = vmatprep.subr.mxu0 %v10813_v33 }
 0x189   : > { %12141 = vst [vmem:[#allocation48_spill] sm:$0xff] %v10790_v62  ;;  %12142 = vst [vmem:[#allocation49_spill] sm:$0xff] %v10792_v47  ;;  %v10796_v0 = vpop.f32.mrf.mxu1 }
 0x18a   : > { %v8649_v12 = vpop.f32.mrf.mxu0  ;;  %12144 = vst [vmem:[#allocation51_spill] sm:$0xff] %v10796_v0 }
 0x18b   : > { %v10799_v55 = vadd.f32 %v8649_v12, %v10555_v51  ;;  %v10803_v9 = vpop.f32.mrf.mxu1 }
 0x18c   : > { %v10801_v29 = vpop.f32.mrf.mxu0  ;;  %12147 = vst [vmem:[#allocation54_spill] sm:$0xff] %v10803_v9 }
 0x18d   : > { %12145 = vst [vmem:[#allocation52_spill] sm:$0xff] %v10799_v55  ;;  %12146 = vst [vmem:[#allocation53_spill] sm:$0xff] %v10801_v29  ;;  %v10815_v37 = vpop.f32.mrf.mxu1 }
 0x18e   : > { %v8652_v15 = vpop.f32.mrf.mxu0  ;;  %12150 = vst [vmem:[#allocation57_spill] sm:$0xff] %v10815_v37 }
 0x18f   : > { %v10820_v12 = vadd.f32 %v8652_v15, %v10569_v31  ;;  %v10824_v9 = vpop.f32.mrf.mxu1 }
 0x190   : > { %v10822_v51 = vpop.f32.mrf.mxu0  ;;  %12153 = vst [vmem:[#allocation60_spill] sm:$0xff] %v10824_v9 }
 0x191   : > { %12151 = vst [vmem:[#allocation58_spill] sm:$0xff] %v10820_v12  ;;  %12152 = vst [vmem:[#allocation59_spill] sm:$0xff] %v10822_v51  ;;  %v10826_v55 = vpop.f32.mrf.mxu1 }
 0x192   : > { %v8655_v0 = vpop.f32.mrf.mxu0  ;;  %12154 = vst [vmem:[#allocation61_spill] sm:$0xff] %v10826_v55 }
 0x193   : > { %v10829_v29 = vadd.f32 %v8655_v0, %v10583_v26  ;;  %v10833_v37 = vpop.f32.mrf.mxu1 }
 0x194   : > { %v10831_v62 = vpop.f32.mrf.mxu0  ;;  %12157 = vst [vmem:[#allocation64_spill] sm:$0xff] %v10833_v37 }
 0x195   : > { %12155 = vst [vmem:[#allocation62_spill] sm:$0xff] %v10829_v29  ;;  %12156 = vst [vmem:[#allocation63_spill] sm:$0xff] %v10831_v62  ;;  %v10835_v47 = vpop.f32.mrf.mxu1 }
 0x196   : > { %v8658_v60 = vpop.f32.mrf.mxu0  ;;  %12158 = vst [vmem:[#allocation65_spill] sm:$0xff] %v10835_v47 }
 0x197   : > { %v10838_v31 = vadd.f32 %v8658_v60, %v10597_v38  ;;  %v10842_v12 = vpop.f32.mrf.mxu1 }
 0x198   : > { %v10840_v15 = vpop.f32.mrf.mxu0  ;;  %12161 = vst [vmem:[#allocation68_spill] sm:$0xff] %v10842_v12 }
 0x199   : > { %12159 = vst [vmem:[#allocation66_spill] sm:$0xff] %v10838_v31  ;;  %12160 = vst [vmem:[#allocation67_spill] sm:$0xff] %v10840_v15  ;;  %v10844_v51 = vpop.f32.mrf.mxu1 }
 0x19a   : > { %v8661_v9 = vpop.f32.mrf.mxu0  ;;  %12162 = vst [vmem:[#allocation69_spill] sm:$0xff] %v10844_v51 }
 0x19b   : > { %v10847_v0 = vadd.f32 %v8661_v9, %v10617_v11  ;;  %v10851_v55 = vpop.f32.mrf.mxu1 }
 0x19c   : > { %v10849_v26 = vpop.f32.mrf.mxu0  ;;  %12165 = vst [vmem:[#allocation72_spill] sm:$0xff] %v10851_v55 }
 0x19d   : > { %12163 = vst [vmem:[#allocation70_spill] sm:$0xff] %v10847_v0  ;;  %12164 = vst [vmem:[#allocation71_spill] sm:$0xff] %v10849_v26  ;;  %v10853_v29 = vpop.f32.mrf.mxu1 }
 0x19e   : > { %v8664_v37 = vpop.f32.mrf.mxu0  ;;  %12166 = vst [vmem:[#allocation73_spill] sm:$0xff] %v10853_v29 }
 0x19f   : > { %v10856_v38 = vadd.f32 %v8664_v37, %v10636_v59  ;;  %v10860_v47 = vpop.f32.mrf.mxu1 }
 0x1a0   : > { %v10858_v60 = vpop.f32.mrf.mxu0  ;;  %12169 = vst [vmem:[#allocation76_spill] sm:$0xff] %v10860_v47 }
 0x1a1   : > { %12167 = vst [vmem:[#allocation74_spill] sm:$0xff] %v10856_v38  ;;  %12168 = vst [vmem:[#allocation75_spill] sm:$0xff] %v10858_v60  ;;  %v10862_v31 = vpop.f32.mrf.mxu1 }
 0x1a2   : > { %v8667_v12 = vpop.f32.mrf.mxu0  ;;  %12170 = vst [vmem:[#allocation77_spill] sm:$0xff] %v10862_v31 }
 0x1a3   : > { %v10865_v11 = vadd.f32 %v8667_v12, %v10653_v57  ;;  %v10869_v51 = vpop.f32.mrf.mxu1 }
 0x1a4   : > { %v10867_v9 = vpop.f32.mrf.mxu0  ;;  %12173 = vst [vmem:[#allocation80_spill] sm:$0xff] %v10869_v51 }
 0x1a5   : > { %12171 = vst [vmem:[#allocation78_spill] sm:$0xff] %v10865_v11  ;;  %12172 = vst [vmem:[#allocation79_spill] sm:$0xff] %v10867_v9  ;;  %v8772_v0 = vpop.f32.mrf.mxu1 }
 0x1a6   : > { %v8722_v55 = vpop.f32.mrf.mxu0 }
 0x1a7   : > { %v10871_v26 = vpop.f32.mrf.mxu1 }
 0x1a8   : > { %v2984_v29 = vpop.f32.mrf.mxu0 }
 0x1a9   : > { %v10875_v38 = vpop.f32.mrf.mxu1 }
 0x1aa   : > { %v8725_v59 = vpop.f32.mrf.mxu0 }
 0x1ab   : > { %v10879_v31 = vpop.f32.mrf.mxu1 }
 0x1ac   : > { %v10873_v37 = vpop.f32.mrf.mxu0 }
 0x1ad   : > { %v10885_v11 = vpop.f32.mrf.mxu1 }
 0x1ae   : > { %v10877_v47 = vpop.f32.mrf.mxu0 }
 0x1af   : > { %v10891_v60 = vpop.f32.mrf.mxu1 }
 0x1b0   : > { %v10881_v57 = vpop.f32.mrf.mxu0 }
 0x1b1   : > { %v10897_v33 = vpop.f32.mrf.mxu1 }
 0x1b2   : > { %v10883_v12 = vpop.f32.mrf.mxu0  ;;  %12178 = vst [vmem:[#allocation85_spill] sm:$0xff] %v10897_v33 }
 0x1b3   : > { %v10903_v48 = vpop.f32.mrf.mxu1 }
 0x1b4   : > { %v10887_v51 = vpop.f32.mrf.mxu0  ;;  %12181 = vst [vmem:[#allocation88_spill] sm:$0xff] %v10903_v48 }
 0x1b5   : > { %12174 = vst [vmem:[#allocation81_spill] sm:$0xff] %v10887_v51  ;;  %v10909_v18 = vpop.f32.mrf.mxu1 }
 0x1b6   : > { %v10889_v9 = vpop.f32.mrf.mxu0  ;;  %12184 = vst [vmem:[#allocation91_spill] sm:$0xff] %v10909_v18 }
 0x1b7   : > { %12175 = vst [vmem:[#allocation82_spill] sm:$0xff] %v10889_v9 }
 0x1b8   : > { %v10893_v15 = vpop.f32.mrf.mxu0 }
 0x1b9   : > { %12176 = vst [vmem:[#allocation83_spill] sm:$0xff] %v10893_v15  ;;  %v10915_v15 = vpop.f32.mrf.mxu1 }
 0x1ba   : > { %v10895_v62 = vpop.f32.mrf.mxu0  ;;  %12187 = vst [vmem:[#allocation94_spill] sm:$0xff] %v10915_v15 }
 0x1bb   : > { %12177 = vst [vmem:[#allocation84_spill] sm:$0xff] %v10895_v62 }
 0x1bc   : > { %v10899_v30 = vpop.f32.mrf.mxu0 }
 0x1bd   : > { %12179 = vst [vmem:[#allocation86_spill] sm:$0xff] %v10899_v30  ;;  %v10921_v30 = vpop.f32.mrf.mxu1 }
 0x1be   : > { %v10901_v4 = vpop.f32.mrf.mxu0  ;;  %12190 = vst [vmem:[#allocation97_spill] sm:$0xff] %v10921_v30 }
 0x1bf   : > { %12180 = vst [vmem:[#allocation87_spill] sm:$0xff] %v10901_v4 }
 0x1c0   : > { %v10905_v46 = vpop.f32.mrf.mxu0 }
 0x1c1   : > { %12182 = vst [vmem:[#allocation89_spill] sm:$0xff] %v10905_v46  ;;  %v10927_v46 = vpop.f32.mrf.mxu1 }
 0x1c2   : > { %v10907_v19 = vpop.f32.mrf.mxu0 }
 0x1c3   : > { %12183 = vst [vmem:[#allocation90_spill] sm:$0xff] %v10907_v19 }
 0x1c4   : > { %v10911_v9 = vpop.f32.mrf.mxu0 }
 0x1c5   : > { %12185 = vst [vmem:[#allocation92_spill] sm:$0xff] %v10911_v9  ;;  %v10933_v9 = vpop.f32.mrf.mxu1 }
 0x1c6   : > { %v10913_v51 = vpop.f32.mrf.mxu0  ;;  %12195 = vst [vmem:[#allocation102_spill] sm:$0xff] %v10933_v9 }
 0x1c7   : > { %12186 = vst [vmem:[#allocation93_spill] sm:$0xff] %v10913_v51 }
 0x1c8   : > { %v10917_v62 = vpop.f32.mrf.mxu0 }
 0x1c9   : > { %12188 = vst [vmem:[#allocation95_spill] sm:$0xff] %v10917_v62  ;;  %v10939_v62 = vpop.f32.mrf.mxu1 }
 0x1ca   : > { %v10919_v33 = vpop.f32.mrf.mxu0 }
 0x1cb   : > { %12189 = vst [vmem:[#allocation96_spill] sm:$0xff] %v10919_v33 }
 0x1cc   : > { %v10923_v4 = vpop.f32.mrf.mxu0 }
 0x1cd   : > { %12191 = vst [vmem:[#allocation98_spill] sm:$0xff] %v10923_v4  ;;  %v10947_v4 = vpop.f32.mrf.mxu1 }
 0x1ce   : > { %v10925_v48 = vpop.f32.mrf.mxu0  ;;  %12200 = vst [vmem:[#allocation107_spill] sm:$0xff] %v10947_v4 }
 0x1cf   : > { %12192 = vst [vmem:[#allocation99_spill] sm:$0xff] %v10925_v48  ;;  %v1886_v48 = vadd.f32 %v10443_v22, %v10447_v28 }
 0x1d0   : > { %v10929_v19 = vpop.f32.mrf.mxu0 }
 0x1d1   : > { %12193 = vst [vmem:[#allocation100_spill] sm:$0xff] %v10929_v19 }
 0x1d2   : > { %v10931_v18 = vpop.f32.mrf.mxu0 }
 0x1d3   : > { %12194 = vst [vmem:[#allocation101_spill] sm:$0xff] %v10931_v18  ;;  %v2305_v18 = vadd.f32 %v10666_v14, %v1886_v48  ;;  %v1890_v14 = vadd.f32 %v10467_v61, %v10471_v34 }
 0x1d4   : > { %v10935_v51 = vpop.f32.mrf.mxu0 }
 0x1d5   : > { %12196 = vst [vmem:[#allocation103_spill] sm:$0xff] %v10935_v51  ;;  %v2725_v51 = vadd.f32 %v10655_v21, %v10664_v45  ;;  %v2724_v22 = vadd.f32 %v10668_v8, %v2305_v18  ;;  %v1002_v45 = vadd.f32 %v10341_v42, %v10339_v41  ;;  %v2309_v21 = vadd.f32 %v10708_v32, %v1890_v14  ;;  %v12207_v14 = vld [vmem:[#allocation10_spill] sm:$0xff] }
 0x1d6   : > { %v10937_v15 = vpop.f32.mrf.mxu0  ;;  %v10988_v41 = vadd.f32 %v10383_v16, %v10381_v13  ;;  %v1892_v42 = vadd.f32 %v10479_v20, %v10483_v44  ;;  %v11007_v20 = vadd.f32 %v10411_v40, %v10409_v39  ;;  %v11022_v39 = vadd.f32 %v10436_v6, %v10434_v5  ;;  %v12205_v5 = vld [vmem:[#allocation30_spill] sm:$0xff] }
 0x1d7   : > { %12197 = vst [vmem:[#allocation104_spill] sm:$0xff] %v10937_v15  ;;  %v1888_v15 = vadd.f32 %v10455_v43, %v10459_v25  ;;  %v3144_v4 = vadd.f32 %v8722_v55, %v2725_v51  ;;  %v2727_v43 = vadd.f32 %v10676_v2, %v10685_v7  ;;  %v3143_v25 = vadd.f32 %v2984_v29, %v2724_v22 }
 0x1d8   : > { %v10941_v33 = vpop.f32.mrf.mxu0  ;;  %v10984_v7 = vadd.f32 %v10369_v1, %v10367_v63  ;;  %v2729_v2 = vadd.f32 %v10697_v10, %v10706_v35  ;;  %v11001_v63 = vadd.f32 %v10397_v27, %v10395_v24  ;;  %v2728_v44 = vadd.f32 %v10710_v3, %v2309_v21  ;;  %v12202_v3 = vld [vmem:[#allocation29_spill] sm:$0xff] }
 0x1d9   : > { %12198 = vst [vmem:[#allocation105_spill] sm:$0xff] %v10941_v33  ;;  %v10958_v33 = vpop.f32.mrf.mxu1  ;;  %v2307_v28 = vadd.f32 %v10687_v50, %v1888_v15  ;;  %v10979_v50 = vadd.f32 %v10355_v53, %v10353_v52  ;;  %v3563_v34 = vadd.f32 %v8772_v0, %v3144_v4  ;;  %v3146_v18 = vadd.f32 %v8725_v59, %v2727_v43  ;;  %v10997_v52 = vld [vmem:[%s12092_s4] ss:$0 sm:$0xff]  ;;  %v12203_v0 = vld [vmem:[#allocation8_spill] sm:$0xff]  ;;  %v12206_v59 = vld [vmem:[#allocation33_spill] sm:$0xff] }
 0x1da   : > { %v10943_v30 = vpop.f32.mrf.mxu0  ;;  %v3562_v1 = vadd.f32 %v10871_v26, %v3143_v25  ;;  %v2311_v35 = vadd.f32 %v10729_v49, %v1892_v42  ;;  %v11016_v24 = vadd.f32 %v10425_v58, %v10423_v56  ;;  %v1894_v40 = vadd.f32 %v10491_v36, %v10495_v54  ;;  %v12204_v26 = vld [vmem:[#allocation7_spill] sm:$0xff]  ;;  %v12208_v43 = vld [vmem:[#allocation9_spill] sm:$0xff] }
 0x1db   : > { %12199 = vst [vmem:[#allocation106_spill] sm:$0xff] %v10943_v30  ;;  %v2726_v61 = vadd.f32 %v10689_v17, %v2307_v28  ;;  %v3148_v17 = vadd.f32 %v10877_v47, %v2729_v2  ;;  %v3565_v27 = vadd.f32 %v10875_v38, %v3146_v18  ;;  %v2731_v49 = vadd.f32 %v12202_v3, %v10727_v23  ;;  %v12209_v21 = vld [vmem:[#allocation13_spill] sm:$0xff]  ;;  %v12211_v18 = vld [vmem:[#allocation31_spill] sm:$0xff] }
 0x1dc   : > { %v10949_v19 = vpop.f32.mrf.mxu0  ;;  %v3147_v47 = vadd.f32 %v10881_v57, %v2728_v44  ;;  %v1896_v38 = vadd.f32 %v12204_v26, %v12203_v0  ;;  %v2730_v6 = vadd.f32 %v12205_v5, %v2311_v35  ;;  %v1898_v25 = vadd.f32 %v12208_v43, %v12207_v14  ;;  %v12213_v44 = vld [vmem:[#allocation12_spill] sm:$0xff]  ;;  %v12214_v35 = vld [vmem:[#allocation11_spill] sm:$0xff]  ;;  %v12225_v14 = vld [vmem:[#allocation17_spill] sm:$0xff] }
 0x1dd   : > { %v3145_v13 = vadd.f32 %v10873_v37, %v2726_v61  ;;  %v2313_v37 = vadd.f32 %v12206_v59, %v1894_v40  ;;  %v3567_v36 = vadd.f32 %v10885_v11, %v3148_v17  ;;  %v3150_v57 = vadd.f32 %v10883_v12, %v2731_v49  ;;  %v12218_v49 = vld [vmem:[#allocation85_spill] sm:$0xff]  ;;  %v12220_v0 = vld [vmem:[#allocation15_spill] sm:$0xff]  ;;  %v12221_v5 = vld [vmem:[#allocation36_spill] sm:$0xff] }
 0x1de   : > { %v10952_v9 = vpop.f32.mrf.mxu0  ;;  %v1483_v61 = vadd.f32 %v12209_v21, %v1002_v45  ;;  %v3566_v11 = vadd.f32 %v10891_v60, %v3147_v47  ;;  %v1900_v17 = vadd.f32 %v12214_v35, %v12213_v44  ;;  %v1485_v26 = vadd.f32 %v12220_v0, %v10979_v50  ;;  %v12223_v59 = vld [vmem:[#allocation83_spill] sm:$0xff]  ;;  %v12226_v21 = vld [vmem:[#allocation38_spill] sm:$0xff]  ;;  %v12230_v44 = vld [vmem:[#allocation16_spill] sm:$0xff] }
 0x1df   : > { %v3564_v56 = vadd.f32 %v10879_v31, %v3145_v13  ;;  %v3569_v47 = vadd.f32 %v12218_v49, %v3150_v57  ;;  %v1487_v43 = vadd.f32 %v12225_v14, %v10984_v7  ;;  %v12231_v7 = vld [vmem:[#allocation19_spill] sm:$0xff]  ;;  %v12237_v0 = vld [vmem:[#allocation42_spill] sm:$0xff]  ;;  %v12241_v14 = vld [vmem:[#allocation20_spill] sm:$0xff] }
 0x1e0   : > { %v10960_v30 = vpop.f32.mrf.mxu0  ;;  %v11075_v35 = vadd.f32 %v12230_v44, %v1485_v26 }
 0x1e1   : > { %12201 = vst [vmem:[#allocation108_spill] sm:$0xff] %v10960_v30  ;;  %v10973_v30 = vpop.f32.mrf.mxu1 }
 0x1e2   : > { %v10966_v48 = vpop.f32.mrf.mxu0 }
 0x1e3   : > { %v11012_v10 = vpop.f32.mrf.mxu1 }
 0x1e4   : > { %v10975_v8 = vpop.f32.mrf.mxu0 }
 0x1e5   : > { %v11036_v54 = vpop.f32.mrf.mxu1 }
 0x1e6   : > { %v8822_v53 = vpop.f32.mrf.mxu0 }
 0x1e7   : > { %v3982_v16 = vadd.f32 %v8822_v53, %v3563_v34  ;;  %v12210_v34 = vld [vmem:[#allocation32_spill] sm:$0xff]  ;;  %v12212_v53 = vld [vmem:[#allocation81_spill] sm:$0xff]  ;;  %v11053_v3 = vpop.f32.mrf.mxu1 }
 0x1e8   : > { %v3822_v32 = vpop.f32.mrf.mxu0  ;;  %v2733_v42 = vadd.f32 %v12211_v18, %v12210_v34  ;;  %v12227_v34 = vld [vmem:[#allocation41_spill] sm:$0xff]  ;;  %v12228_v18 = vld [vmem:[#allocation91_spill] sm:$0xff] }
 0x1e9   : > { %v4018_v4 = vadd.f32 %v10997_v52, %v3982_v16  ;;  %v3981_v55 = vadd.f32 %v3822_v32, %v3562_v1  ;;  %v3149_v1 = vadd.f32 %v12212_v53, %v2730_v6  ;;  %v12215_v32 = vld [vmem:[#allocation34_spill] sm:$0xff]  ;;  %v12222_v6 = vld [vmem:[#allocation35_spill] sm:$0xff]  ;;  %v2317_v50 = vadd.f32 %v12227_v34, %v1898_v25  ;;  %v12229_v53 = vld [vmem:[#allocation84_spill] sm:$0xff] }
 0x1ea   : > { %v8825_v29 = vpop.f32.mrf.mxu0  ;;  %v12233_v25 = vld [vmem:[#allocation39_spill] sm:$0xff] }
 0x1eb   : > { %v4050_v58 = vmax.f32 %v4018_v4, 0.0  ;;  %v4017_v51 = vadd.f32 %v10997_v52, %v3981_v55  ;;  %v3984_v15 = vadd.f32 %v8825_v29, %v3565_v27  ;;  %v2732_v27 = vadd.f32 %v12215_v32, %v2313_v37  ;;  %v12216_v4 = vld [vmem:[#allocation37_spill] sm:$0xff]  ;;  %v12217_v55 = vld [vmem:[#allocation82_spill] sm:$0xff]  ;;  %v12244_v34 = vld [vmem:[#allocation43_spill] sm:$0xff] }
 0x1ec   : > { %v3832_v23 = vpop.f32.mrf.mxu0  ;;  %v2315_v45 = vadd.f32 %v12216_v4, %v1896_v38  ;;  %v3152_v40 = vadd.f32 %v12217_v55, %v2733_v42  ;;  %v2735_v38 = vadd.f32 %v12222_v6, %v12221_v5  ;;  %v1489_v32 = vadd.f32 %v12231_v7, %v10988_v41  ;;  %v12238_v5 = vld [vmem:[#allocation45_spill] sm:$0xff]  ;;  %v12239_v6 = vld [vmem:[#allocation87_spill] sm:$0xff] }
 0x1ed   : > { %4083 = vst [vmem:[#allocation2 + $0x28] sm:$0xff] %v4050_v58  ;;  %v4049_v31 = vmax.f32 %v4017_v51, 0.0  ;;  %v4020_v22 = vadd.f32 %v10997_v52, %v3984_v15  ;;  %v3983_v28 = vadd.f32 %v3832_v23, %v3564_v56  ;;  %v12219_v51 = vld [vmem:[#allocation14_spill] sm:$0xff]  ;;  %v3151_v37 = vadd.f32 %v12223_v59, %v2732_v27  ;;  %v12224_v23 = vld [vmem:[#allocation88_spill] sm:$0xff] }
 0x1ee   : > { %v8828_v2 = vpop.f32.mrf.mxu0  ;;  %v1902_v15 = vadd.f32 %v12219_v51, %v1483_v61  ;;  %v2734_v61 = vadd.f32 %v12226_v21, %v2315_v45  ;;  %v3571_v42 = vadd.f32 %v12228_v18, %v3152_v40  ;;  %v12232_v27 = vld [vmem:[#allocation40_spill] sm:$0xff]  ;;  %v12234_v45 = vld [vmem:[#allocation94_spill] sm:$0xff]  ;;  %v2736_v26 = vadd.f32 %v12237_v0, %v2317_v50  ;;  %v12245_v18 = vld [vmem:[#allocation89_spill] sm:$0xff] }
 0x1ef   : > { %4082 = vst [vmem:[#allocation2 + $0x20] sm:$0xff] %v4049_v31  ;;  %v4052_v12 = vmax.f32 %v4020_v22, 0.0  ;;  %v4019_v13 = vadd.f32 %v10997_v52, %v3983_v28  ;;  %v3986_v16 = vadd.f32 %v8828_v2, %v3567_v36  ;;  %v3568_v31 = vadd.f32 %v12224_v23, %v3149_v1 }
 0x1f0   : > { %v3842_v60 = vpop.f32.mrf.mxu0  ;;  %v2737_v4 = vadd.f32 %v12233_v25, %v12232_v27  ;;  %v3570_v55 = vadd.f32 %v12234_v45, %v3151_v37  ;;  %v2319_v41 = vadd.f32 %v12238_v5, %v1900_v17  ;;  %v12242_v17 = vld [vmem:[#allocation21_spill] sm:$0xff] }
 0x1f1   : > { %4085 = vst [vmem:[#allocation2 + $0x40] sm:$0xff] %v4052_v12  ;;  %v4051_v29 = vmax.f32 %v4019_v13, 0.0  ;;  %v4022_v56 = vadd.f32 %v10997_v52, %v3986_v16  ;;  %v3985_v58 = vadd.f32 %v3842_v60, %v3566_v11  ;;  %v11070_v11 = vpop.f32.mrf.mxu1  ;;  %v3154_v12 = vadd.f32 %v12229_v53, %v2735_v38  ;;  %v12235_v60 = vld [vmem:[#allocation86_spill] sm:$0xff]  ;;  %v12247_v27 = vld [vmem:[#allocation49_spill] sm:$0xff] }
 0x1f2   : > { %v8831_v36 = vpop.f32.mrf.mxu0  ;;  %v3153_v49 = vadd.f32 %v12235_v60, %v2734_v61  ;;  %v3156_v38 = vadd.f32 %v12239_v6, %v2737_v4  ;;  %v1491_v21 = vadd.f32 %v12242_v17, %v11001_v63  ;;  %v12243_v61 = vld [vmem:[#allocation44_spill] sm:$0xff]  ;;  %v12246_v63 = vld [vmem:[#allocation46_spill] sm:$0xff]  ;;  %v2321_v25 = vadd.f32 %v12247_v27, %v1902_v15  ;;  %v12249_v60 = vld [vmem:[#allocation55_spill] sm:$0xff] }
 0x1f3   : > { %4084 = vst [vmem:[#allocation2 + $0x38] sm:$0xff] %v4051_v29  ;;  %v4054_v57 = vmax.f32 %v4022_v56, 0.0  ;;  %v4021_v22 = vadd.f32 %v10997_v52, %v3985_v58  ;;  %v3988_v28 = vadd.f32 %v8831_v36, %v3569_v47  ;;  %v12236_v58 = vld [vmem:[#allocation18_spill] sm:$0xff]  ;;  %v11090_v59 = vpop.f32.mrf.mxu1  ;;  %v12240_v36 = vld [vmem:[#allocation97_spill] sm:$0xff]  ;;  %v2739_v50 = vadd.f32 %v12244_v34, %v12243_v61  ;;  %v12254_v6 = vld [vmem:[#allocation47_spill] sm:$0xff] }
 0x1f4   : > { %v3852_v2 = vpop.f32.mrf.mxu0  ;;  %v11085_v51 = vadd.f32 %v12236_v58, %v1487_v43  ;;  %v3573_v23 = vadd.f32 %v12240_v36, %v3154_v12  ;;  %v11098_v43 = vadd.f32 %v12241_v14, %v1489_v32  ;;  %v2738_v32 = vadd.f32 %v12246_v63, %v2319_v41  ;;  %v12248_v4 = vld [vmem:[#allocation102_spill] sm:$0xff]  ;;  %v12253_v41 = vld [vmem:[#allocation48_spill] sm:$0xff]  ;;  %v12257_v61 = vld [vmem:[#allocation53_spill] sm:$0xff] }
 0x1f5   : > { %4087 = vst [vmem:[#allocation2 + $0x58] sm:$0xff] %v4054_v57  ;;  %v4053_v1 = vmax.f32 %v4021_v22, 0.0  ;;  %v4024_v13 = vadd.f32 %v10997_v52, %v3988_v28  ;;  %v3987_v16 = vadd.f32 %v3852_v2, %v3568_v31  ;;  %v4145_v28 = vld [vmem:[%s12090_s2 + $0x70] sm:$0xff]  ;;  %v3575_v45 = vadd.f32 %v12248_v4, %v3156_v38  ;;  %v12262_v27 = vld [vmem:[#allocation51_spill] sm:$0xff] }
 0x1f6   : > { %v8834_v40 = vpop.f32.mrf.mxu0  ;;  %v2741_v38 = vadd.f32 %v12254_v6, %v12253_v41  ;;  %v2323_v34 = vadd.f32 %v12257_v61, %v11075_v35  ;;  %v4142_v35 = vld [vmem:[%s12090_s2 + $0x58] sm:$0xff]  ;;  %v12263_v4 = vld [vmem:[#allocation95_spill] sm:$0xff] }
 0x1f7   : > { %4086 = vst [vmem:[#allocation2 + $0x50] sm:$0xff] %v4053_v1  ;;  %v4056_v47 = vmax.f32 %v4024_v13, 0.0  ;;  %v4023_v29 = vadd.f32 %v10997_v52, %v3987_v16  ;;  %v3990_v56 = vadd.f32 %v8834_v40, %v3571_v42  ;;  %v3155_v42 = vadd.f32 %v12245_v18, %v2736_v26  ;;  %v7526_v1 = vld [vmem:[%s12090_s2 + $0x270] sm:$0xff]  ;;  %v12252_v26 = vld [vmem:[#allocation22_spill] sm:$0xff] }
 0x1f8   : > { %v3862_v37 = vpop.f32.mrf.mxu0  ;;  %v3572_v13 = vadd.f32 %v10927_v46, %v3153_v49  ;;  %v4144_v46 = vld [vmem:[%s12090_s2 + $0x68] sm:$0xff]  ;;  %v11126_v5 = vadd.f32 %v12252_v26, %v1491_v21 }
 0x1f9   : > { %4089 = vst [vmem:[#allocation2 + $0x70] sm:$0xff] %v4056_v47  ;;  %v4055_v31 = vmax.f32 %v4023_v29, 0.0  ;;  %v4026_v57 = vadd.f32 %v10997_v52, %v3990_v56  ;;  %v3989_v22 = vadd.f32 %v3862_v37, %v3570_v55  ;;  %v11113_v55 = vpop.f32.mrf.mxu1  ;;  %v12250_v47 = vld [vmem:[#allocation56_spill] sm:$0xff]  ;;  %v12251_v29 = vld [vmem:[#allocation90_spill] sm:$0xff]  ;;  %v3574_v37 = vadd.f32 %v10939_v62, %v3155_v42  ;;  %v12265_v26 = vld [vmem:[#allocation59_spill] sm:$0xff] }
 0x1fa   : > { %v8837_v2 = vpop.f32.mrf.mxu0  ;;  %v4150_v53 = vld [vmem:[#allocation2 + $0x38] ss:$2 sm:$0xff]  ;;  %v4393_v12 = vld [vmem:[#allocation2 + $0x39] ss:$2 sm:$0xff]  ;;  %v7525_v49 = vld [vmem:[%s12090_s2 + $0x268] sm:$0xff]  ;;  %v3158_v56 = vadd.f32 %v12251_v29, %v2739_v50 }
 0x1fb   : > { %4088 = vst [vmem:[#allocation2 + $0x68] sm:$0xff] %v4055_v31  ;;  %v4058_v16 = vmax.f32 %v4026_v57, 0.0  ;;  %v4025_v44 = vadd.f32 %v10997_v52, %v3989_v22  ;;  %v3992_v7 = vadd.f32 %v8837_v2, %v3573_v23  ;;  %8901 = vmatmul.mubr.f32.vlgmr.msra.gmra.mxu1 %v4150_v53  ;;  %8989 = vmatmul.mubr.f32.vlgmr.msra.gmra.mxu0 %v4393_v12  ;;  %v4143_v23 = vld [vmem:[%s12090_s2 + $0x60] sm:$0xff]  ;;  %v12255_v57 = vld [vmem:[#allocation92_spill] sm:$0xff]  ;;  %v12258_v50 = vld [vmem:[#allocation93_spill] sm:$0xff]  ;;  %v11143_v42 = vpop.f32.mrf.mxu1 }
 0x1fc   : > { %v3872_v40 = vpop.f32.mrf.mxu0  ;;  %8913 = vmatpush3.msra.mxu1 %v12249_v60  ;;  %9045 = vmatpush3.msra.mxu0 %v12250_v47  ;;  %v7524_v31 = vld [vmem:[%s12090_s2 + $0x260] sm:$0xff]  ;;  %v3157_v22 = vadd.f32 %v12255_v57, %v2738_v32  ;;  %v3160_v18 = vadd.f32 %v12258_v50, %v2741_v38  ;;  %v12261_v32 = vld [vmem:[#allocation52_spill] sm:$0xff] }
 0x1fd   : > { %4091 = vst [vmem:[#allocation2 + $0x88] sm:$0xff] %v4058_v16  ;;  %v4057_v15 = vmax.f32 %v4025_v44, 0.0  ;;  %v4028_v58 = vadd.f32 %v10997_v52, %v3992_v7  ;;  %v3991_v0 = vadd.f32 %v3872_v40, %v3572_v13  ;;  %8914 = vmatprep.subr.mxu1 %v4145_v28  ;;  %9046 = vmatprep.subr.mxu0 %v7526_v1  ;;  %v12256_v62 = vld [vmem:[#allocation50_spill] sm:$0xff]  ;;  %v12259_v53 = vld [vmem:[#allocation107_spill] sm:$0xff]  ;;  %v11170_v6 = vpop.f32.mrf.mxu1 }
 0x1fe   : > { %v8840_v36 = vpop.f32.mrf.mxu0  ;;  %8915 = vmatpush3.msra.mxu1 %v4145_v28  ;;  %9047 = vmatpush3.msra.mxu0 %v7526_v1  ;;  %v2740_v28 = vadd.f32 %v12256_v62, %v2321_v25  ;;  %v3577_v12 = vadd.f32 %v12259_v53, %v3158_v56  ;;  %v7523_v44 = vld [vmem:[%s12090_s2 + $0x258] sm:$0xff]  ;;  %v12260_v7 = vld [vmem:[#allocation23_spill] sm:$0xff]  ;;  %v2743_v25 = vadd.f32 %v12262_v27, %v12261_v32 }
 0x1ff   : > { %4090 = vst [vmem:[#allocation2 + $0x80] sm:$0xff] %v4057_v15  ;;  %v4060_v14 = vmax.f32 %v4028_v58, 0.0  ;;  %v4027_v17 = vadd.f32 %v10997_v52, %v3991_v0  ;;  %v3994_v21 = vadd.f32 %v8840_v36, %v3575_v45  ;;  %8916 = vmatprep.subr.mxu1 %v4144_v46  ;;  %9048 = vmatprep.subr.mxu0 %v7525_v49  ;;  %v7522_v15 = vld [vmem:[%s12090_s2 + $0x250] sm:$0xff]  ;;  %v12264_v58 = vld [vmem:[#allocation54_spill] sm:$0xff] }
 0x200   : > { %v3882_v2 = vpop.f32.mrf.mxu0  ;;  %8917 = vmatpush3.msra.mxu1 %v4144_v46  ;;  %9049 = vmatpush3.msra.mxu0 %v7525_v49  ;;  %v1493_v63 = vadd.f32 %v12260_v7, %v11007_v20  ;;  %v3159_v45 = vadd.f32 %v12263_v4, %v2740_v28  ;;  %v3576_v46 = vadd.f32 %v10958_v33, %v3157_v22  ;;  %v4141_v20 = vld [vmem:[%s12090_s2 + $0x50] sm:$0xff] }
 0x201   : > { %4093 = vst [vmem:[#allocation2 + $0xa0] sm:$0xff] %v4060_v14  ;;  %v4059_v1 = vmax.f32 %v4027_v17, 0.0  ;;  %v4030_v13 = vadd.f32 %v10997_v52, %v3994_v21  ;;  %v3993_v16 = vadd.f32 %v3882_v2, %v3574_v37  ;;  %8918 = vmatprep.subr.mxu1 %v4143_v23  ;;  %9050 = vmatprep.subr.mxu0 %v7524_v31  ;;  %v12266_v37 = vld [vmem:[#allocation96_spill] sm:$0xff]  ;;  %v12268_v17 = vld [vmem:[#allocation58_spill] sm:$0xff]  ;;  %v12269_v21 = vld [vmem:[#allocation57_spill] sm:$0xff] }
 0x202   : > { %v8843_v40 = vpop.f32.mrf.mxu0  ;;  %v4152_v60 = vld [vmem:[#allocation2 + $0x68] ss:$2 sm:$0xff]  ;;  %v4395_v47 = vld [vmem:[#allocation2 + $0x69] ss:$2 sm:$0xff]  ;;  %8919 = vmatpush3.msra.mxu1 %v4143_v23  ;;  %9051 = vmatpush3.msra.mxu0 %v7524_v31  ;;  %v2742_v0 = vadd.f32 %v12264_v58, %v2323_v34  ;;  %v2325_v33 = vadd.f32 %v12265_v26, %v11085_v51  ;;  %v3579_v41 = vadd.f32 %v10973_v30, %v3160_v18  ;;  %v12270_v34 = vld [vmem:[#allocation98_spill] sm:$0xff] }
 0x203   : > { %4092 = vst [vmem:[#allocation2 + $0x98] sm:$0xff] %v4059_v1  ;;  %v4062_v49 = vmax.f32 %v4030_v13, 0.0  ;;  %v4029_v29 = vadd.f32 %v10997_v52, %v3993_v16  ;;  %v3996_v56 = vadd.f32 %v8843_v40, %v3577_v12  ;;  %8903 = vmatprep.mubr.f32.mxu1 %v4152_v60  ;;  %8991 = vmatprep.mubr.f32.mxu0 %v4395_v47  ;;  %v4140_v51 = vld [vmem:[%s12090_s2 + $0x48] sm:$0xff]  ;;  %v4139_v12 = vld [vmem:[%s12090_s2 + $0x40] sm:$0xff]  ;;  %v12274_v40 = vld [vmem:[#allocation25_spill] sm:$0xff] }
 0x204   : > { %v3892_v38 = vpop.f32.mrf.mxu0  ;;  %8920 = vmatprep.subr.mxu1 %v4142_v35  ;;  %9052 = vmatprep.subr.mxu0 %v7523_v44  ;;  %v3162_v36 = vadd.f32 %v12266_v37, %v2743_v25  ;;  %v7521_v30 = vld [vmem:[%s12090_s2 + $0x248] sm:$0xff]  ;;  %v2745_v62 = vadd.f32 %v12269_v21, %v12268_v17  ;;  %v3578_v28 = vadd.f32 %v11012_v10, %v3159_v45  ;;  %v7520_v10 = vld [vmem:[%s12090_s2 + $0x240] sm:$0xff]  ;;  %v7519_v58 = vld [vmem:[%s12090_s2 + $0x238] sm:$0xff] }
 0x205   : > { %4095 = vst [vmem:[#allocation2 + $0xb8] sm:$0xff] %v4062_v49  ;;  %v4061_v23 = vmax.f32 %v4029_v29, 0.0  ;;  %v4032_v31 = vadd.f32 %v10997_v52, %v3996_v56  ;;  %v3995_v57 = vadd.f32 %v3892_v38, %v3576_v46  ;;  %8921 = vmatpush3.msra.mxu1 %v4142_v35  ;;  %9053 = vmatpush3.msra.mxu0 %v7523_v44  ;;  %v12267_v22 = vld [vmem:[#allocation24_spill] sm:$0xff]  ;;  %v12272_v16 = vld [vmem:[#allocation63_spill] sm:$0xff]  ;;  %v12275_v47 = vld [vmem:[#allocation62_spill] sm:$0xff] }
 0x206   : > { %v11181_v14 = vadd.f32 %v12267_v22, %v1493_v63  ;;  %v8846_v61 = vpop.f32.mrf.mxu0  ;;  %8922 = vmatprep.subr.mxu1 %v4141_v20  ;;  %9054 = vmatprep.subr.mxu0 %v7522_v15  ;;  %v3161_v50 = vadd.f32 %v12270_v34, %v2742_v0  ;;  %v12271_v1 = vld [vmem:[#allocation60_spill] sm:$0xff]  ;;  %v2327_v35 = vadd.f32 %v12272_v16, %v11098_v43  ;;  %v12273_v44 = vld [vmem:[#allocation99_spill] sm:$0xff]  ;;  %v11198_v63 = vpop.f32.mrf.mxu1  ;;  %v4138_v43 = vld [vmem:[%s12090_s2 + $0x38] sm:$0xff] }
 0x207   : > { %4094 = vst [vmem:[#allocation2 + $0xb0] sm:$0xff] %v4061_v23  ;;  %v4064_v18 = vmax.f32 %v4032_v31, 0.0  ;;  %v4031_v2 = vadd.f32 %v10997_v52, %v3995_v57  ;;  %v3998_v53 = vadd.f32 %v8846_v61, %v3579_v41  ;;  %8923 = vmatpush3.msra.mxu1 %v4141_v20  ;;  %9055 = vmatpush3.msra.mxu0 %v7522_v15  ;;  %v12276_v46 = vld [vmem:[#allocation61_spill] sm:$0xff]  ;;  %v12277_v29 = vld [vmem:[#allocation100_spill] sm:$0xff]  ;;  %v12279_v37 = vld [vmem:[#allocation67_spill] sm:$0xff] }
 0x208   : > { %v2744_v13 = vadd.f32 %v12271_v1, %v2325_v33  ;;  %v3164_v7 = vadd.f32 %v12273_v44, %v2745_v62  ;;  %v3902_v32 = vpop.f32.mrf.mxu0  ;;  %8924 = vmatprep.subr.mxu1 %v4140_v51  ;;  %9056 = vmatprep.subr.mxu0 %v7521_v30  ;;  %v3581_v27 = vadd.f32 %v11036_v54, %v3162_v36  ;;  %v12278_v41 = vld [vmem:[#allocation64_spill] sm:$0xff]  ;;  %v11219_v31 = vpop.f32.mrf.mxu1  ;;  %v12281_v21 = vld [vmem:[#allocation26_spill] sm:$0xff]  ;;  %v12283_v61 = vld [vmem:[#allocation65_spill] sm:$0xff] }
 0x209   : > { %4097 = vst [vmem:[#allocation2 + $0xd0] sm:$0xff] %v4064_v18  ;;  %v4063_v25 = vmax.f32 %v4031_v2, 0.0  ;;  %v4034_v4 = vadd.f32 %v10997_v52, %v3998_v53  ;;  %v3997_v45 = vadd.f32 %v3902_v32, %v3578_v28  ;;  %8925 = vmatpush3.msra.mxu1 %v4140_v51  ;;  %9057 = vmatpush3.msra.mxu0 %v7521_v30  ;;  %v7518_v51 = vld [vmem:[%s12090_s2 + $0x230] sm:$0xff]  ;;  %v12282_v28 = vld [vmem:[#allocation66_spill] sm:$0xff]  ;;  %v4136_v2 = vld [vmem:[%s12090_s2 + $0x28] sm:$0xff] }
 0x20a   : > { %v1495_v60 = vadd.f32 %v12274_v40, %v11016_v24  ;;  %v2747_v49 = vadd.f32 %v12276_v46, %v12275_v47  ;;  %v3163_v56 = vadd.f32 %v12277_v29, %v2744_v13  ;;  %v8849_v54 = vpop.f32.mrf.mxu0  ;;  %v4154_v20 = vld [vmem:[#allocation2 + $0x98] ss:$2 sm:$0xff]  ;;  %v4397_v15 = vld [vmem:[#allocation2 + $0x99] ss:$2 sm:$0xff]  ;;  %8926 = vmatprep.subr.mxu1 %v4139_v12  ;;  %9058 = vmatprep.subr.mxu0 %v7520_v10  ;;  %v7517_v53 = vld [vmem:[%s12090_s2 + $0x228] sm:$0xff] }
 0x20b   : > { %v3580_v0 = vadd.f32 %v11053_v3, %v3161_v50  ;;  %4096 = vst [vmem:[#allocation2 + $0xc8] sm:$0xff] %v4063_v25  ;;  %v4066_v26 = vmax.f32 %v4034_v4, 0.0  ;;  %v4033_v24 = vadd.f32 %v10997_v52, %v3997_v45  ;;  %v4000_v33 = vadd.f32 %v8849_v54, %v3581_v27  ;;  %8904 = vmatmul.mubr.f32.gmra.mxu1 %v4154_v20  ;;  %v4137_v3 = vld [vmem:[%s12090_s2 + $0x30] sm:$0xff]  ;;  %v12286_v44 = vld [vmem:[#allocation71_spill] sm:$0xff]  ;;  %v11245_v25 = vpop.f32.mrf.mxu1  ;;  %v12289_v29 = vld [vmem:[#allocation70_spill] sm:$0xff] }
 0x20c   : > { %8992 = vmatmul.mubr.f32.gmra.mxu0 %v4397_v15  ;;  %v2746_v38 = vadd.f32 %v12278_v41, %v2327_v35  ;;  %v2329_v36 = vadd.f32 %v12279_v37, %v11126_v5  ;;  %v3583_v23 = vadd.f32 %v11070_v11, %v3164_v7  ;;  %v3912_v57 = vpop.f32.mrf.mxu0  ;;  %8927 = vmatpush3.msra.mxu1 %v4139_v12  ;;  %v12280_v30 = vld [vmem:[#allocation101_spill] sm:$0xff]  ;;  %v12284_v12 = vld [vmem:[#allocation103_spill] sm:$0xff]  ;;  %v12287_v32 = vld [vmem:[#allocation104_spill] sm:$0xff] }
 0x20d   : > { %9059 = vmatpush3.msra.mxu0 %v7520_v10  ;;  %v3166_v22 = vadd.f32 %v12280_v30, %v2747_v49  ;;  %4099 = vst [vmem:[#allocation2 + $0xe8] sm:$0xff] %v4066_v26  ;;  %v4065_v17 = vmax.f32 %v4033_v24, 0.0  ;;  %v4036_v5 = vadd.f32 %v10997_v52, %v4000_v33  ;;  %v3999_v11 = vadd.f32 %v3912_v57, %v3580_v0  ;;  %v7516_v47 = vld [vmem:[%s12090_s2 + $0x220] sm:$0xff]  ;;  %v12291_v54 = vld [vmem:[#allocation105_spill] sm:$0xff]  ;;  %v12292_v37 = vld [vmem:[#allocation72_spill] sm:$0xff] }
 0x20e   : > { %8928 = vmatprep.subr.mxu1 %v4138_v43  ;;  %9060 = vmatprep.subr.mxu0 %v7519_v58  ;;  %v1914_v62 = vadd.f32 %v12281_v21, %v1495_v60  ;;  %v2749_v34 = vadd.f32 %v12283_v61, %v12282_v28  ;;  %v3582_v50 = vadd.f32 %v11090_v59, %v3163_v56  ;;  %v8852_v18 = vpop.f32.mrf.mxu0  ;;  %v12285_v59 = vld [vmem:[#allocation68_spill] sm:$0xff]  ;;  %v12288_v46 = vld [vmem:[#allocation27_spill] sm:$0xff]  ;;  %v12294_v30 = vld [vmem:[#allocation106_spill] sm:$0xff] }
 0x20f   : > { %8929 = vmatpush3.msra.mxu1 %v4138_v43  ;;  %9061 = vmatpush3.msra.mxu0 %v7519_v58  ;;  %v3165_v10 = vadd.f32 %v12284_v12, %v2746_v38  ;;  %4098 = vst [vmem:[#allocation2 + $0xe0] sm:$0xff] %v4065_v17  ;;  %v4068_v1 = vmax.f32 %v4036_v5, 0.0  ;;  %v4035_v13 = vadd.f32 %v10997_v52, %v3999_v11  ;;  %v7515_v38 = vld [vmem:[%s12090_s2 + $0x218] sm:$0xff]  ;;  %v4133_v21 = vld [vmem:[%s12090_s2 + $0x10] sm:$0xff] }
 0x210   : > { %v4002_v16 = vadd.f32 %v8852_v18, %v3583_v23  ;;  %8930 = vmatprep.subr.mxu1 %v4137_v3  ;;  %9062 = vmatprep.subr.mxu0 %v7518_v51  ;;  %v2748_v35 = vadd.f32 %v12285_v59, %v2329_v36  ;;  %v2331_v7 = vadd.f32 %v12286_v44, %v11181_v14  ;;  %v3922_v4 = vpop.f32.mrf.mxu0  ;;  %v4135_v14 = vld [vmem:[%s12090_s2 + $0x20] sm:$0xff] }
 0x211   : > { %v3168_v27 = vadd.f32 %v12287_v32, %v2749_v34  ;;  %8931 = vmatpush3.msra.mxu1 %v4137_v3  ;;  %9063 = vmatpush3.msra.mxu0 %v7518_v51  ;;  %v3585_v45 = vadd.f32 %v11113_v55, %v3166_v22  ;;  %4101 = vst [vmem:[#allocation2 + $0x100] sm:$0xff] %v4068_v1  ;;  %v4067_v43 = vmax.f32 %v4035_v13, 0.0  ;;  %v12290_v55 = vld [vmem:[#allocation69_spill] sm:$0xff]  ;;  %v12293_v23 = vld [vmem:[#allocation75_spill] sm:$0xff]  ;;  %v8814_v3 = vpop.f32.mrf.mxu1  ;;  %v12296_v61 = vld [vmem:[#allocation74_spill] sm:$0xff] }
 0x212   : > { %v4038_v40 = vadd.f32 %v10997_v52, %v4002_v16  ;;  %v4001_v60 = vadd.f32 %v3922_v4, %v3582_v50  ;;  %8932 = vmatprep.subr.mxu1 %v4136_v2  ;;  %9064 = vmatprep.subr.mxu0 %v7517_v53  ;;  %v1497_v49 = vadd.f32 %v12288_v46, %v11022_v39  ;;  %v8855_v15 = vpop.f32.mrf.mxu0  ;;  %v4156_v58 = vld [vmem:[#allocation2 + $0xc8] ss:$2 sm:$0xff]  ;;  %v4399_v0 = vld [vmem:[#allocation2 + $0xc9] ss:$2 sm:$0xff]  ;;  %v4134_v39 = vld [vmem:[%s12090_s2 + $0x18] sm:$0xff] }
 0x213   : > { %v2751_v56 = vadd.f32 %v12290_v55, %v12289_v29  ;;  %v3167_v20 = vadd.f32 %v12291_v54, %v2748_v35  ;;  %8933 = vmatpush3.msra.mxu1 %v4136_v2  ;;  %9065 = vmatpush3.msra.mxu0 %v7517_v53  ;;  %v3584_v26 = vadd.f32 %v11143_v42, %v3165_v10  ;;  %v12297_v34 = vld [vmem:[#allocation73_spill] sm:$0xff]  ;;  %v4132_v13 = vld [vmem:[%s12090_s2 + $0x8] sm:$0xff] }
 0x214   : > { %4100 = vst [vmem:[#allocation2 + $0xf8] sm:$0xff] %v4067_v43  ;;  %v4070_v24 = vmax.f32 %v4038_v40, 0.0  ;;  %v4037_v33 = vadd.f32 %v10997_v52, %v4001_v60  ;;  %v4004_v41 = vadd.f32 %v8855_v15, %v3585_v45  ;;  %8906 = vmatprep.mubr.f32.mxu1 %v4156_v58  ;;  %8994 = vmatprep.mubr.f32.mxu0 %v4399_v0  ;;  %v3932_v51 = vpop.f32.mrf.mxu0  ;;  %v12298_v16 = vld [vmem:[#allocation76_spill] sm:$0xff]  ;;  %v12299_v35 = vld [vmem:[#allocation79_spill] sm:$0xff]  ;;  %v12300_v60 = vld [vmem:[#allocation78_spill] sm:$0xff] }
 0x215   : > { %v2750_v36 = vadd.f32 %v12292_v37, %v2331_v7  ;;  %v2333_v57 = vadd.f32 %v12293_v23, %v1914_v62  ;;  %v3587_v42 = vadd.f32 %v11170_v6, %v3168_v27  ;;  %8934 = vmatprep.subr.mxu1 %v4135_v14  ;;  %9066 = vmatprep.subr.mxu0 %v7516_v47  ;;  %v7514_v6 = vld [vmem:[%s12090_s2 + $0x210] sm:$0xff]  ;;  %v3543_v7 = vpop.f32.mrf.mxu1  ;;  %v4131_v40 = vld [vmem:[%s12090_s2] sm:$0xff] }
 0x216   : > { %v3170_v22 = vadd.f32 %v12294_v30, %v2751_v56  ;;  %4103 = vst [vmem:[#allocation2 + $0x118] sm:$0xff] %v4070_v24  ;;  %v4069_v17 = vmax.f32 %v4037_v33, 0.0  ;;  %v4040_v5 = vadd.f32 %v10997_v52, %v4004_v41  ;;  %v4003_v11 = vadd.f32 %v3932_v51, %v3584_v26  ;;  %8935 = vmatpush3.msra.mxu1 %v4135_v14  ;;  %v12295_v62 = vld [vmem:[#allocation28_spill] sm:$0xff]  ;;  %v8858_v2 = vpop.f32.mrf.mxu0  ;;  %v12301_v14 = vld [vmem:[#allocation77_spill] sm:$0xff] }
 0x217   : > { %9067 = vmatpush3.msra.mxu0 %v7516_v47  ;;  %v1916_v28 = vadd.f32 %v12295_v62, %v1497_v49  ;;  %v2753_v50 = vadd.f32 %v12297_v34, %v12296_v61  ;;  %v3586_v18 = vadd.f32 %v11198_v63, %v3167_v20  ;;  %8936 = vmatprep.subr.mxu1 %v4134_v39  ;;  %v7513_v63 = vld [vmem:[%s12090_s2 + $0x208] sm:$0xff]  ;;  %v8817_v24 = vpop.f32.mrf.mxu1  ;;  %v7511_v41 = vld [vmem:[%s12090_s2 + $0x1f8] sm:$0xff] }
 0x218   : > { %9068 = vmatprep.subr.mxu0 %v7515_v38  ;;  %v3169_v53 = vadd.f32 %v10949_v19, %v2750_v36  ;;  %4102 = vst [vmem:[#allocation2 + $0x110] sm:$0xff] %v4069_v17  ;;  %v4072_v12 = vmax.f32 %v4040_v5, 0.0  ;;  %v4039_v10 = vadd.f32 %v10997_v52, %v4003_v11  ;;  %v4006_v1 = vadd.f32 %v8858_v2, %v3587_v42  ;;  %v3942_v32 = vpop.f32.mrf.mxu0  ;;  %v12302_v47 = vld [vmem:[#allocation108_spill] sm:$0xff] }
 0x219   : > { %8937 = vmatpush3.msra.mxu1 %v4134_v39  ;;  %9069 = vmatpush3.msra.mxu0 %v7515_v38  ;;  %v2752_v59 = vadd.f32 %v12298_v16, %v2333_v57  ;;  %v2335_v44 = vadd.f32 %v12299_v35, %v1916_v28  ;;  %v3172_v19 = vadd.f32 %v10952_v9, %v2753_v50  ;;  %v12303_v58 = vld [vmem:[#allocation80_spill] sm:$0xff] }
 0x21a   : > { %8938 = vmatprep.subr.mxu1 %v4133_v21  ;;  %9070 = vmatprep.subr.mxu0 %v7514_v6  ;;  %v3589_v27 = vadd.f32 %v11219_v31, %v3170_v22  ;;  %4105 = vst [vmem:[#allocation2 + $0x130] sm:$0xff] %v4072_v12  ;;  %v4071_v4 = vmax.f32 %v4039_v10, 0.0  ;;  %v4042_v45 = vadd.f32 %v10997_v52, %v4006_v1  ;;  %v8861_v49 = vpop.f32.mrf.mxu0  ;;  %v7512_v31 = vld [vmem:[%s12090_s2 + $0x200] sm:$0xff] }
 0x21b   : > { %v4005_v43 = vadd.f32 %v3942_v32, %v3586_v18  ;;  %8939 = vmatpush3.msra.mxu1 %v4133_v21  ;;  %9071 = vmatpush3.msra.mxu0 %v7514_v6  ;;  %v2755_v9 = vadd.f32 %v12301_v14, %v12300_v60  ;;  %v3171_v46 = vadd.f32 %v12302_v47, %v2752_v59  ;;  %v4158_v29 = vld [vmem:[#allocation2 + $0xf8] ss:$2 sm:$0xff]  ;;  %v4401_v55 = vld [vmem:[#allocation2 + $0xf9] ss:$2 sm:$0xff] }
 0x21c   : > { %8940 = vmatprep.subr.mxu1 %v4132_v13  ;;  %9072 = vmatprep.subr.mxu0 %v7513_v63  ;;  %v3588_v56 = vadd.f32 %v11245_v25, %v3169_v53  ;;  %4104 = vst [vmem:[#allocation2 + $0x128] sm:$0xff] %v4071_v4  ;;  %v4074_v54 = vmax.f32 %v4042_v45, 0.0  ;;  %v4008_v15 = vadd.f32 %v8861_v49, %v3589_v27  ;;  %v3952_v33 = vpop.f32.mrf.mxu0  ;;  %v7559_v25 = vld [vmem:[%s12090_s2 + $0x378] sm:$0xff]  ;;  %v4683_v35 = vld [vmem:[#allocation2 + $0x20] ss:$2 sm:$0xff] }
 0x21d   : > { %v4041_v20 = vadd.f32 %v10997_v52, %v4005_v43  ;;  %8907 = vmatmul.mubr.f32.gmra.mxu1 %v4158_v29  ;;  %8995 = vmatmul.mubr.f32.gmra.mxu0 %v4401_v55  ;;  %v2754_v0 = vadd.f32 %v12303_v58, %v2335_v44  ;;  %v3591_v26 = vadd.f32 %v8814_v3, %v3172_v19  ;;  %v4118_v44 = vld [vmem:[#allocation2 + $0x37] ss:$2 sm:$0xff]  ;;  %v4685_v19 = vld [vmem:[#allocation2 + $0x50] ss:$2 sm:$0xff]  ;;  %v4120_v32 = vld [vmem:[#allocation2 + $0x67] ss:$2 sm:$0xff] }
 0x21e   : > { %8941 = vmatpush3.msra.mxu1 %v4132_v13  ;;  %9073 = vmatpush3.msra.mxu0 %v7513_v63  ;;  %v3174_v39 = vadd.f32 %v10966_v48, %v2755_v9  ;;  %4107 = vst [vmem:[#allocation2 + $0x148] sm:$0xff] %v4074_v54  ;;  %v4044_v37 = vadd.f32 %v10997_v52, %v4008_v15  ;;  %v8864_v57 = vpop.f32.mrf.mxu0  ;;  %v3553_v48 = vpop.f32.mrf.mxu1  ;;  %v4116_v63 = vld [vmem:[#allocation2 + $0x7] ss:$2 sm:$0xff]  ;;  %v4687_v27 = vld [vmem:[#allocation2 + $0x80] ss:$2 sm:$0xff]  ;;  %v7555_v49 = vld [vmem:[%s12090_s2 + $0x358] sm:$0xff] }
 0x21f   : > { %v4073_v38 = vmax.f32 %v4041_v20, 0.0  ;;  %v4007_v36 = vadd.f32 %v3952_v33, %v3588_v56  ;;  %8942 = vmatprep.subr.mxu1 %v4131_v40  ;;  %9074 = vmatprep.subr.mxu0 %v7512_v31  ;;  %v3590_v23 = vadd.f32 %v3543_v7, %v3171_v46  ;;  %v3173_v42 = vadd.f32 %v10975_v8, %v2754_v0  ;;  %v7510_v7 = vld [vmem:[%s12090_s2 + $0x1f0] sm:$0xff]  ;;  %v7509_v4 = vld [vmem:[%s12090_s2 + $0x1e8] sm:$0xff]  ;;  %v7508_v60 = vld [vmem:[%s12090_s2 + $0x1e0] sm:$0xff] }
 0x220   : > { %8943 = vmatpush3.msra.mxu1 %v4131_v40  ;;  %9075 = vmatpush3.msra.mxu0 %v7512_v31  ;;  %v4076_v3 = vmax.f32 %v4044_v37, 0.0  ;;  %v4010_v30 = vadd.f32 %v8864_v57, %v3591_v26  ;;  %v3962_v22 = vpop.f32.mrf.mxu0  ;;  %v3593_v17 = vadd.f32 %v8817_v24, %v3174_v39  ;;  %v7557_v45 = vld [vmem:[%s12090_s2 + $0x368] sm:$0xff]  ;;  %v4122_v43 = vld [vmem:[#allocation2 + $0x97] ss:$2 sm:$0xff]  ;;  %v4689_v40 = vld [vmem:[#allocation2 + $0xb0] ss:$2 sm:$0xff] }
 0x221   : > { %4106 = vst [vmem:[#allocation2 + $0x140] sm:$0xff] %v4073_v38  ;;  %v4043_v51 = vadd.f32 %v10997_v52, %v4007_v36  ;;  %9000 = vmatprep.subr.mxu1 %v7511_v41  ;;  %9132 = vmatprep.subr.mxu0 %v7559_v25  ;;  %v4009_v21 = vadd.f32 %v3962_v22, %v3590_v23  ;;  %v7556_v14 = vld [vmem:[%s12090_s2 + $0x360] sm:$0xff]  ;;  %v7507_v46 = vld [vmem:[%s12090_s2 + $0x1d8] sm:$0xff]  ;;  %v7506_v31 = vld [vmem:[%s12090_s2 + $0x1d0] sm:$0xff] }
 0x222   : > { %4109 = vst [vmem:[#allocation2 + $0x160] sm:$0xff] %v4076_v3  ;;  %v4046_v11 = vadd.f32 %v10997_v52, %v4010_v30  ;;  %v8867_v6 = vpop.f32.mrf.mxu0  ;;  %v3592_v61 = vadd.f32 %v3553_v48, %v3173_v42  ;;  %v4124_v9 = vld [vmem:[#allocation2 + $0xc7] ss:$2 sm:$0xff]  ;;  %v4691_v47 = vld [vmem:[#allocation2 + $0xe0] ss:$2 sm:$0xff]  ;;  %v7503_v39 = vld [vmem:[%s12090_s2 + $0x1b8] sm:$0xff] }
 0x223   : > { %v4075_v5 = vmax.f32 %v4043_v51, 0.0  ;;  %v4160_v62 = vld [vmem:[#allocation2 + $0x128] ss:$2 sm:$0xff]  ;;  %v4403_v28 = vld [vmem:[#allocation2 + $0x129] ss:$2 sm:$0xff]  ;;  %v4045_v34 = vadd.f32 %v10997_v52, %v4009_v21  ;;  %v4012_v50 = vadd.f32 %v8867_v6, %v3593_v17  ;;  %v7504_v24 = vld [vmem:[%s12090_s2 + $0x1c0] sm:$0xff] }
 0x224   : > { %v4078_v8 = vmax.f32 %v4046_v11, 0.0  ;;  %8909 = vmatprep.mubr.f32.mxu1 %v4160_v62  ;;  %8997 = vmatprep.mubr.f32.mxu0 %v4403_v28  ;;  %v3972_v18 = vpop.f32.mrf.mxu0  ;;  %v4126_v29 = vld [vmem:[#allocation2 + $0xf7] ss:$2 sm:$0xff]  ;;  %v4693_v55 = vld [vmem:[#allocation2 + $0x110] ss:$2 sm:$0xff]  ;;  %v7505_v15 = vld [vmem:[%s12090_s2 + $0x1c8] sm:$0xff] }
 0x225   : > { %4108 = vst [vmem:[#allocation2 + $0x158] sm:$0xff] %v4075_v5  ;;  %v4077_v2 = vmax.f32 %v4045_v34, 0.0  ;;  %v4048_v53 = vadd.f32 %v10997_v52, %v4012_v50  ;;  %v4011_v12 = vadd.f32 %v3972_v18, %v3592_v61  ;;  %v7554_v56 = vld [vmem:[%s12090_s2 + $0x350] sm:$0xff]  ;;  %v7553_v58 = vld [vmem:[%s12090_s2 + $0x348] sm:$0xff]  ;;  %v7552_v33 = vld [vmem:[%s12090_s2 + $0x340] sm:$0xff] }
 0x226   : > { %4111 = vst [vmem:[#allocation2 + $0x178] sm:$0xff] %v4078_v8  ;;  %v4128_v54 = vld [vmem:[#allocation2 + $0x127] ss:$2 sm:$0xff]  ;;  %v7551_v38 = vld [vmem:[%s12090_s2 + $0x338] sm:$0xff] }
 0x227   : > { %4110 = vst [vmem:[#allocation2 + $0x170] sm:$0xff] %v4077_v2  ;;  %v4080_v10 = vmax.f32 %v4048_v53, 0.0  ;;  %v4047_v1 = vadd.f32 %v10997_v52, %v4011_v12  ;;  %v7558_v52 = vld [vmem:[%s12090_s2 + $0x370] sm:$0xff]  ;;  %v7501_v23 = vld [vmem:[%s12090_s2 + $0x1a8] sm:$0xff]  ;;  %v7500_v42 = vld [vmem:[%s12090_s2 + $0x1a0] sm:$0xff] }
 0x228   : > { %v4695_v20 = vld [vmem:[#allocation2 + $0x140] ss:$2 sm:$0xff]  ;;  %v7502_v37 = vld [vmem:[%s12090_s2 + $0x1b0] sm:$0xff]  ;;  %v7499_v51 = vld [vmem:[%s12090_s2 + $0x198] sm:$0xff] }
 0x229   : > { %4113 = vst [vmem:[#allocation2 + $0x190] sm:$0xff] %v4080_v10  ;;  %v4079_v13 = vmax.f32 %v4047_v1, 0.0  ;;  %v7550_v36 = vld [vmem:[%s12090_s2 + $0x330] sm:$0xff]  ;;  %v7549_v57 = vld [vmem:[%s12090_s2 + $0x328] sm:$0xff]  ;;  %v7548_v3 = vld [vmem:[%s12090_s2 + $0x320] sm:$0xff] }
 0x22a   : > { %v7547_v30 = vld [vmem:[%s12090_s2 + $0x318] sm:$0xff]  ;;  %v7498_v48 = vld [vmem:[%s12090_s2 + $0x190] sm:$0xff]  ;;  %v7497_v17 = vld [vmem:[%s12090_s2 + $0x188] sm:$0xff] }
 0x22b   : > { %4112 = vst [vmem:[#allocation2 + $0x188] sm:$0xff] %v4079_v13  ;;  %v7546_v22 = vld [vmem:[%s12090_s2 + $0x310] sm:$0xff]  ;;  %v7545_v5 = vld [vmem:[%s12090_s2 + $0x308] sm:$0xff]  ;;  %v7496_v11 = vld [vmem:[%s12090_s2 + $0x180] sm:$0xff] }
 0x22c   : > { %v4162_v16 = vld [vmem:[#allocation2 + $0x158] ss:$2 sm:$0xff]  ;;  %v4405_v59 = vld [vmem:[#allocation2 + $0x159] ss:$2 sm:$0xff]  ;;  %v7542_v34 = vld [vmem:[%s12090_s2 + $0x2f0] sm:$0xff] }
 0x22d   : > { %8910 = vmatmul.mubr.f32.gmra.mxu1 %v4162_v16  ;;  %8998 = vmatmul.mubr.f32.gmra.mxu0 %v4405_v59  ;;  %v4130_v0 = vld [vmem:[#allocation2 + $0x157] ss:$2 sm:$0xff]  ;;  %v4978_v61 = vld [vmem:[#allocation2 + $0x67] ss:$2 sm:$0xff] }
 0x22e   : > { %9076 = vmatprep.mubr.f32.mxu0 %v4683_v35  ;;  %8944 = vmatprep.mubr.f32.mxu1 %v4116_v63  ;;  %v4697_v26 = vld [vmem:[#allocation2 + $0x170] ss:$2 sm:$0xff]  ;;  %v7544_v21 = vld [vmem:[%s12090_s2 + $0x300] sm:$0xff]  ;;  %v4539_v28 = vld [vmem:[#allocation2 + $0x4f] ss:$2 sm:$0xff] }
 0x22f   : > { %v7543_v6 = vld [vmem:[%s12090_s2 + $0x2f8] sm:$0xff]  ;;  %v7590_v50 = vld [vmem:[%s12090_s2 + $0x470] sm:$0xff]  ;;  %v7541_v2 = vld [vmem:[%s12090_s2 + $0x2e8] sm:$0xff] }
 0x230   : > { %v7591_v62 = vld [vmem:[%s12090_s2 + $0x478] sm:$0xff]  ;;  %v7589_v53 = vld [vmem:[%s12090_s2 + $0x468] sm:$0xff]  ;;  %v7540_v13 = vld [vmem:[%s12090_s2 + $0x2e0] sm:$0xff] }
 0x231   : > { %8945 = vmatmul.mubr.f32.vlgmr.msra.gmra.mxu1 %v4118_v44  ;;  %9077 = vmatmul.mubr.f32.vlgmr.msra.gmra.mxu0 %v4685_v19  ;;  %v4541_v8 = vld [vmem:[#allocation2 + $0x7f] ss:$2 sm:$0xff]  ;;  %v4543_v12 = vld [vmem:[#allocation2 + $0xaf] ss:$2 sm:$0xff] }
 0x232   : > { %9001 = vmatpush3.msra.mxu1 %v7511_v41  ;;  %9133 = vmatpush3.msra.mxu0 %v7559_v25  ;;  %v4537_v41 = vld [vmem:[#allocation2 + $0x1f] ss:$2 sm:$0xff]  ;;  %v4547_v44 = vld [vmem:[#allocation2 + $0x10f] ss:$2 sm:$0xff] }
 0x233   : > { %8947 = vmatprep.mubr.f32.mxu1 %v4120_v32  ;;  %9002 = vmatprep.subr.mxu1 %v7510_v7  ;;  %v4976_v25 = vld [vmem:[#allocation2 + $0x37] ss:$2 sm:$0xff]  ;;  %v4982_v10 = vld [vmem:[#allocation2 + $0xc7] ss:$2 sm:$0xff] }
 0x234   : > { %9079 = vmatprep.mubr.f32.mxu0 %v4687_v27  ;;  %9134 = vmatprep.subr.mxu0 %v7558_v52  ;;  %v4980_v18 = vld [vmem:[#allocation2 + $0x97] ss:$2 sm:$0xff]  ;;  %v4986_v19 = vld [vmem:[#allocation2 + $0x127] ss:$2 sm:$0xff] }
 0x235   : > { %9003 = vmatpush3.msra.mxu1 %v7510_v7  ;;  %9135 = vmatpush3.msra.mxu0 %v7558_v52  ;;  %v4545_v1 = vld [vmem:[#allocation2 + $0xdf] ss:$2 sm:$0xff]  ;;  %v7538_v52 = vld [vmem:[%s12090_s2 + $0x2d0] sm:$0xff] }
 0x236   : > { %9004 = vmatprep.subr.mxu1 %v7509_v4  ;;  %9136 = vmatprep.subr.mxu0 %v7557_v45  ;;  %v7588_v63 = vld [vmem:[%s12090_s2 + $0x460] sm:$0xff]  ;;  %v7539_v59 = vld [vmem:[%s12090_s2 + $0x2d8] sm:$0xff]  ;;  %v7586_v32 = vld [vmem:[%s12090_s2 + $0x450] sm:$0xff] }
 0x237   : > { %8948 = vmatmul.mubr.f32.gmra.mxu1 %v4122_v43  ;;  %9080 = vmatmul.mubr.f32.gmra.mxu0 %v4689_v40  ;;  %v4984_v16 = vld [vmem:[#allocation2 + $0xf7] ss:$2 sm:$0xff]  ;;  %v4990_v40 = vld [vmem:[#allocation2 + $0x187] ss:$2 sm:$0xff] }
 0x238   : > { %9005 = vmatpush3.msra.mxu1 %v7509_v4  ;;  %9137 = vmatpush3.msra.mxu0 %v7557_v45  ;;  %v7587_v35 = vld [vmem:[%s12090_s2 + $0x458] sm:$0xff]  ;;  %v7537_v4 = vld [vmem:[%s12090_s2 + $0x2c8] sm:$0xff] }
 0x239   : > { %8950 = vmatprep.mubr.f32.mxu1 %v4124_v9  ;;  %9006 = vmatprep.subr.mxu1 %v7508_v60  ;;  %v4549_v7 = vld [vmem:[#allocation2 + $0x13f] ss:$2 sm:$0xff]  ;;  %v4551_v43 = vld [vmem:[#allocation2 + $0x16f] ss:$2 sm:$0xff] }
 0x23a   : > { %9082 = vmatprep.mubr.f32.mxu0 %v4691_v47  ;;  %9138 = vmatprep.subr.mxu0 %v7556_v14  ;;  %v4988_v27 = vld [vmem:[#allocation2 + $0x157] ss:$2 sm:$0xff]  ;;  %v7585_v45 = vld [vmem:[%s12090_s2 + $0x448] sm:$0xff] }
 0x23b   : > { %9007 = vmatpush3.msra.mxu1 %v7508_v60  ;;  %9139 = vmatpush3.msra.mxu0 %v7556_v14  ;;  %v4829_v60 = vld [vmem:[#allocation2 + $0x21] ss:$2 sm:$0xff] }
 0x23c   : > { %9008 = vmatprep.subr.mxu1 %v7507_v46  ;;  %9140 = vmatprep.subr.mxu0 %v7555_v49  ;;  %v7536_v14 = vld [vmem:[%s12090_s2 + $0x2c0] sm:$0xff] }
 0x23d   : > { %8951 = vmatmul.mubr.f32.gmra.mxu1 %v4126_v29  ;;  %9083 = vmatmul.mubr.f32.gmra.mxu0 %v4693_v55  ;;  %v7584_v9 = vld [vmem:[%s12090_s2 + $0x440] sm:$0xff]  ;;  %v7534_v29 = vld [vmem:[%s12090_s2 + $0x2b0] sm:$0xff] }
 0x23e   : > { %9009 = vmatpush3.msra.mxu1 %v7507_v46  ;;  %9141 = vmatpush3.msra.mxu0 %v7555_v49  ;;  %v5268_v47 = vld [vmem:[#allocation2 + $0x39] ss:$2 sm:$0xff]  ;;  %v7582_v55 = vld [vmem:[%s12090_s2 + $0x430] sm:$0xff] }
 0x23f   : > { %8953 = vmatprep.mubr.f32.mxu1 %v4128_v54  ;;  %9010 = vmatprep.subr.mxu1 %v7506_v31  ;;  %v7535_v46 = vld [vmem:[%s12090_s2 + $0x2b8] sm:$0xff]  ;;  %v7532_v54 = vld [vmem:[%s12090_s2 + $0x2a0] sm:$0xff] }
 0x240   : > { %9085 = vmatprep.mubr.f32.mxu0 %v4695_v20  ;;  %9142 = vmatprep.subr.mxu0 %v7554_v56  ;;  %v7583_v49 = vld [vmem:[%s12090_s2 + $0x438] sm:$0xff]  ;;  %v7580_v20 = vld [vmem:[%s12090_s2 + $0x420] sm:$0xff] }
 0x241   : > { %9011 = vmatpush3.msra.mxu1 %v7506_v31  ;;  %9143 = vmatpush3.msra.mxu0 %v7554_v56  ;;  %v7533_v31 = vld [vmem:[%s12090_s2 + $0x2a8] sm:$0xff] }
 0x242   : > { %9012 = vmatprep.subr.mxu1 %v7505_v15  ;;  %9144 = vmatprep.subr.mxu0 %v7553_v58  ;;  %v7581_v56 = vld [vmem:[%s12090_s2 + $0x428] sm:$0xff] }
 0x243   : > { %8954 = vmatmul.mubr.f32.gmra.mxu1 %v4130_v0  ;;  %9086 = vmatmul.mubr.f32.gmra.mxu0 %v4697_v26  ;;  %v7530_v0 = vld [vmem:[%s12090_s2 + $0x290] sm:$0xff] }
 0x244   : > { %9013 = vmatpush3.msra.mxu1 %v7505_v15  ;;  %9145 = vmatpush3.msra.mxu0 %v7553_v58  ;;  %v7531_v15 = vld [vmem:[%s12090_s2 + $0x298] sm:$0xff]  ;;  %v7578_v26 = vld [vmem:[%s12090_s2 + $0x410] sm:$0xff] }
 0x245   : > { %9014 = vmatprep.subr.mxu1 %v7504_v24  ;;  %9032 = vmatprep.mubr.f32.mxu1 %v4537_v41  ;;  %v7579_v58 = vld [vmem:[%s12090_s2 + $0x418] sm:$0xff]  ;;  %v7528_v41 = vld [vmem:[%s12090_s2 + $0x280] sm:$0xff] }
 0x246   : > { %9146 = vmatprep.subr.mxu0 %v7552_v33  ;;  %9164 = vmatprep.mubr.f32.mxu0 %v4976_v25  ;;  %v7576_v25 = vld [vmem:[%s12090_s2 + $0x400] sm:$0xff] }
 0x247   : > { %9015 = vmatpush3.msra.mxu1 %v7504_v24  ;;  %9147 = vmatpush3.msra.mxu0 %v7552_v33  ;;  %v7529_v24 = vld [vmem:[%s12090_s2 + $0x288] sm:$0xff] }
 0x248   : > { %9016 = vmatprep.subr.mxu1 %v7503_v39  ;;  %9148 = vmatprep.subr.mxu0 %v7551_v38  ;;  %v7577_v33 = vld [vmem:[%s12090_s2 + $0x408] sm:$0xff] }
 0x249   : > { %9017 = vmatpush3.msra.mxu1 %v7503_v39  ;;  %9149 = vmatpush3.msra.mxu0 %v7551_v38  ;;  %v7575_v39 = vld [vmem:[%s12090_s2 + $0x3f8] sm:$0xff] }
 0x24a   : > { %9018 = vmatprep.subr.mxu1 %v7502_v37  ;;  %9150 = vmatprep.subr.mxu0 %v7550_v36  ;;  %v4831_v38 = vld [vmem:[#allocation2 + $0x51] ss:$2 sm:$0xff] }
 0x24b   : > { %9019 = vmatpush3.msra.mxu1 %v7502_v37  ;;  %9151 = vmatpush3.msra.mxu0 %v7550_v36  ;;  %v5270_v37 = vld [vmem:[#allocation2 + $0x69] ss:$2 sm:$0xff] }
 0x24c   : > { %9020 = vmatprep.subr.mxu1 %v7501_v23  ;;  %9152 = vmatprep.subr.mxu0 %v7549_v57  ;;  %v4833_v36 = vld [vmem:[#allocation2 + $0x81] ss:$2 sm:$0xff] }
 0x24d   : > { %9021 = vmatpush3.msra.mxu1 %v7501_v23  ;;  %9153 = vmatpush3.msra.mxu0 %v7549_v57  ;;  %v7574_v23 = vld [vmem:[%s12090_s2 + $0x3f0] sm:$0xff]  ;;  %v5272_v57 = vld [vmem:[#allocation2 + $0x99] ss:$2 sm:$0xff] }
 0x24e   : > { %9022 = vmatprep.subr.mxu1 %v7500_v42  ;;  %9154 = vmatprep.subr.mxu0 %v7548_v3 }
 0x24f   : > { %9023 = vmatpush3.msra.mxu1 %v7500_v42  ;;  %9155 = vmatpush3.msra.mxu0 %v7548_v3  ;;  %v7573_v42 = vld [vmem:[%s12090_s2 + $0x3e8] sm:$0xff]  ;;  %v4835_v3 = vld [vmem:[#allocation2 + $0xb1] ss:$2 sm:$0xff] }
 0x250   : > { %9024 = vmatprep.subr.mxu1 %v7499_v51  ;;  %9156 = vmatprep.subr.mxu0 %v7547_v30 }
 0x251   : > { %9025 = vmatpush3.msra.mxu1 %v7499_v51  ;;  %9157 = vmatpush3.msra.mxu0 %v7547_v30  ;;  %v5274_v51 = vld [vmem:[#allocation2 + $0xc9] ss:$2 sm:$0xff] }
 0x252   : > { %9026 = vmatprep.subr.mxu1 %v7498_v48  ;;  %9158 = vmatprep.subr.mxu0 %v7546_v22  ;;  %v4837_v30 = vld [vmem:[#allocation2 + $0xe1] ss:$2 sm:$0xff] }
 0x253   : > { %9027 = vmatpush3.msra.mxu1 %v7498_v48  ;;  %9159 = vmatpush3.msra.mxu0 %v7546_v22  ;;  %v7572_v48 = vld [vmem:[%s12090_s2 + $0x3e0] sm:$0xff] }
 0x254   : > { %9028 = vmatprep.subr.mxu1 %v7497_v17  ;;  %9160 = vmatprep.subr.mxu0 %v7545_v5  ;;  %v5276_v22 = vld [vmem:[#allocation2 + $0xf9] ss:$2 sm:$0xff] }
 0x255   : > { %9029 = vmatpush3.msra.mxu1 %v7497_v17  ;;  %9161 = vmatpush3.msra.mxu0 %v7545_v5  ;;  %v7571_v17 = vld [vmem:[%s12090_s2 + $0x3d8] sm:$0xff] }
 0x256   : > { %9030 = vmatprep.subr.mxu1 %v7496_v11  ;;  %9162 = vmatprep.subr.mxu0 %v7544_v21  ;;  %v4839_v5 = vld [vmem:[#allocation2 + $0x111] ss:$2 sm:$0xff] }
 0x257   : > { %9031 = vmatpush3.msra.mxu1 %v7496_v11  ;;  %9163 = vmatpush3.msra.mxu0 %v7544_v21  ;;  %v5278_v11 = vld [vmem:[#allocation2 + $0x129] ss:$2 sm:$0xff] }
 0x258   : > { %9033 = vmatmul.mubr.f32.vlgmr.msra.gmra.mxu1 %v4539_v28  ;;  %9088 = vmatprep.subr.mxu1 %v7543_v6  ;;  %v4841_v21 = vld [vmem:[#allocation2 + $0x141] ss:$2 sm:$0xff] }
 0x259   : > { %9165 = vmatmul.mubr.f32.vlgmr.msra.gmra.mxu0 %v4978_v61  ;;  %9220 = vmatprep.subr.mxu0 %v7591_v62  ;;  %v7569_v28 = vld [vmem:[%s12090_s2 + $0x3c8] sm:$0xff]  ;;  %v4843_v61 = vld [vmem:[#allocation2 + $0x171] ss:$2 sm:$0xff] }
 0x25a   : > { %9035 = vmatprep.mubr.f32.mxu1 %v4541_v8  ;;  %9089 = vmatpush3.msra.mxu1 %v7543_v6  ;;  %v7570_v6 = vld [vmem:[%s12090_s2 + $0x3d0] sm:$0xff]  ;;  %v7568_v8 = vld [vmem:[%s12090_s2 + $0x3c0] sm:$0xff] }
 0x25b   : > { %9167 = vmatprep.mubr.f32.mxu0 %v4980_v18  ;;  %9221 = vmatpush3.msra.mxu0 %v7591_v62  ;;  %v5280_v62 = vld [vmem:[#allocation2 + $0x159] ss:$2 sm:$0xff] }
 0x25c   : > { %9090 = vmatprep.subr.mxu1 %v7542_v34  ;;  %9222 = vmatprep.subr.mxu0 %v7590_v50  ;;  %v7567_v18 = vld [vmem:[%s12090_s2 + $0x3b8] sm:$0xff] }
 0x25d   : > { %9091 = vmatpush3.msra.mxu1 %v7542_v34  ;;  %9223 = vmatpush3.msra.mxu0 %v7590_v50  ;;  %v5282_v34 = vld [vmem:[#allocation2 + $0x189] ss:$2 sm:$0xff]  ;;  %v5122_v50 = vld [vmem:[#allocation2 + $0x38] ss:$2 sm:$0xff] }
 0x25e   : > { %9036 = vmatmul.mubr.f32.gmra.mxu1 %v4543_v12  ;;  %9092 = vmatprep.subr.mxu1 %v7541_v2  ;;  %v7564_v12 = vld [vmem:[%s12090_s2 + $0x3a0] sm:$0xff] }
 0x25f   : > { %9168 = vmatmul.mubr.f32.gmra.mxu0 %v4982_v10  ;;  %9224 = vmatprep.subr.mxu0 %v7589_v53  ;;  %v7563_v10 = vld [vmem:[%s12090_s2 + $0x398] sm:$0xff] }
 0x260   : > { %9038 = vmatprep.mubr.f32.mxu1 %v4545_v1  ;;  %9093 = vmatpush3.msra.mxu1 %v7541_v2  ;;  %v7566_v2 = vld [vmem:[%s12090_s2 + $0x3b0] sm:$0xff] }
 0x261   : > { %9170 = vmatprep.mubr.f32.mxu0 %v4984_v16  ;;  %9225 = vmatpush3.msra.mxu0 %v7589_v53  ;;  %v7565_v53 = vld [vmem:[%s12090_s2 + $0x3a8] sm:$0xff]  ;;  %v7562_v1 = vld [vmem:[%s12090_s2 + $0x390] sm:$0xff] }
 0x262   : > { %9094 = vmatprep.subr.mxu1 %v7540_v13  ;;  %9226 = vmatprep.subr.mxu0 %v7588_v63  ;;  %v5124_v16 = vld [vmem:[#allocation2 + $0x68] ss:$2 sm:$0xff] }
 0x263   : > { %9095 = vmatpush3.msra.mxu1 %v7540_v13  ;;  %9227 = vmatpush3.msra.mxu0 %v7588_v63  ;;  %v7561_v13 = vld [vmem:[%s12090_s2 + $0x388] sm:$0xff]  ;;  %v7560_v63 = vld [vmem:[%s12090_s2 + $0x380] sm:$0xff] }
 0x264   : > { %9039 = vmatmul.mubr.f32.gmra.mxu1 %v4547_v44  ;;  %9096 = vmatprep.subr.mxu1 %v7539_v59  ;;  %v5130_v44 = vld [vmem:[#allocation2 + $0xf8] ss:$2 sm:$0xff] }
 0x265   : > { %9171 = vmatmul.mubr.f32.gmra.mxu0 %v4986_v19  ;;  %9228 = vmatprep.subr.mxu0 %v7587_v35  ;;  %v5132_v19 = vld [vmem:[#allocation2 + $0x128] ss:$2 sm:$0xff] }
 0x266   : > { %9041 = vmatprep.mubr.f32.mxu1 %v4549_v7  ;;  %9097 = vmatpush3.msra.mxu1 %v7539_v59  ;;  %v5126_v59 = vld [vmem:[#allocation2 + $0x98] ss:$2 sm:$0xff] }
 0x267   : > { %9173 = vmatprep.mubr.f32.mxu0 %v4988_v27  ;;  %9229 = vmatpush3.msra.mxu0 %v7587_v35  ;;  %v5128_v35 = vld [vmem:[#allocation2 + $0xc8] ss:$2 sm:$0xff]  ;;  %v5134_v7 = vld [vmem:[#allocation2 + $0x158] ss:$2 sm:$0xff] }
 0x268   : > { %9098 = vmatprep.subr.mxu1 %v7538_v52  ;;  %9230 = vmatprep.subr.mxu0 %v7586_v32  ;;  %v5466_v27 = vld [vmem:[%s12091_s3 + $0x78] sm:$0xff] }
 0x269   : > { %9099 = vmatpush3.msra.mxu1 %v7538_v52  ;;  %9231 = vmatpush3.msra.mxu0 %v7586_v32  ;;  %v5136_v52 = vld [vmem:[#allocation2 + $0x188] ss:$2 sm:$0xff]  ;;  %v7608_v32 = vld [vmem:[%s12091_s3 + $0xf8] sm:$0xff] }
 0x26a   : > { %9042 = vmatmul.mubr.f32.gmra.mxu1 %v4551_v43  ;;  %9100 = vmatprep.subr.mxu1 %v7537_v4  ;;  %v7606_v43 = vld [vmem:[%s12091_s3 + $0xe8] sm:$0xff] }
 0x26b   : > { %9174 = vmatmul.mubr.f32.gmra.mxu0 %v4990_v40  ;;  %9232 = vmatprep.subr.mxu0 %v7585_v45  ;;  %v5464_v40 = vld [vmem:[%s12091_s3 + $0x68] sm:$0xff] }
 0x26c   : > { %9101 = vmatpush3.msra.mxu1 %v7537_v4  ;;  %9120 = vmatprep.mubr.f32.mxu1 %v4829_v60  ;;  %v7607_v4 = vld [vmem:[%s12091_s3 + $0xf0] sm:$0xff]  ;;  %v7605_v60 = vld [vmem:[%s12091_s3 + $0xe0] sm:$0xff] }
 0x26d   : > { %9233 = vmatpush3.msra.mxu0 %v7585_v45  ;;  %9252 = vmatprep.mubr.f32.mxu0 %v5268_v47  ;;  %v5465_v45 = vld [vmem:[%s12091_s3 + $0x70] sm:$0xff]  ;;  %v5462_v47 = vld [vmem:[%s12091_s3 + $0x58] sm:$0xff] }
 0x26e   : > { %9102 = vmatprep.subr.mxu1 %v7536_v14  ;;  %9234 = vmatprep.subr.mxu0 %v7584_v9 }
 0x26f   : > { %9103 = vmatpush3.msra.mxu1 %v7536_v14  ;;  %9235 = vmatpush3.msra.mxu0 %v7584_v9  ;;  %v5463_v14 = vld [vmem:[%s12091_s3 + $0x60] sm:$0xff]  ;;  %v7604_v9 = vld [vmem:[%s12091_s3 + $0xd8] sm:$0xff] }
 0x270   : > { %9104 = vmatprep.subr.mxu1 %v7535_v46  ;;  %9236 = vmatprep.subr.mxu0 %v7583_v49 }
 0x271   : > { %9105 = vmatpush3.msra.mxu1 %v7535_v46  ;;  %9237 = vmatpush3.msra.mxu0 %v7583_v49  ;;  %v7603_v46 = vld [vmem:[%s12091_s3 + $0xd0] sm:$0xff] }
 0x272   : > { %9106 = vmatprep.subr.mxu1 %v7534_v29  ;;  %9238 = vmatprep.subr.mxu0 %v7582_v55  ;;  %v5461_v49 = vld [vmem:[%s12091_s3 + $0x50] sm:$0xff] }
 0x273   : > { %9107 = vmatpush3.msra.mxu1 %v7534_v29  ;;  %9239 = vmatpush3.msra.mxu0 %v7582_v55  ;;  %v7602_v29 = vld [vmem:[%s12091_s3 + $0xc8] sm:$0xff] }
 0x274   : > { %9108 = vmatprep.subr.mxu1 %v7533_v31  ;;  %9240 = vmatprep.subr.mxu0 %v7581_v56  ;;  %v5460_v55 = vld [vmem:[%s12091_s3 + $0x48] sm:$0xff] }
 0x275   : > { %9109 = vmatpush3.msra.mxu1 %v7533_v31  ;;  %9241 = vmatpush3.msra.mxu0 %v7581_v56  ;;  %v7601_v31 = vld [vmem:[%s12091_s3 + $0xc0] sm:$0xff] }
 0x276   : > { %9110 = vmatprep.subr.mxu1 %v7532_v54  ;;  %9242 = vmatprep.subr.mxu0 %v7580_v20  ;;  %v5459_v56 = vld [vmem:[%s12091_s3 + $0x40] sm:$0xff] }
 0x277   : > { %9111 = vmatpush3.msra.mxu1 %v7532_v54  ;;  %9243 = vmatpush3.msra.mxu0 %v7580_v20  ;;  %v7600_v54 = vld [vmem:[%s12091_s3 + $0xb8] sm:$0xff] }
 0x278   : > { %9112 = vmatprep.subr.mxu1 %v7531_v15  ;;  %9244 = vmatprep.subr.mxu0 %v7579_v58  ;;  %v5458_v20 = vld [vmem:[%s12091_s3 + $0x38] sm:$0xff] }
 0x279   : > { %9113 = vmatpush3.msra.mxu1 %v7531_v15  ;;  %9245 = vmatpush3.msra.mxu0 %v7579_v58  ;;  %v7599_v15 = vld [vmem:[%s12091_s3 + $0xb0] sm:$0xff] }
 0x27a   : > { %9114 = vmatprep.subr.mxu1 %v7530_v0  ;;  %9246 = vmatprep.subr.mxu0 %v7578_v26  ;;  %v5457_v58 = vld [vmem:[%s12091_s3 + $0x30] sm:$0xff] }
 0x27b   : > { %9115 = vmatpush3.msra.mxu1 %v7530_v0  ;;  %9247 = vmatpush3.msra.mxu0 %v7578_v26  ;;  %v7598_v0 = vld [vmem:[%s12091_s3 + $0xa8] sm:$0xff] }
 0x27c   : > { %9116 = vmatprep.subr.mxu1 %v7529_v24  ;;  %9248 = vmatprep.subr.mxu0 %v7577_v33  ;;  %v5456_v26 = vld [vmem:[%s12091_s3 + $0x28] sm:$0xff] }
 0x27d   : > { %9117 = vmatpush3.msra.mxu1 %v7529_v24  ;;  %9249 = vmatpush3.msra.mxu0 %v7577_v33  ;;  %v7597_v24 = vld [vmem:[%s12091_s3 + $0xa0] sm:$0xff] }
 0x27e   : > { %9118 = vmatprep.subr.mxu1 %v7528_v41  ;;  %9250 = vmatprep.subr.mxu0 %v7576_v25  ;;  %v5455_v33 = vld [vmem:[%s12091_s3 + $0x20] sm:$0xff] }
 0x27f   : > { %9119 = vmatpush3.msra.mxu1 %v7528_v41  ;;  %9251 = vmatpush3.msra.mxu0 %v7576_v25  ;;  %v7596_v41 = vld [vmem:[%s12091_s3 + $0x98] sm:$0xff] }
 0x280   : > { %9121 = vmatmul.mubr.f32.vlgmr.msra.gmra.mxu1 %v4831_v38  ;;  %9176 = vmatprep.subr.mxu1 %v7575_v39  ;;  %v5454_v25 = vld [vmem:[%s12091_s3 + $0x18] sm:$0xff]  ;;  %v5453_v38 = vld [vmem:[%s12091_s3 + $0x10] sm:$0xff] }
 0x281   : > { %9253 = vmatmul.mubr.f32.vlgmr.msra.gmra.mxu0 %v5270_v37  ;;  %9123 = vmatprep.mubr.f32.mxu1 %v4833_v36  ;;  %v7594_v36 = vld [vmem:[%s12091_s3 + $0x88] sm:$0xff] }
 0x282   : > { %9177 = vmatpush3.msra.mxu1 %v7575_v39  ;;  %9255 = vmatprep.mubr.f32.mxu0 %v5272_v57  ;;  %v7595_v39 = vld [vmem:[%s12091_s3 + $0x90] sm:$0xff]  ;;  %v7593_v57 = vld [vmem:[%s12091_s3 + $0x80] sm:$0xff] }
 0x283   : > { %9178 = vmatprep.subr.mxu1 %v7574_v23  ;;  %9302 = vmatprep.subr.mxu0 %v5466_v27 }
 0x284   : > { %9179 = vmatpush3.msra.mxu1 %v7574_v23  ;;  %9303 = vmatpush3.msra.mxu0 %v5466_v27  ;;  %v5452_v23 = vld [vmem:[%s12091_s3 + $0x8] sm:$0xff] }
 0x285   : > { %9124 = vmatmul.mubr.f32.gmra.mxu1 %v4835_v3  ;;  %9180 = vmatprep.subr.mxu1 %v7573_v42 }
 0x286   : > { %9256 = vmatmul.mubr.f32.gmra.mxu0 %v5274_v51  ;;  %9126 = vmatprep.mubr.f32.mxu1 %v4837_v30  ;;  %v5468_v51 = vld [vmem:[#allocation3 + $0x8] ss:$2 sm:$0xff]  ;;  %v5444_v30 = vld [vmem:[#allocation3 + $0x7] ss:$2 sm:$0xff] }
 0x287   : > { %9181 = vmatpush3.msra.mxu1 %v7573_v42  ;;  %9258 = vmatprep.mubr.f32.mxu0 %v5276_v22  ;;  %v5451_v42 = vld [vmem:[%s12091_s3] sm:$0xff]  ;;  %v11662_v22 = vld [vmem:[%s12091_s3 + $0x1f8] sm:$0xff] }
 0x288   : > { %9182 = vmatprep.subr.mxu1 %v7572_v48  ;;  %9304 = vmatprep.subr.mxu0 %v5465_v45  ;;  %12305 = vst [vmem:[#allocation8_spill] sm:$0xff] %v11662_v22 }
 0x289   : > { %9183 = vmatpush3.msra.mxu1 %v7572_v48  ;;  %9305 = vmatpush3.msra.mxu0 %v5465_v45  ;;  %v11657_v48 = vld [vmem:[%s12091_s3 + $0x178] sm:$0xff] }
 0x28a   : > { %9127 = vmatmul.mubr.f32.gmra.mxu1 %v4839_v5  ;;  %9184 = vmatprep.subr.mxu1 %v7571_v17  ;;  %12304 = vst [vmem:[#allocation29_spill] sm:$0xff] %v11657_v48 }
 0x28b   : > { %9259 = vmatmul.mubr.f32.gmra.mxu0 %v5278_v11  ;;  %9129 = vmatprep.mubr.f32.mxu1 %v4841_v21 }
 0x28c   : > { %9185 = vmatpush3.msra.mxu1 %v7571_v17  ;;  %9261 = vmatprep.mubr.f32.mxu0 %v5280_v62 }
 0x28d   : > { %9186 = vmatprep.subr.mxu1 %v7570_v6  ;;  %9306 = vmatprep.subr.mxu0 %v5464_v40 }
 0x28e   : > { %9187 = vmatpush3.msra.mxu1 %v7570_v6  ;;  %9307 = vmatpush3.msra.mxu0 %v5464_v40 }
 0x28f   : > { %9130 = vmatmul.mubr.f32.gmra.mxu1 %v4843_v61  ;;  %9188 = vmatprep.subr.mxu1 %v7569_v28 }
 0x290   : > { %9262 = vmatmul.mubr.f32.gmra.mxu0 %v5282_v34  ;;  %9189 = vmatpush3.msra.mxu1 %v7569_v28 }
 0x291   : > { %9208 = vmatprep.mubr.f32.mxu1 %v5122_v50  ;;  %9190 = vmatprep.subr.mxu1 %v7568_v8 }
 0x292   : > { %9191 = vmatpush3.msra.mxu1 %v7568_v8  ;;  %9308 = vmatprep.subr.mxu0 %v5463_v14 }
 0x293   : > { %9192 = vmatprep.subr.mxu1 %v7567_v18  ;;  %9309 = vmatpush3.msra.mxu0 %v5463_v14 }
 0x294   : > { %9193 = vmatpush3.msra.mxu1 %v7567_v18  ;;  %9310 = vmatprep.subr.mxu0 %v5462_v47 }
 0x295   : > { %9194 = vmatprep.subr.mxu1 %v7566_v2  ;;  %9311 = vmatpush3.msra.mxu0 %v5462_v47 }
 0x296   : > { %9195 = vmatpush3.msra.mxu1 %v7566_v2  ;;  %9312 = vmatprep.subr.mxu0 %v5461_v49 }
 0x297   : > { %9196 = vmatprep.subr.mxu1 %v7565_v53  ;;  %9313 = vmatpush3.msra.mxu0 %v5461_v49 }
 0x298   : > { %9197 = vmatpush3.msra.mxu1 %v7565_v53  ;;  %9314 = vmatprep.subr.mxu0 %v5460_v55 }
 0x299   : > { %9198 = vmatprep.subr.mxu1 %v7564_v12  ;;  %9315 = vmatpush3.msra.mxu0 %v5460_v55 }
 0x29a   : > { %9199 = vmatpush3.msra.mxu1 %v7564_v12  ;;  %9316 = vmatprep.subr.mxu0 %v5459_v56 }
 0x29b   : > { %9200 = vmatprep.subr.mxu1 %v7563_v10  ;;  %9317 = vmatpush3.msra.mxu0 %v5459_v56 }
 0x29c   : > { %9201 = vmatpush3.msra.mxu1 %v7563_v10  ;;  %9318 = vmatprep.subr.mxu0 %v5458_v20 }
 0x29d   : > { %9202 = vmatprep.subr.mxu1 %v7562_v1  ;;  %9319 = vmatpush3.msra.mxu0 %v5458_v20 }
 0x29e   : > { %9203 = vmatpush3.msra.mxu1 %v7562_v1  ;;  %9320 = vmatprep.subr.mxu0 %v5457_v58 }
 0x29f   : > { %9204 = vmatprep.subr.mxu1 %v7561_v13  ;;  %9321 = vmatpush3.msra.mxu0 %v5457_v58 }
 0x2a0   : > { %9205 = vmatpush3.msra.mxu1 %v7561_v13  ;;  %9322 = vmatprep.subr.mxu0 %v5456_v26 }
 0x2a1   : > { %9206 = vmatprep.subr.mxu1 %v7560_v63  ;;  %9323 = vmatpush3.msra.mxu0 %v5456_v26 }
 0x2a2   : > { %9207 = vmatpush3.msra.mxu1 %v7560_v63  ;;  %9324 = vmatprep.subr.mxu0 %v5455_v33 }
 0x2a3   : > { %9209 = vmatmul.mubr.f32.vlgmr.msra.gmra.mxu1 %v5124_v16  ;;  %9264 = vmatprep.subr.mxu1 %v7608_v32 }
 0x2a4   : > { %9211 = vmatprep.mubr.f32.mxu1 %v5126_v59  ;;  %9265 = vmatpush3.msra.mxu1 %v7608_v32 }
 0x2a5   : > { %9266 = vmatprep.subr.mxu1 %v7607_v4  ;;  %9325 = vmatpush3.msra.mxu0 %v5455_v33 }
 0x2a6   : > { %9267 = vmatpush3.msra.mxu1 %v7607_v4  ;;  %9326 = vmatprep.subr.mxu0 %v5454_v25 }
 0x2a7   : > { %9212 = vmatmul.mubr.f32.gmra.mxu1 %v5128_v35  ;;  %9268 = vmatprep.subr.mxu1 %v7606_v43 }
 0x2a8   : > { %9214 = vmatprep.mubr.f32.mxu1 %v5130_v44  ;;  %9269 = vmatpush3.msra.mxu1 %v7606_v43 }
 0x2a9   : > { %9270 = vmatprep.subr.mxu1 %v7605_v60  ;;  %9327 = vmatpush3.msra.mxu0 %v5454_v25 }
 0x2aa   : > { %9271 = vmatpush3.msra.mxu1 %v7605_v60  ;;  %9328 = vmatprep.subr.mxu0 %v5453_v38 }
 0x2ab   : > { %9215 = vmatmul.mubr.f32.gmra.mxu1 %v5132_v19  ;;  %9272 = vmatprep.subr.mxu1 %v7604_v9 }
 0x2ac   : > { %9217 = vmatprep.mubr.f32.mxu1 %v5134_v7  ;;  %9273 = vmatpush3.msra.mxu1 %v7604_v9 }
 0x2ad   : > { %9274 = vmatprep.subr.mxu1 %v7603_v46  ;;  %9329 = vmatpush3.msra.mxu0 %v5453_v38 }
 0x2ae   : > { %9275 = vmatpush3.msra.mxu1 %v7603_v46  ;;  %9330 = vmatprep.subr.mxu0 %v5452_v23 }
 0x2af   : > { %9218 = vmatmul.mubr.f32.gmra.mxu1 %v5136_v52  ;;  %9276 = vmatprep.subr.mxu1 %v7602_v29 }
 0x2b0   : > { %9277 = vmatpush3.msra.mxu1 %v7602_v29  ;;  %9331 = vmatpush3.msra.mxu0 %v5452_v23 }
 0x2b1   : > { %9278 = vmatprep.subr.mxu1 %v7601_v31  ;;  %9332 = vmatprep.subr.mxu0 %v5451_v42 }
 0x2b2   : > { %9279 = vmatpush3.msra.mxu1 %v7601_v31  ;;  %9333 = vmatpush3.msra.mxu0 %v5451_v42 }
 0x2b3   : > { %9280 = vmatprep.subr.mxu1 %v7600_v54  ;;  %9296 = vmatprep.mubr.f32.mxu1 %v5468_v51 }
 0x2b4   : > { %9281 = vmatpush3.msra.mxu1 %v7600_v54  ;;  %9334 = vmatprep.mubr.f32.mxu0 %v5444_v30 }
 0x2b5   : > { %9282 = vmatprep.subr.mxu1 %v7599_v15  ;;  %9378 = vmatprep.subr.mxu0 %v11662_v22 }
 0x2b6   : > { %9283 = vmatpush3.msra.mxu1 %v7599_v15 }
 0x2b7   : > { %9284 = vmatprep.subr.mxu1 %v7598_v0 }
 0x2b8   : > { %9285 = vmatpush3.msra.mxu1 %v7598_v0 }
 0x2b9   : > { %9286 = vmatprep.subr.mxu1 %v7597_v24 }
 0x2ba   : > { %9287 = vmatpush3.msra.mxu1 %v7597_v24 }
 0x2bb   : > { %9288 = vmatprep.subr.mxu1 %v7596_v41  ;;  %v11640_v37 = vpop.f32.mrf.mxu1  ;;  %v8990_v6 = vpop.f32.mrf.mxu0 }
 0x2bc   : > { %9289 = vmatpush3.msra.mxu1 %v7596_v41 }
 0x2bd   : > { %9290 = vmatprep.subr.mxu1 %v7595_v39  ;;  %v4246_v3 = vpop.f32.mrf.mxu1  ;;  %v4489_v28 = vpop.f32.mrf.mxu0 }
 0x2be   : > { %9291 = vmatpush3.msra.mxu1 %v7595_v39 }
 0x2bf   : > { %9292 = vmatprep.subr.mxu1 %v7594_v36 }
 0x2c0   : > { %9293 = vmatpush3.msra.mxu1 %v7594_v36 }
 0x2c1   : > { %9294 = vmatprep.subr.mxu1 %v7593_v57 }
 0x2c2   : > { %9295 = vmatpush3.msra.mxu1 %v7593_v57 }
 0x2c3   : > { %9340 = vmatprep.subr.mxu1 %v11657_v48 }
 0x2cb   : > { %v8905_v17 = vpop.f32.mrf.mxu1 }
 0x2cc   : > { %v8993_v8 = vpop.f32.mrf.mxu0 }
 0x2cd   : > { %v4256_v5 = vpop.f32.mrf.mxu1 }
 0x2ce   : > { %v4499_v50 = vpop.f32.mrf.mxu0 }
 0x2dd   : > { %v8908_v11 = vpop.f32.mrf.mxu1  ;;  %v8996_v18 = vpop.f32.mrf.mxu0 }
 0x2df   : > { %v4266_v21 = vpop.f32.mrf.mxu1  ;;  %v11670_v53 = vpop.f32.mrf.mxu0 }
 0x2ed   : > { %v11666_v62 = vpop.f32.mrf.mxu1  ;;  %v11672_v10 = vpop.f32.mrf.mxu0 }
 0x2ef   : > { %v11668_v61 = vpop.f32.mrf.mxu1  ;;  %v11674_v13 = vpop.f32.mrf.mxu0 }
 0x2f1   : > { %v8946_v34 = vpop.f32.mrf.mxu1  ;;  %v9078_v16 = vpop.f32.mrf.mxu0 }
 0x2f2   : > { %v4357_v33 = vadd.f32 %v8946_v34, %v11640_v37 }
 0x2f3   : > { %v4351_v2 = vpop.f32.mrf.mxu1  ;;  %v4781_v35 = vpop.f32.mrf.mxu0 }
 0x2f4   : > { %v4352_v41 = vadd.f32 %v4351_v2, %v4246_v3  ;;  %v4529_v36 = vadd.f32 %v8990_v6, %v4357_v33 }
 0x2f6   : > { %v4528_v51 = vadd.f32 %v4489_v28, %v4352_v41 }
 0x2f7   : > { %v8949_v12 = vpop.f32.mrf.mxu1  ;;  %v9081_v19 = vpop.f32.mrf.mxu0 }
 0x2f8   : > { %v4367_v38 = vadd.f32 %v8949_v12, %v8905_v17 }
 0x2f9   : > { %v4361_v1 = vpop.f32.mrf.mxu1  ;;  %v4791_v52 = vpop.f32.mrf.mxu0 }
 0x2fa   : > { %v4362_v57 = vadd.f32 %v4361_v1, %v4256_v5 }
 0x2fd   : > { %v8952_v63 = vpop.f32.mrf.mxu1  ;;  %v9084_v27 = vpop.f32.mrf.mxu0 }
 0x2fe   : > { %v4377_v30 = vadd.f32 %v8952_v63, %v8908_v11 }
 0x2ff   : > { %v4371_v59 = vpop.f32.mrf.mxu1  ;;  %v11676_v45 = vpop.f32.mrf.mxu0 }
 0x300   : > { %v4533_v3 = vadd.f32 %v8996_v18, %v4377_v30 }
 0x303   : > { %v8955_v44 = vpop.f32.mrf.mxu1  ;;  %v11678_v40 = vpop.f32.mrf.mxu0 }
 0x304   : > { %12306 = vst [vmem:[#allocation7_spill] sm:$0xff] %v11678_v40  ;;  %v4387_v37 = vadd.f32 %v8955_v44, %v11666_v62 }
 0x305   : > { %v4381_v7 = vpop.f32.mrf.mxu1  ;;  %v11680_v14 = vpop.f32.mrf.mxu0 }
 0x306   : > { %12307 = vst [vmem:[#allocation30_spill] sm:$0xff] %v11680_v14  ;;  %v4382_v5 = vadd.f32 %v4381_v7, %v11668_v61  ;;  %v4535_v63 = vadd.f32 %v11672_v10, %v4387_v37  ;;  %v11702_v10 = vld [vmem:[%s12092_s4 + $0x1] ss:$0 sm:$0xff] }
 0x308   : > { %v4534_v44 = vadd.f32 %v11674_v13, %v4382_v5 }
 0x318   : > { %v9034_v32 = vpop.f32.mrf.mxu1 }
 0x319   : > { %v9166_v47 = vpop.f32.mrf.mxu0  ;;  %v4675_v42 = vadd.f32 %v9034_v32, %v4529_v36 }
 0x31a   : > { %v4635_v4 = vpop.f32.mrf.mxu1 }
 0x31b   : > { %v5074_v49 = vpop.f32.mrf.mxu0  ;;  %v4674_v48 = vadd.f32 %v4635_v4, %v4528_v51  ;;  %v4821_v40 = vadd.f32 %v9078_v16, %v4675_v42 }
 0x31d   : > { %v4820_v6 = vadd.f32 %v4781_v35, %v4674_v48 }
 0x31e   : > { %v9037_v43 = vpop.f32.mrf.mxu1 }
 0x31f   : > { %v9169_v55 = vpop.f32.mrf.mxu0 }
 0x320   : > { %v4645_v60 = vpop.f32.mrf.mxu1 }
 0x321   : > { %v11682_v56 = vpop.f32.mrf.mxu0 }
 0x322   : > { %12308 = vst [vmem:[#allocation33_spill] sm:$0xff] %v11682_v56  ;;  %v4530_v56 = vadd.f32 %v4499_v50, %v4362_v57 }
 0x324   : > { %v9040_v9 = vpop.f32.mrf.mxu1  ;;  %v4676_v2 = vadd.f32 %v4645_v60, %v4530_v56 }
 0x325   : > { %v11684_v20 = vpop.f32.mrf.mxu0  ;;  %v4679_v12 = vadd.f32 %v9040_v9, %v4533_v3 }
 0x326   : > { %v4655_v46 = vpop.f32.mrf.mxu1  ;;  %12309 = vst [vmem:[#allocation10_spill] sm:$0xff] %v11684_v20  ;;  %v4372_v20 = vadd.f32 %v4371_v59, %v4266_v21  ;;  %v4822_v59 = vadd.f32 %v4791_v52, %v4676_v2 }
 0x327   : > { %v11686_v58 = vpop.f32.mrf.mxu0  ;;  %v4825_v48 = vadd.f32 %v9084_v27, %v4679_v12  ;;  %v12312_v27 = vld [vmem:[#allocation7_spill] sm:$0xff] }
 0x328   : > { %12310 = vst [vmem:[#allocation9_spill] sm:$0xff] %v11686_v58  ;;  %v4531_v58 = vadd.f32 %v8993_v8, %v4367_v38  ;;  %v4532_v11 = vadd.f32 %v11670_v53, %v4372_v20 }
 0x32a   : > { %v9043_v29 = vpop.f32.mrf.mxu1  ;;  %v4678_v21 = vadd.f32 %v4655_v46, %v4532_v11 }
 0x32b   : > { %v11688_v26 = vpop.f32.mrf.mxu0  ;;  %v4681_v18 = vadd.f32 %v9043_v29, %v4535_v63 }
 0x32c   : > { %v4665_v31 = vpop.f32.mrf.mxu1  ;;  %12311 = vst [vmem:[#allocation13_spill] sm:$0xff] %v11688_v26  ;;  %v4677_v26 = vadd.f32 %v9037_v43, %v4531_v58 }
 0x32d   : > { %v11691_v25 = vpop.f32.mrf.mxu0  ;;  %v4680_v53 = vadd.f32 %v4665_v31, %v4534_v44  ;;  %v4827_v46 = vadd.f32 %v12312_v27, %v4681_v18  ;;  %v7623_v44 = vld [vmem:[%s12091_s3 + $0x170] sm:$0xff]  ;;  %v7621_v27 = vld [vmem:[%s12091_s3 + $0x160] sm:$0xff] }
 0x32e   : > { %v4823_v8 = vadd.f32 %v9081_v19, %v4677_v26  ;;  %v4824_v19 = vadd.f32 %v11676_v45, %v4678_v21  ;;  %v12315_v26 = vld [vmem:[#allocation10_spill] sm:$0xff] }
 0x333   : > { %v12317_v3 = vld [vmem:[#allocation13_spill] sm:$0xff] }
 0x340   : > { %v9122_v54 = vpop.f32.mrf.mxu1 }
 0x341   : > { %v9254_v23 = vpop.f32.mrf.mxu0  ;;  %v4967_v17 = vadd.f32 %v9122_v54, %v4821_v40  ;;  %v12313_v54 = vld [vmem:[#allocation33_spill] sm:$0xff] }
 0x342   : > { %v4927_v15 = vpop.f32.mrf.mxu1 }
 0x343   : > { %v5366_v14 = vpop.f32.mrf.mxu0  ;;  %v4966_v1 = vadd.f32 %v4927_v15, %v4820_v6  ;;  %v5114_v62 = vadd.f32 %v9166_v47, %v4967_v17  ;;  %v12314_v15 = vld [vmem:[#allocation30_spill] sm:$0xff] }
 0x344   : > { %v4826_v58 = vadd.f32 %v12314_v15, %v4680_v53  ;;  %v12318_v53 = vld [vmem:[#allocation29_spill] sm:$0xff]  ;;  %v7634_v15 = vld [vmem:[%s12091_s3 + $0x1c8] sm:$0xff] }
 0x345   : > { %v9125_v0 = vpop.f32.mrf.mxu1  ;;  %v5113_v4 = vadd.f32 %v5074_v49, %v4966_v1 }
 0x346   : > { %v9257_v28 = vpop.f32.mrf.mxu0  ;;  %v4969_v16 = vadd.f32 %v9125_v0, %v4823_v8 }
 0x347   : > { %v4937_v24 = vpop.f32.mrf.mxu1 }
 0x348   : > { %v5376_v32 = vpop.f32.mrf.mxu0  ;;  %v4968_v61 = vadd.f32 %v4937_v24, %v4822_v59  ;;  %v5116_v9 = vadd.f32 %v9169_v55, %v4969_v16 }
 0x34a   : > { %v9128_v39 = vpop.f32.mrf.mxu1  ;;  %v5115_v45 = vadd.f32 %v12313_v54, %v4968_v61  ;;  %v7635_v54 = vld [vmem:[%s12091_s3 + $0x1d0] sm:$0xff] }
 0x34b   : > { %v4971_v43 = vadd.f32 %v9128_v39, %v4825_v48  ;;  %v9260_v13 = vpop.f32.mrf.mxu0 }
 0x34c   : > { %v4947_v22 = vpop.f32.mrf.mxu1 }
 0x34d   : > { %v4970_v47 = vadd.f32 %v4947_v22, %v4824_v19  ;;  %v5118_v24 = vadd.f32 %v12315_v26, %v4971_v43  ;;  %v5386_v39 = vpop.f32.mrf.mxu0  ;;  %v12319_v43 = vld [vmem:[#allocation8_spill] sm:$0xff]  ;;  %v7616_v26 = vld [vmem:[%s12091_s3 + $0x138] sm:$0xff] }
 0x34e   : > { %v7622_v19 = vld [vmem:[%s12091_s3 + $0x168] sm:$0xff] }
 0x34f   : > { %v9131_v34 = vpop.f32.mrf.mxu1 }
 0x350   : > { %v4973_v20 = vadd.f32 %v9131_v34, %v4827_v46  ;;  %v9263_v12 = vpop.f32.mrf.mxu0  ;;  %v7637_v46 = vld [vmem:[%s12091_s3 + $0x1e0] sm:$0xff] }
 0x351   : > { %v4957_v50 = vpop.f32.mrf.mxu1 }
 0x352   : > { %v4972_v38 = vadd.f32 %v4957_v50, %v4826_v58  ;;  %v5120_v34 = vadd.f32 %v12317_v3, %v4973_v20  ;;  %v7617_v58 = vld [vmem:[%s12091_s3 + $0x140] sm:$0xff] }
 0x353   : > { %v5663_v3 = vld [vmem:[#allocation3 + $0x9] ss:$2 sm:$0xff] }
 0x363   : > { %v9210_v35 = vpop.f32.mrf.mxu1 }
 0x364   : > { %v5260_v7 = vadd.f32 %v9210_v35, %v5114_v62  ;;  %v7639_v35 = vld [vmem:[%s12091_s3 + $0x1f0] sm:$0xff] }
 0x365   : > { %v5220_v52 = vpop.f32.mrf.mxu1 }
 0x366   : > { %v5406_v40 = vadd.f32 %v9254_v23, %v5260_v7  ;;  %v5259_v60 = vadd.f32 %v5220_v52, %v5113_v4  ;;  %v12316_v23 = vld [vmem:[#allocation9_spill] sm:$0xff]  ;;  %v7638_v52 = vld [vmem:[%s12091_s3 + $0x1e8] sm:$0xff] }
 0x367   : > { %v9213_v29 = vpop.f32.mrf.mxu1  ;;  %v5117_v57 = vadd.f32 %v12316_v23, %v4970_v47  ;;  %v7628_v23 = vld [vmem:[%s12091_s3 + $0x198] sm:$0xff] }
 0x368   : > { %v5418_v49 = vadd.f32 %v11702_v10, %v5406_v40  ;;  %v5405_v31 = vadd.f32 %v5366_v14, %v5259_v60  ;;  %v5262_v56 = vadd.f32 %v9213_v29, %v5116_v9  ;;  %v7636_v29 = vld [vmem:[%s12091_s3 + $0x1d8] sm:$0xff] }
 0x369   : > { %v5230_v0 = vpop.f32.mrf.mxu1 }
 0x36a   : > { %v5426_v33 = vmax.f32 %v5418_v49, 0.0  ;;  %v5417_v55 = vadd.f32 %v11702_v10, %v5405_v31  ;;  %v5408_v41 = vadd.f32 %v9257_v28, %v5262_v56  ;;  %v5261_v22 = vadd.f32 %v5230_v0, %v5115_v45  ;;  %v7619_v56 = vld [vmem:[%s12091_s3 + $0x150] sm:$0xff]  ;;  %v7618_v45 = vld [vmem:[%s12091_s3 + $0x148] sm:$0xff]  ;;  %v7633_v0 = vld [vmem:[%s12091_s3 + $0x1c0] sm:$0xff] }
 0x36b   : > { %v9216_v36 = vpop.f32.mrf.mxu1  ;;  %v5119_v28 = vadd.f32 %v11691_v25, %v4972_v38  ;;  %v7629_v38 = vld [vmem:[%s12091_s3 + $0x1a0] sm:$0xff] }
 0x36c   : > { %5435 = vst [vmem:[#allocation3 + $0x38] sm:$0xff] %v5426_v33  ;;  %v5425_v14 = vmax.f32 %v5417_v55, 0.0  ;;  %v5420_v42 = vadd.f32 %v11702_v10, %v5408_v41  ;;  %v5407_v51 = vadd.f32 %v5376_v32, %v5261_v22  ;;  %v5264_v30 = vadd.f32 %v9216_v36, %v5118_v24  ;;  %v5396_v32 = vpop.f32.mrf.mxu0  ;;  %v7632_v24 = vld [vmem:[%s12091_s3 + $0x1b8] sm:$0xff]  ;;  %v7615_v33 = vld [vmem:[%s12091_s3 + $0x130] sm:$0xff]  ;;  %v7614_v41 = vld [vmem:[%s12091_s3 + $0x128] sm:$0xff] }
 0x36d   : > { %v5240_v37 = vpop.f32.mrf.mxu1  ;;  %v7631_v55 = vld [vmem:[%s12091_s3 + $0x1b0] sm:$0xff]  ;;  %v7630_v22 = vld [vmem:[%s12091_s3 + $0x1a8] sm:$0xff]  ;;  %v7612_v36 = vld [vmem:[%s12091_s3 + $0x118] sm:$0xff] }
 0x36e   : > { %5434 = vst [vmem:[#allocation3 + $0x20] sm:$0xff] %v5425_v14  ;;  %v5428_v2 = vmax.f32 %v5420_v42, 0.0  ;;  %v5419_v17 = vadd.f32 %v11702_v10, %v5407_v51  ;;  %v5410_v6 = vadd.f32 %v9260_v13, %v5264_v30  ;;  %v5263_v5 = vadd.f32 %v5240_v37, %v5117_v57  ;;  %v7611_v57 = vld [vmem:[%s12091_s3 + $0x110] sm:$0xff]  ;;  %v7610_v42 = vld [vmem:[%s12091_s3 + $0x108] sm:$0xff]  ;;  %v7609_v30 = vld [vmem:[%s12091_s3 + $0x100] sm:$0xff] }
 0x36f   : > { %v9219_v11 = vpop.f32.mrf.mxu1  ;;  %v7627_v14 = vld [vmem:[%s12091_s3 + $0x190] sm:$0xff]  ;;  %v7626_v51 = vld [vmem:[%s12091_s3 + $0x188] sm:$0xff]  ;;  %v7625_v37 = vld [vmem:[%s12091_s3 + $0x180] sm:$0xff] }
 0x370   : > { %5437 = vst [vmem:[#allocation3 + $0x68] sm:$0xff] %v5428_v2  ;;  %v5427_v1 = vmax.f32 %v5419_v17, 0.0  ;;  %v5422_v8 = vadd.f32 %v11702_v10, %v5410_v6  ;;  %v5409_v21 = vadd.f32 %v5386_v39, %v5263_v5  ;;  %v5266_v63 = vadd.f32 %v9219_v11, %v5120_v34  ;;  %v7613_v39 = vld [vmem:[%s12091_s3 + $0x120] sm:$0xff]  ;;  %v7656_v34 = vld [vmem:[%s12091_s3 + $0x278] sm:$0xff]  ;;  %v7655_v5 = vld [vmem:[%s12091_s3 + $0x270] sm:$0xff] }
 0x371   : > { %v5250_v50 = vpop.f32.mrf.mxu1  ;;  %v7672_v2 = vld [vmem:[%s12091_s3 + $0x2f8] sm:$0xff] }
 0x372   : > { %5436 = vst [vmem:[#allocation3 + $0x50] sm:$0xff] %v5427_v1  ;;  %v5430_v16 = vmax.f32 %v5422_v8, 0.0  ;;  %v5421_v59 = vadd.f32 %v11702_v10, %v5409_v21  ;;  %v5412_v62 = vadd.f32 %v9263_v12, %v5266_v63  ;;  %v5265_v18 = vadd.f32 %v5250_v50, %v5119_v28  ;;  %v7671_v28 = vld [vmem:[%s12091_s3 + $0x2f0] sm:$0xff]  ;;  %v7654_v1 = vld [vmem:[%s12091_s3 + $0x268] sm:$0xff] }
 0x373   : > { %v5470_v48 = vld [vmem:[#allocation3 + $0x38] ss:$2 sm:$0xff]  ;;  %v5446_v25 = vld [vmem:[#allocation3 + $0x37] ss:$2 sm:$0xff] }
 0x374   : > { %5439 = vst [vmem:[#allocation3 + $0x98] sm:$0xff] %v5430_v16  ;;  %v5429_v61 = vmax.f32 %v5421_v59, 0.0  ;;  %v5424_v7 = vadd.f32 %v11702_v10, %v5412_v62  ;;  %v5411_v4 = vadd.f32 %v5396_v32, %v5265_v18  ;;  %9297 = vmatmul.mubr.f32.vlgmr.msra.gmra.mxu1 %v5470_v48  ;;  %9335 = vmatmul.mubr.f32.vlgmr.msra.gmra.mxu0 %v5446_v25  ;;  %v5665_v17 = vld [vmem:[#allocation3 + $0x39] ss:$2 sm:$0xff]  ;;  %v7653_v16 = vld [vmem:[%s12091_s3 + $0x260] sm:$0xff]  ;;  %v7652_v18 = vld [vmem:[%s12091_s3 + $0x258] sm:$0xff] }
 0x375   : > { %9341 = vmatpush3.msra.mxu1 %v12318_v53  ;;  %9379 = vmatpush3.msra.mxu0 %v12319_v43  ;;  %v5777_v20 = vld [vmem:[#allocation3 + $0x1f] ss:$2 sm:$0xff]  ;;  %v5891_v50 = vld [vmem:[#allocation3 + $0x20] ss:$2 sm:$0xff]  ;;  %v7669_v59 = vld [vmem:[%s12091_s3 + $0x2e0] sm:$0xff] }
 0x376   : > { %5438 = vst [vmem:[#allocation3 + $0x80] sm:$0xff] %v5429_v61  ;;  %v5432_v40 = vmax.f32 %v5424_v7, 0.0  ;;  %v5423_v60 = vadd.f32 %v11702_v10, %v5411_v4  ;;  %9342 = vmatprep.subr.mxu1 %v7623_v44  ;;  %9380 = vmatprep.subr.mxu0 %v7639_v35  ;;  %v7620_v10 = vld [vmem:[%s12091_s3 + $0x158] sm:$0xff]  ;;  %v7670_v8 = vld [vmem:[%s12091_s3 + $0x2e8] sm:$0xff]  ;;  %v7651_v32 = vld [vmem:[%s12091_s3 + $0x250] sm:$0xff] }
 0x377   : > { %9343 = vmatpush3.msra.mxu1 %v7623_v44  ;;  %9381 = vmatpush3.msra.mxu0 %v7639_v35  ;;  %v5472_v9 = vld [vmem:[#allocation3 + $0x68] ss:$2 sm:$0xff]  ;;  %v5448_v13 = vld [vmem:[#allocation3 + $0x67] ss:$2 sm:$0xff]  ;;  %v7650_v25 = vld [vmem:[%s12091_s3 + $0x248] sm:$0xff] }
 0x378   : > { %5441 = vst [vmem:[#allocation3 + $0xc8] sm:$0xff] %v5432_v40  ;;  %v5431_v47 = vmax.f32 %v5423_v60, 0.0  ;;  %9344 = vmatprep.subr.mxu1 %v7622_v19  ;;  %9382 = vmatprep.subr.mxu0 %v7638_v52  ;;  %v5667_v12 = vld [vmem:[#allocation3 + $0x69] ss:$2 sm:$0xff]  ;;  %v7667_v48 = vld [vmem:[%s12091_s3 + $0x2d0] sm:$0xff]  ;;  %v7666_v35 = vld [vmem:[%s12091_s3 + $0x2c8] sm:$0xff] }
 0x379   : > { %9299 = vmatprep.mubr.f32.mxu1 %v5472_v9  ;;  %9337 = vmatprep.mubr.f32.mxu0 %v5448_v13  ;;  %v5779_v6 = vld [vmem:[#allocation3 + $0x4f] ss:$2 sm:$0xff]  ;;  %v7647_v43 = vld [vmem:[%s12091_s3 + $0x230] sm:$0xff] }
 0x37a   : > { %5440 = vst [vmem:[#allocation3 + $0xb0] sm:$0xff] %v5431_v47  ;;  %9345 = vmatpush3.msra.mxu1 %v7622_v19  ;;  %9383 = vmatpush3.msra.mxu0 %v7638_v52  ;;  %v6005_v62 = vld [vmem:[#allocation3 + $0x21] ss:$2 sm:$0xff]  ;;  %v7649_v61 = vld [vmem:[%s12091_s3 + $0x240] sm:$0xff]  ;;  %v7646_v52 = vld [vmem:[%s12091_s3 + $0x228] sm:$0xff] }
 0x37b   : > { %9346 = vmatprep.subr.mxu1 %v7621_v27  ;;  %9384 = vmatprep.subr.mxu0 %v7637_v46  ;;  %v5474_v49 = vld [vmem:[#allocation3 + $0x98] ss:$2 sm:$0xff]  ;;  %v5450_v31 = vld [vmem:[#allocation3 + $0x97] ss:$2 sm:$0xff]  ;;  %v7668_v44 = vld [vmem:[%s12091_s3 + $0x2d8] sm:$0xff] }
 0x37c   : > { %9347 = vmatpush3.msra.mxu1 %v7621_v27  ;;  %9385 = vmatpush3.msra.mxu0 %v7637_v46  ;;  %v5669_v21 = vld [vmem:[#allocation3 + $0x99] ss:$2 sm:$0xff]  ;;  %v7665_v7 = vld [vmem:[%s12091_s3 + $0x2c0] sm:$0xff]  ;;  %v7648_v4 = vld [vmem:[%s12091_s3 + $0x238] sm:$0xff] }
 0x37d   : > { %9348 = vmatprep.subr.mxu1 %v7620_v10  ;;  %9386 = vmatprep.subr.mxu0 %v7636_v29  ;;  %v5781_v11 = vld [vmem:[#allocation3 + $0x7f] ss:$2 sm:$0xff]  ;;  %v7645_v60 = vld [vmem:[%s12091_s3 + $0x220] sm:$0xff] }
 0x37e   : > { %9300 = vmatmul.mubr.f32.gmra.mxu1 %v5474_v49  ;;  %9338 = vmatmul.mubr.f32.gmra.mxu0 %v5450_v31  ;;  %v7664_v53 = vld [vmem:[%s12091_s3 + $0x2b8] sm:$0xff]  ;;  %v7663_v19 = vld [vmem:[%s12091_s3 + $0x2b0] sm:$0xff]  ;;  %v7662_v40 = vld [vmem:[%s12091_s3 + $0x2a8] sm:$0xff] }
 0x37f   : > { %9349 = vmatpush3.msra.mxu1 %v7620_v10  ;;  %9387 = vmatpush3.msra.mxu0 %v7636_v29  ;;  %v7661_v9 = vld [vmem:[%s12091_s3 + $0x2a0] sm:$0xff]  ;;  %v7644_v13 = vld [vmem:[%s12091_s3 + $0x218] sm:$0xff]  ;;  %v7643_v27 = vld [vmem:[%s12091_s3 + $0x210] sm:$0xff] }
 0x380   : > { %9350 = vmatprep.subr.mxu1 %v7619_v56  ;;  %9388 = vmatprep.subr.mxu0 %v7635_v54  ;;  %v7660_v47 = vld [vmem:[%s12091_s3 + $0x298] sm:$0xff]  ;;  %v7659_v46 = vld [vmem:[%s12091_s3 + $0x290] sm:$0xff]  ;;  %v7642_v10 = vld [vmem:[%s12091_s3 + $0x208] sm:$0xff] }
 0x381   : > { %9410 = vmatprep.mubr.f32.mxu0 %v5777_v20  ;;  %9351 = vmatpush3.msra.mxu1 %v7619_v56  ;;  %v5783_v63 = vld [vmem:[#allocation3 + $0xaf] ss:$2 sm:$0xff] }
 0x382   : > { %9389 = vmatpush3.msra.mxu0 %v7635_v54  ;;  %9352 = vmatprep.subr.mxu1 %v7618_v45  ;;  %v7658_v29 = vld [vmem:[%s12091_s3 + $0x288] sm:$0xff]  ;;  %v7641_v49 = vld [vmem:[%s12091_s3 + $0x200] sm:$0xff]  ;;  %v7688_v56 = vld [vmem:[%s12091_s3 + $0x378] sm:$0xff] }
 0x383   : > { %9390 = vmatprep.subr.mxu0 %v7634_v15  ;;  %9353 = vmatpush3.msra.mxu1 %v7618_v45  ;;  %v7657_v31 = vld [vmem:[%s12091_s3 + $0x280] sm:$0xff]  ;;  %v7704_v54 = vld [vmem:[%s12091_s3 + $0x3f8] sm:$0xff] }
 0x384   : > { %9391 = vmatpush3.msra.mxu0 %v7634_v15  ;;  %9354 = vmatprep.subr.mxu1 %v7617_v58  ;;  %v5893_v45 = vld [vmem:[#allocation3 + $0x50] ss:$2 sm:$0xff]  ;;  %v6007_v20 = vld [vmem:[#allocation3 + $0x51] ss:$2 sm:$0xff]  ;;  %v7687_v15 = vld [vmem:[%s12091_s3 + $0x370] sm:$0xff] }
 0x385   : > { %9392 = vmatprep.subr.mxu0 %v7633_v0  ;;  %9355 = vmatpush3.msra.mxu1 %v7617_v58  ;;  %v5895_v58 = vld [vmem:[#allocation3 + $0x80] ss:$2 sm:$0xff] }
 0x386   : > { %9393 = vmatpush3.msra.mxu0 %v7633_v0  ;;  %9356 = vmatprep.subr.mxu1 %v7616_v26  ;;  %v6009_v0 = vld [vmem:[#allocation3 + $0x81] ss:$2 sm:$0xff] }
 0x387   : > { %9394 = vmatprep.subr.mxu0 %v7632_v24  ;;  %9357 = vmatpush3.msra.mxu1 %v7616_v26  ;;  %v7703_v26 = vld [vmem:[%s12091_s3 + $0x3f0] sm:$0xff] }
 0x388   : > { %9395 = vmatpush3.msra.mxu0 %v7632_v24  ;;  %9358 = vmatprep.subr.mxu1 %v7615_v33  ;;  %v7686_v24 = vld [vmem:[%s12091_s3 + $0x368] sm:$0xff] }
 0x389   : > { %9396 = vmatprep.subr.mxu0 %v7631_v55  ;;  %9359 = vmatpush3.msra.mxu1 %v7615_v33  ;;  %v7702_v33 = vld [vmem:[%s12091_s3 + $0x3e8] sm:$0xff] }
 0x38a   : > { %9397 = vmatpush3.msra.mxu0 %v7631_v55  ;;  %9360 = vmatprep.subr.mxu1 %v7614_v41  ;;  %v5897_v55 = vld [vmem:[#allocation3 + $0xb0] ss:$2 sm:$0xff] }
 0x38b   : > { %9398 = vmatprep.subr.mxu0 %v7630_v22  ;;  %9361 = vmatpush3.msra.mxu1 %v7614_v41  ;;  %v6011_v41 = vld [vmem:[#allocation3 + $0xb1] ss:$2 sm:$0xff] }
 0x38c   : > { %9399 = vmatpush3.msra.mxu0 %v7630_v22  ;;  %9362 = vmatprep.subr.mxu1 %v7613_v39  ;;  %v6120_v22 = vld [vmem:[#allocation3 + $0x37] ss:$2 sm:$0xff] }
 0x38d   : > { %9400 = vmatprep.subr.mxu0 %v7629_v38  ;;  %9363 = vmatpush3.msra.mxu1 %v7613_v39  ;;  %v7685_v39 = vld [vmem:[%s12091_s3 + $0x360] sm:$0xff] }
 0x38e   : > { %9401 = vmatpush3.msra.mxu0 %v7629_v38  ;;  %9364 = vmatprep.subr.mxu1 %v7612_v36  ;;  %v7701_v38 = vld [vmem:[%s12091_s3 + $0x3e0] sm:$0xff] }
 0x38f   : > { %9402 = vmatprep.subr.mxu0 %v7628_v23  ;;  %9365 = vmatpush3.msra.mxu1 %v7612_v36  ;;  %v6234_v36 = vld [vmem:[#allocation3 + $0x38] ss:$2 sm:$0xff] }
 0x390   : > { %9403 = vmatpush3.msra.mxu0 %v7628_v23  ;;  %9366 = vmatprep.subr.mxu1 %v7611_v57  ;;  %v7684_v23 = vld [vmem:[%s12091_s3 + $0x358] sm:$0xff] }
 0x391   : > { %9404 = vmatprep.subr.mxu0 %v7627_v14  ;;  %9367 = vmatpush3.msra.mxu1 %v7611_v57  ;;  %v7700_v57 = vld [vmem:[%s12091_s3 + $0x3d8] sm:$0xff] }
 0x392   : > { %9405 = vmatpush3.msra.mxu0 %v7627_v14  ;;  %9368 = vmatprep.subr.mxu1 %v7610_v42  ;;  %v7683_v14 = vld [vmem:[%s12091_s3 + $0x350] sm:$0xff] }
 0x393   : > { %9406 = vmatprep.subr.mxu0 %v7626_v51  ;;  %9369 = vmatpush3.msra.mxu1 %v7610_v42  ;;  %v7699_v42 = vld [vmem:[%s12091_s3 + $0x3d0] sm:$0xff] }
 0x394   : > { %9407 = vmatpush3.msra.mxu0 %v7626_v51  ;;  %9370 = vmatprep.subr.mxu1 %v7609_v30  ;;  %v7682_v51 = vld [vmem:[%s12091_s3 + $0x348] sm:$0xff] }
 0x395   : > { %9408 = vmatprep.subr.mxu0 %v7625_v37  ;;  %9371 = vmatpush3.msra.mxu1 %v7609_v30  ;;  %v7698_v30 = vld [vmem:[%s12091_s3 + $0x3c8] sm:$0xff] }
 0x396   : > { %9372 = vmatprep.mubr.f32.mxu1 %v5663_v3  ;;  %9409 = vmatpush3.msra.mxu0 %v7625_v37  ;;  %v7681_v37 = vld [vmem:[%s12091_s3 + $0x340] sm:$0xff] }
 0x397   : > { %9373 = vmatmul.mubr.f32.vlgmr.msra.gmra.mxu1 %v5665_v17  ;;  %9411 = vmatmul.mubr.f32.vlgmr.msra.gmra.mxu0 %v5779_v6  ;;  %v7697_v3 = vld [vmem:[%s12091_s3 + $0x3c0] sm:$0xff]  ;;  %v7679_v17 = vld [vmem:[%s12091_s3 + $0x330] sm:$0xff] }
 0x398   : > { %9416 = vmatprep.subr.mxu1 %v7656_v34  ;;  %9454 = vmatprep.subr.mxu0 %v7672_v2  ;;  %v7695_v6 = vld [vmem:[%s12091_s3 + $0x3b0] sm:$0xff] }
 0x399   : > { %9375 = vmatprep.mubr.f32.mxu1 %v5667_v12  ;;  %9413 = vmatprep.mubr.f32.mxu0 %v5781_v11  ;;  %v7694_v12 = vld [vmem:[%s12091_s3 + $0x3a8] sm:$0xff]  ;;  %v7677_v11 = vld [vmem:[%s12091_s3 + $0x320] sm:$0xff] }
 0x39a   : > { %9417 = vmatpush3.msra.mxu1 %v7656_v34  ;;  %9455 = vmatpush3.msra.mxu0 %v7672_v2  ;;  %v7680_v34 = vld [vmem:[%s12091_s3 + $0x338] sm:$0xff] }
 0x39b   : > { %9418 = vmatprep.subr.mxu1 %v7655_v5  ;;  %9456 = vmatprep.subr.mxu0 %v7671_v28  ;;  %v7696_v2 = vld [vmem:[%s12091_s3 + $0x3b8] sm:$0xff] }
 0x39c   : > { %9419 = vmatpush3.msra.mxu1 %v7655_v5  ;;  %9457 = vmatpush3.msra.mxu0 %v7671_v28  ;;  %v7678_v5 = vld [vmem:[%s12091_s3 + $0x328] sm:$0xff]  ;;  %v7693_v28 = vld [vmem:[%s12091_s3 + $0x3a0] sm:$0xff] }
 0x39d   : > { %9376 = vmatmul.mubr.f32.gmra.mxu1 %v5669_v21  ;;  %9414 = vmatmul.mubr.f32.gmra.mxu0 %v5783_v63  ;;  %v7675_v21 = vld [vmem:[%s12091_s3 + $0x310] sm:$0xff] }
 0x39e   : > { %9420 = vmatprep.subr.mxu1 %v7654_v1  ;;  %9458 = vmatprep.subr.mxu0 %v7670_v8  ;;  %v7691_v63 = vld [vmem:[%s12091_s3 + $0x390] sm:$0xff] }
 0x39f   : > { %9421 = vmatpush3.msra.mxu1 %v7654_v1  ;;  %9448 = vmatprep.mubr.f32.mxu1 %v5891_v50  ;;  %v7676_v1 = vld [vmem:[%s12091_s3 + $0x318] sm:$0xff]  ;;  %v7674_v50 = vld [vmem:[%s12091_s3 + $0x308] sm:$0xff] }
 0x3a0   : > { %9459 = vmatpush3.msra.mxu0 %v7670_v8  ;;  %9486 = vmatprep.mubr.f32.mxu0 %v6005_v62  ;;  %v7692_v8 = vld [vmem:[%s12091_s3 + $0x398] sm:$0xff]  ;;  %v7689_v62 = vld [vmem:[%s12091_s3 + $0x380] sm:$0xff] }
 0x3a1   : > { %9422 = vmatprep.subr.mxu1 %v7653_v16  ;;  %9460 = vmatprep.subr.mxu0 %v7669_v59 }
 0x3a2   : > { %9423 = vmatpush3.msra.mxu1 %v7653_v16  ;;  %9461 = vmatpush3.msra.mxu0 %v7669_v59  ;;  %v7690_v16 = vld [vmem:[%s12091_s3 + $0x388] sm:$0xff]  ;;  %v7673_v59 = vld [vmem:[%s12091_s3 + $0x300] sm:$0xff] }
 0x3a3   : > { %9424 = vmatprep.subr.mxu1 %v7652_v18  ;;  %9462 = vmatprep.subr.mxu0 %v7668_v44 }
 0x3a4   : > { %9425 = vmatpush3.msra.mxu1 %v7652_v18  ;;  %9463 = vmatpush3.msra.mxu0 %v7668_v44  ;;  %v7720_v18 = vld [vmem:[%s12091_s3 + $0x478] sm:$0xff] }
 0x3a5   : > { %9426 = vmatprep.subr.mxu1 %v7651_v32  ;;  %9464 = vmatprep.subr.mxu0 %v7667_v48  ;;  %v6122_v44 = vld [vmem:[#allocation3 + $0x67] ss:$2 sm:$0xff] }
 0x3a6   : > { %9427 = vmatpush3.msra.mxu1 %v7651_v32  ;;  %9465 = vmatpush3.msra.mxu0 %v7667_v48  ;;  %v6236_v32 = vld [vmem:[#allocation3 + $0x68] ss:$2 sm:$0xff]  ;;  %v6124_v48 = vld [vmem:[#allocation3 + $0x97] ss:$2 sm:$0xff] }
 0x3a7   : > { %9428 = vmatprep.subr.mxu1 %v7650_v25  ;;  %9466 = vmatprep.subr.mxu0 %v7666_v35 }
 0x3a8   : > { %9429 = vmatpush3.msra.mxu1 %v7650_v25  ;;  %9467 = vmatpush3.msra.mxu0 %v7666_v35  ;;  %v7719_v25 = vld [vmem:[%s12091_s3 + $0x470] sm:$0xff] }
 0x3a9   : > { %9430 = vmatprep.subr.mxu1 %v7649_v61  ;;  %9468 = vmatprep.subr.mxu0 %v7665_v7  ;;  %v6238_v35 = vld [vmem:[#allocation3 + $0x98] ss:$2 sm:$0xff] }
 0x3aa   : > { %9431 = vmatpush3.msra.mxu1 %v7649_v61  ;;  %9469 = vmatpush3.msra.mxu0 %v7665_v7  ;;  %v7718_v61 = vld [vmem:[%s12091_s3 + $0x468] sm:$0xff]  ;;  %v6240_v7 = vld [vmem:[#allocation3 + $0xc8] ss:$2 sm:$0xff] }
 0x3ab   : > { %9432 = vmatprep.subr.mxu1 %v7648_v4  ;;  %9470 = vmatprep.subr.mxu0 %v7664_v53 }
 0x3ac   : > { %9433 = vmatpush3.msra.mxu1 %v7648_v4  ;;  %9471 = vmatpush3.msra.mxu0 %v7664_v53  ;;  %v6126_v4 = vld [vmem:[#allocation3 + $0xc7] ss:$2 sm:$0xff] }
 0x3ad   : > { %9434 = vmatprep.subr.mxu1 %v7647_v43  ;;  %9472 = vmatprep.subr.mxu0 %v7663_v19  ;;  %v7717_v53 = vld [vmem:[%s12091_s3 + $0x460] sm:$0xff] }
 0x3ae   : > { %9435 = vmatpush3.msra.mxu1 %v7647_v43  ;;  %9473 = vmatpush3.msra.mxu0 %v7663_v19  ;;  %v6348_v43 = vld [vmem:[#allocation3 + $0x39] ss:$2 sm:$0xff]  ;;  %v7716_v19 = vld [vmem:[%s12091_s3 + $0x458] sm:$0xff] }
 0x3af   : > { %9436 = vmatprep.subr.mxu1 %v7646_v52  ;;  %9474 = vmatprep.subr.mxu0 %v7662_v40 }
 0x3b0   : > { %9437 = vmatpush3.msra.mxu1 %v7646_v52  ;;  %9475 = vmatpush3.msra.mxu0 %v7662_v40  ;;  %v7715_v52 = vld [vmem:[%s12091_s3 + $0x450] sm:$0xff]  ;;  %v7714_v40 = vld [vmem:[%s12091_s3 + $0x448] sm:$0xff] }
 0x3b1   : > { %9438 = vmatprep.subr.mxu1 %v7645_v60  ;;  %9476 = vmatprep.subr.mxu0 %v7661_v9 }
 0x3b2   : > { %9439 = vmatpush3.msra.mxu1 %v7645_v60  ;;  %9477 = vmatpush3.msra.mxu0 %v7661_v9  ;;  %v7713_v60 = vld [vmem:[%s12091_s3 + $0x440] sm:$0xff]  ;;  %v7712_v9 = vld [vmem:[%s12091_s3 + $0x438] sm:$0xff] }
 0x3b3   : > { %9440 = vmatprep.subr.mxu1 %v7644_v13  ;;  %9478 = vmatprep.subr.mxu0 %v7660_v47 }
 0x3b4   : > { %9441 = vmatpush3.msra.mxu1 %v7644_v13  ;;  %9479 = vmatpush3.msra.mxu0 %v7660_v47  ;;  %v7711_v13 = vld [vmem:[%s12091_s3 + $0x430] sm:$0xff]  ;;  %v7710_v47 = vld [vmem:[%s12091_s3 + $0x428] sm:$0xff] }
 0x3b5   : > { %9442 = vmatprep.subr.mxu1 %v7643_v27  ;;  %9480 = vmatprep.subr.mxu0 %v7659_v46 }
 0x3b6   : > { %9443 = vmatpush3.msra.mxu1 %v7643_v27  ;;  %9481 = vmatpush3.msra.mxu0 %v7659_v46  ;;  %v7709_v27 = vld [vmem:[%s12091_s3 + $0x420] sm:$0xff]  ;;  %v7708_v46 = vld [vmem:[%s12091_s3 + $0x418] sm:$0xff] }
 0x3b7   : > { %9444 = vmatprep.subr.mxu1 %v7642_v10  ;;  %9482 = vmatprep.subr.mxu0 %v7658_v29 }
 0x3b8   : > { %9445 = vmatpush3.msra.mxu1 %v7642_v10  ;;  %9483 = vmatpush3.msra.mxu0 %v7658_v29  ;;  %v7707_v10 = vld [vmem:[%s12091_s3 + $0x410] sm:$0xff]  ;;  %v7706_v29 = vld [vmem:[%s12091_s3 + $0x408] sm:$0xff] }
 0x3b9   : > { %9446 = vmatprep.subr.mxu1 %v7641_v49  ;;  %9484 = vmatprep.subr.mxu0 %v7657_v31 }
 0x3ba   : > { %9447 = vmatpush3.msra.mxu1 %v7641_v49  ;;  %9485 = vmatpush3.msra.mxu0 %v7657_v31  ;;  %v7705_v49 = vld [vmem:[%s12091_s3 + $0x400] sm:$0xff] }
 0x3bb   : > { %9449 = vmatmul.mubr.f32.vlgmr.msra.gmra.mxu1 %v5893_v45  ;;  %9487 = vmatmul.mubr.f32.vlgmr.msra.gmra.mxu0 %v6007_v20  ;;  %v6350_v31 = vld [vmem:[#allocation3 + $0x69] ss:$2 sm:$0xff] }
 0x3bc   : > { %9492 = vmatprep.subr.mxu1 %v7688_v56  ;;  %9530 = vmatprep.subr.mxu0 %v7704_v54 }
 0x3bd   : > { %9451 = vmatprep.mubr.f32.mxu1 %v5895_v58  ;;  %9489 = vmatprep.mubr.f32.mxu0 %v6009_v0 }
 0x3be   : > { %9493 = vmatpush3.msra.mxu1 %v7688_v56  ;;  %9531 = vmatpush3.msra.mxu0 %v7704_v54  ;;  %v6352_v56 = vld [vmem:[#allocation3 + $0x99] ss:$2 sm:$0xff]  ;;  %v6354_v54 = vld [vmem:[#allocation3 + $0xc9] ss:$2 sm:$0xff] }
 0x3bf   : > { %9494 = vmatprep.subr.mxu1 %v7687_v15  ;;  %9532 = vmatprep.subr.mxu0 %v7703_v26 }
 0x3c0   : > { %9495 = vmatpush3.msra.mxu1 %v7687_v15  ;;  %9533 = vmatpush3.msra.mxu0 %v7703_v26 }
 0x3c1   : > { %9452 = vmatmul.mubr.f32.gmra.mxu1 %v5897_v55  ;;  %9490 = vmatmul.mubr.f32.gmra.mxu0 %v6011_v41 }
 0x3c2   : > { %9496 = vmatprep.subr.mxu1 %v7686_v24  ;;  %9534 = vmatprep.subr.mxu0 %v7702_v33 }
 0x3c3   : > { %9497 = vmatpush3.msra.mxu1 %v7686_v24  ;;  %9524 = vmatprep.mubr.f32.mxu1 %v6120_v22 }
 0x3c4   : > { %9535 = vmatpush3.msra.mxu0 %v7702_v33  ;;  %9562 = vmatprep.mubr.f32.mxu0 %v6234_v36 }
 0x3c5   : > { %9498 = vmatprep.subr.mxu1 %v7685_v39  ;;  %9536 = vmatprep.subr.mxu0 %v7701_v38 }
 0x3c6   : > { %9499 = vmatpush3.msra.mxu1 %v7685_v39  ;;  %9537 = vmatpush3.msra.mxu0 %v7701_v38 }
 0x3c7   : > { %9500 = vmatprep.subr.mxu1 %v7684_v23  ;;  %9538 = vmatprep.subr.mxu0 %v7700_v57 }
 0x3c8   : > { %9501 = vmatpush3.msra.mxu1 %v7684_v23  ;;  %9539 = vmatpush3.msra.mxu0 %v7700_v57 }
 0x3c9   : > { %9502 = vmatprep.subr.mxu1 %v7683_v14  ;;  %9540 = vmatprep.subr.mxu0 %v7699_v42 }
 0x3ca   : > { %9503 = vmatpush3.msra.mxu1 %v7683_v14  ;;  %9541 = vmatpush3.msra.mxu0 %v7699_v42 }
 0x3cb   : > { %9504 = vmatprep.subr.mxu1 %v7682_v51  ;;  %9542 = vmatprep.subr.mxu0 %v7698_v30 }
 0x3cc   : > { %9505 = vmatpush3.msra.mxu1 %v7682_v51  ;;  %9543 = vmatpush3.msra.mxu0 %v7698_v30 }
 0x3cd   : > { %9506 = vmatprep.subr.mxu1 %v7681_v37  ;;  %9544 = vmatprep.subr.mxu0 %v7697_v3 }
 0x3ce   : > { %9507 = vmatpush3.msra.mxu1 %v7681_v37  ;;  %9545 = vmatpush3.msra.mxu0 %v7697_v3 }
 0x3cf   : > { %9508 = vmatprep.subr.mxu1 %v7680_v34  ;;  %9546 = vmatprep.subr.mxu0 %v7696_v2 }
 0x3d0   : > { %9509 = vmatpush3.msra.mxu1 %v7680_v34  ;;  %9547 = vmatpush3.msra.mxu0 %v7696_v2 }
 0x3d1   : > { %9510 = vmatprep.subr.mxu1 %v7679_v17  ;;  %9548 = vmatprep.subr.mxu0 %v7695_v6 }
 0x3d2   : > { %9511 = vmatpush3.msra.mxu1 %v7679_v17  ;;  %9549 = vmatpush3.msra.mxu0 %v7695_v6 }
 0x3d3   : > { %9512 = vmatprep.subr.mxu1 %v7678_v5  ;;  %9550 = vmatprep.subr.mxu0 %v7694_v12 }
 0x3d4   : > { %9513 = vmatpush3.msra.mxu1 %v7678_v5  ;;  %9551 = vmatpush3.msra.mxu0 %v7694_v12 }
 0x3d5   : > { %9514 = vmatprep.subr.mxu1 %v7677_v11  ;;  %9552 = vmatprep.subr.mxu0 %v7693_v28 }
 0x3d6   : > { %9515 = vmatpush3.msra.mxu1 %v7677_v11  ;;  %9553 = vmatpush3.msra.mxu0 %v7693_v28 }
 0x3d7   : > { %9516 = vmatprep.subr.mxu1 %v7676_v1  ;;  %9554 = vmatprep.subr.mxu0 %v7692_v8 }
 0x3d8   : > { %9517 = vmatpush3.msra.mxu1 %v7676_v1  ;;  %9555 = vmatpush3.msra.mxu0 %v7692_v8 }
 0x3d9   : > { %9518 = vmatprep.subr.mxu1 %v7675_v21  ;;  %9556 = vmatprep.subr.mxu0 %v7691_v63 }
 0x3da   : > { %9519 = vmatpush3.msra.mxu1 %v7675_v21  ;;  %9557 = vmatpush3.msra.mxu0 %v7691_v63 }
 0x3db   : > { %9520 = vmatprep.subr.mxu1 %v7674_v50  ;;  %9558 = vmatprep.subr.mxu0 %v7690_v16 }
 0x3dc   : > { %9521 = vmatpush3.msra.mxu1 %v7674_v50  ;;  %9559 = vmatpush3.msra.mxu0 %v7690_v16 }
 0x3dd   : > { %9522 = vmatprep.subr.mxu1 %v7673_v59  ;;  %9560 = vmatprep.subr.mxu0 %v7689_v62 }
 0x3de   : > { %9523 = vmatpush3.msra.mxu1 %v7673_v59  ;;  %9561 = vmatpush3.msra.mxu0 %v7689_v62 }
 0x3df   : > { %9525 = vmatmul.mubr.f32.vlgmr.msra.gmra.mxu1 %v6122_v44  ;;  %9563 = vmatmul.mubr.f32.vlgmr.msra.gmra.mxu0 %v6236_v32  ;;  %v6473_v32 = vlaneseq }
 0x3e0   : > { %9568 = vmatprep.subr.mxu1 %v7720_v18  ;;  %9527 = vmatprep.mubr.f32.mxu1 %v6124_v48 }
 0x3e1   : > { %9565 = vmatprep.mubr.f32.mxu0 %v6238_v35  ;;  %9569 = vmatpush3.msra.mxu1 %v7720_v18 }
 0x3e2   : > { %9570 = vmatprep.subr.mxu1 %v7719_v25 }
 0x3e3   : > { %9571 = vmatpush3.msra.mxu1 %v7719_v25  ;;  %9566 = vmatmul.mubr.f32.gmra.mxu0 %v6240_v7 }
 0x3e4   : > { %9528 = vmatmul.mubr.f32.gmra.mxu1 %v6126_v4  ;;  %9572 = vmatprep.subr.mxu1 %v7718_v61 }
 0x3e5   : > { %9573 = vmatpush3.msra.mxu1 %v7718_v61  ;;  %9600 = vmatprep.mubr.f32.mxu1 %v6348_v43 }
 0x3e6   : > { %9574 = vmatprep.subr.mxu1 %v7717_v53 }
 0x3e7   : > { %9575 = vmatpush3.msra.mxu1 %v7717_v53 }
 0x3e8   : > { %9576 = vmatprep.subr.mxu1 %v7716_v19 }
 0x3e9   : > { %9577 = vmatpush3.msra.mxu1 %v7716_v19  ;;  %v6474_v19 = vshrl.u32 %v6473_v32, 7 }
 0x3ea   : > { %9578 = vmatprep.subr.mxu1 %v7715_v52 }
 0x3eb   : > { %9579 = vmatpush3.msra.mxu1 %v7715_v52 }
 0x3ec   : > { %9580 = vmatprep.subr.mxu1 %v7714_v40 }
 0x3ed   : > { %9581 = vmatpush3.msra.mxu1 %v7714_v40 }
 0x3ee   : > { %9582 = vmatprep.subr.mxu1 %v7713_v60 }
 0x3ef   : > { %9583 = vmatpush3.msra.mxu1 %v7713_v60 }
 0x3f0   : > { %9584 = vmatprep.subr.mxu1 %v7712_v9 }
 0x3f1   : > { %9585 = vmatpush3.msra.mxu1 %v7712_v9 }
 0x3f2   : > { %9586 = vmatprep.subr.mxu1 %v7711_v13 }
 0x3f3   : > { %9587 = vmatpush3.msra.mxu1 %v7711_v13 }
 0x3f4   : > { %9588 = vmatprep.subr.mxu1 %v7710_v47 }
 0x3f5   : > { %9589 = vmatpush3.msra.mxu1 %v7710_v47 }
 0x3f6   : > { %9590 = vmatprep.subr.mxu1 %v7709_v27 }
 0x3f7   : > { %9591 = vmatpush3.msra.mxu1 %v7709_v27 }
 0x3f8   : > { %9592 = vmatprep.subr.mxu1 %v7708_v46 }
 0x3f9   : > { %9593 = vmatpush3.msra.mxu1 %v7708_v46  ;;  %v7721_v46 = vld [vmem:[%s12092_s4 + $0x2] ss:$0 sm:$0xff] }
 0x3fa   : > { %9594 = vmatprep.subr.mxu1 %v7707_v10 }
 0x3fb   : > { %9595 = vmatpush3.msra.mxu1 %v7707_v10 }
 0x3fc   : > { %9596 = vmatprep.subr.mxu1 %v7706_v29 }
 0x3fd   : > { %9597 = vmatpush3.msra.mxu1 %v7706_v29  ;;  %v6475_v29 = vadd.s32 8, %v6474_v19 }
 0x3fe   : > { %9598 = vmatprep.subr.mxu1 %v7705_v49 }
 0x3ff   : > { %9599 = vmatpush3.msra.mxu1 %v7705_v49 }
 0x400   : > { %9601 = vmatmul.mubr.f32.vlgmr.msra.gmra.mxu1 %v6350_v31 }
 0x401   : > { %9603 = vmatprep.mubr.f32.mxu1 %v6352_v56 }
 0x404   : > { %9604 = vmatmul.mubr.f32.gmra.mxu1 %v6354_v54 }
 0x434   : > { %v9298_v45 = vpop.f32.mrf.mxu1  ;;  %v9336_v15 = vpop.f32.mrf.mxu0 }
 0x435   : > { %v5649_v37 = vadd.f32 %v9336_v15, %v9298_v45  ;;  %v6482_v45 = vand.u32 7, %v6474_v19 }
 0x436   : > { %v5558_v20 = vpop.f32.mrf.mxu1  ;;  %v5643_v0 = vpop.f32.mrf.mxu0 }
 0x437   : > { %v5644_v34 = vadd.f32 %v5643_v0, %v5558_v20  ;;  %v6476_v20 = vadd.s32 16, %v6474_v19  ;;  %vm6526_vm1 = vcmp.lt.s32.totalorder %v6482_v45, 4 }
 0x43e   : > { %v9301_v58 = vpop.f32.mrf.mxu1  ;;  %v9339_v24 = vpop.f32.mrf.mxu0 }
 0x43f   : > { %v5659_v6 = vadd.f32 %v9339_v24, %v9301_v58  ;;  %v6489_v24 = vand.u32 7, %v6475_v29 }
 0x440   : > { %v5568_v26 = vpop.f32.mrf.mxu1  ;;  %v5653_v55 = vpop.f32.mrf.mxu0 }
 0x441   : > { %v5654_v28 = vadd.f32 %v5653_v55, %v5568_v26  ;;  %v6477_v55 = vadd.s32 24, %v6474_v19  ;;  %vm6527_vm2 = vcmp.lt.s32.totalorder %v6489_v24, 4 }
 0x457   : > { %v9374_v33 = vpop.f32.mrf.mxu1  ;;  %v9412_v22 = vpop.f32.mrf.mxu0 }
 0x458   : > { %v5773_v2 = vadd.f32 %v9374_v33, %v5649_v37 }
 0x459   : > { %v5753_v41 = vpop.f32.mrf.mxu1  ;;  %v5867_v38 = vpop.f32.mrf.mxu0 }
 0x45a   : > { %v5772_v5 = vadd.f32 %v5753_v41, %v5644_v34  ;;  %v5887_v1 = vadd.f32 %v9412_v22, %v5773_v2 }
 0x45c   : > { %v5886_v21 = vadd.f32 %v5867_v38, %v5772_v5 }
 0x45d   : > { %v9377_v39 = vpop.f32.mrf.mxu1  ;;  %v9415_v23 = vpop.f32.mrf.mxu0 }
 0x45e   : > { %v5775_v8 = vadd.f32 %v9377_v39, %v5659_v6 }
 0x45f   : > { %v5763_v36 = vpop.f32.mrf.mxu1  ;;  %v5877_v14 = vpop.f32.mrf.mxu0 }
 0x460   : > { %v5774_v63 = vadd.f32 %v5763_v36, %v5654_v28  ;;  %v5889_v62 = vadd.f32 %v9415_v23, %v5775_v8  ;;  %v6496_v36 = vand.u32 7, %v6476_v20 }
 0x462   : > { %v5888_v48 = vadd.f32 %v5877_v14, %v5774_v63  ;;  %vm6528_vm3 = vcmp.lt.s32.totalorder %v6496_v36, 4 }
 0x47b   : > { %v9450_v57 = vpop.f32.mrf.mxu1  ;;  %v9488_v51 = vpop.f32.mrf.mxu0 }
 0x47c   : > { %v6001_v50 = vadd.f32 %v9450_v57, %v5887_v1 }
 0x47d   : > { %v5981_v42 = vpop.f32.mrf.mxu1  ;;  %v6095_v3 = vpop.f32.mrf.mxu0 }
 0x47e   : > { %v6000_v18 = vadd.f32 %v5981_v42, %v5886_v21  ;;  %v6115_v25 = vadd.f32 %v9488_v51, %v6001_v50  ;;  %v6503_v51 = vand.u32 7, %v6477_v55 }
 0x480   : > { %v6114_v7 = vadd.f32 %v6095_v3, %v6000_v18  ;;  %vm6529_vm4 = vcmp.lt.s32.totalorder %v6503_v51, 4 }
 0x481   : > { %v9453_v30 = vpop.f32.mrf.mxu1  ;;  %v9491_v12 = vpop.f32.mrf.mxu0 }
 0x482   : > { %v6003_v35 = vadd.f32 %v9453_v30, %v5889_v62 }
 0x483   : > { %v5991_v17 = vpop.f32.mrf.mxu1  ;;  %v6105_v16 = vpop.f32.mrf.mxu0 }
 0x484   : > { %v6002_v4 = vadd.f32 %v5991_v17, %v5888_v48  ;;  %v6117_v52 = vadd.f32 %v9491_v12, %v6003_v35 }
 0x486   : > { %v6116_v9 = vadd.f32 %v6105_v16, %v6002_v4 }
 0x49f   : > { %v9526_v11 = vpop.f32.mrf.mxu1  ;;  %v9564_v44 = vpop.f32.mrf.mxu0 }
 0x4a0   : > { %v6230_v53 = vadd.f32 %v9526_v11, %v6115_v25 }
 0x4a1   : > { %v6210_v59 = vpop.f32.mrf.mxu1  ;;  %v6324_v43 = vpop.f32.mrf.mxu0 }
 0x4a2   : > { %v6229_v40 = vadd.f32 %v6210_v59, %v6114_v7  ;;  %v6344_v13 = vadd.f32 %v9564_v44, %v6230_v53 }
 0x4a3   : > { %v9567_v27 = vpop.f32.mrf.mxu0 }
 0x4a4   : > { %v9529_v61 = vpop.f32.mrf.mxu1  ;;  %v6343_v49 = vadd.f32 %v6324_v43, %v6229_v40 }
 0x4a5   : > { %v6232_v47 = vadd.f32 %v9529_v61, %v6117_v52  ;;  %v6334_v26 = vpop.f32.mrf.mxu0 }
 0x4a6   : > { %v6220_v60 = vpop.f32.mrf.mxu1 }
 0x4a7   : > { %v6231_v31 = vadd.f32 %v6220_v60, %v6116_v9  ;;  %v6346_v15 = vadd.f32 %v9567_v27, %v6232_v47 }
 0x4a9   : > { %v6345_v41 = vadd.f32 %v6334_v26, %v6231_v31 }
 0x4c0   : > { %v9602_v10 = vpop.f32.mrf.mxu1 }
 0x4c1   : > { %v6458_v56 = vadd.f32 %v9602_v10, %v6344_v13 }
 0x4c2   : > { %v6438_v54 = vpop.f32.mrf.mxu1 }
 0x4c3   : > { %v6466_v58 = vadd.f32 %v7721_v46, %v6458_v56  ;;  %v6457_v0 = vadd.f32 %v6438_v54, %v6343_v49 }
 0x4c4   : > { %v9605_v33 = vpop.f32.mrf.mxu1 }
 0x4c5   : > { %v6465_v22 = vadd.f32 %v7721_v46, %v6457_v0  ;;  %v6460_v39 = vadd.f32 %v9605_v33, %v6346_v15  ;;  %v6470_v23 = vmax.f32 %v6466_v58, 0.0 }
 0x4c6   : > { %v6448_v38 = vpop.f32.mrf.mxu1 }
 0x4c7   : > { %v6469_v57 = vmax.f32 %v6465_v22, 0.0  ;;  %v6468_v14 = vadd.f32 %v7721_v46, %v6460_v39  ;;  %v6459_v42 = vadd.f32 %v6448_v38, %v6345_v41  ;;  %v6531_v3 = vsel %vm6527_vm2, %v6470_v23, 0.0 }
 0x4c9   : > { %v6530_v30 = vsel %vm6526_vm1, %v6469_v57, 0.0  ;;  %v6467_v37 = vadd.f32 %v7721_v46, %v6459_v42  ;;  %v6472_v34 = vmax.f32 %v6468_v14, 0.0 }
 0x4ca   : > { %v6534_v17 = vadd.f32 %v6531_v3, %v6530_v30 }
 0x4cb   : > { %v6471_v2 = vmax.f32 %v6467_v37, 0.0  ;;  %v6533_v12 = vsel %vm6529_vm4, %v6472_v34, 0.0 }
 0x4cd   : > { %v6532_v6 = vsel %vm6528_vm3, %v6471_v2, 0.0 }
 0x4ce   : > { %v6535_v5 = vadd.f32 %v6534_v17, %v6532_v6 }
 0x4d0   : > { %v6536_v11 = vadd.f32 %v6535_v5, %v6533_v12 }
 0x4d2   : > { %v6537_v28 = vrot.slane %v6536_v11, 4 }
 0x4d4   : > { %v6538_v1 = vadd.f32 %v6537_v28, %v6536_v11 }
 0x4d6   : > { %v6539_v8 = vrot.slane %v6538_v1, 2 }
 0x4d8   : > { %v6540_v21 = vadd.f32 %v6539_v8, %v6538_v1 }
 0x4da   : > { %v6541_v63 = vrot.slane %v6540_v21, 1 }
 0x4dc   : > { %v6542_v50 = vadd.f32 %v6541_v63, %v6540_v21 }
 0x4de   : > { %v6543_v16 = vmul.f32 0.0625, %v6542_v50 }
 0x4e0   : > { %6544 = vst [vmem:[%s216_s30] sm:$0x1] %v6543_v16 }
 0x4e1   : > { %9660 = shalt.err (!%p9657_p3)
}
 0x4e2   : > { %s9661_s14 = scalar_lea.hbm %s6556_s9, 16  ;;  %s9665_s16 = scalar_lea.hbm %s12093_s5, 32 }
 0x4e3   : > { %p9662_p4 = scmp.ne.s32.totalorder %s6556_s9, %s9661_s14  ;;  %p9666_p9 = scmp.lt.s32.totalorder %s6556_s9, %s12093_s5 }
 0x4e4   : > { %p9667_p10 = scmp.lt.s32.totalorder %s9665_s16, %s9661_s14 }
 0x4e5   : > { %p9663_p7 = pnand %p9662_p4, %p9779_p5 }
 0x4e6   : > { %p9668_p11 = por %p9667_p10, %p9666_p9 }
 0x4e7   : > { %p9664_p8 = pneg %p9663_p7 }
 0x4e9   : > { %p9669_p12 = pnand %p9668_p11, %p9664_p8 }
 0x4eb   : > { %9672 = shalt.err (!%p9669_p12)
}
 0x4ec   : > { %9607 = dma.vmem_to_hbm [thread:$0]  (%p9779_p5), %s6559_s6, 16, %s6556_s9, %s6546_s10  }
 0x4ed PF: > { %p9613_p13 = scmp.ge.s32.totalorder %s9707_s21, 2  ;;  %s6570_s26 = sand.u32 1, %s9695_s18  }
 0x4ee   : > { %s6571_s30 = scalar_lea.sflag [#allocation5], %s6570_s26 }
 0x4ef   : > { %p9610_p0 = pnand %p9613_p13, %p9783_p6 }
 0x4f1   : > { %p9611_p1 = pneg %p9610_p0 }
 0x4f3   : > { %9690 = dma.done.wait (%p9611_p1), %s6571_s30, 16  }
 0x4f4   : > { %9692 = vsyncadd (%p9611_p1), %s6571_s30, 4294967280  ;;  %p15_p2 = scmp.ge.s32.totalorder %s9766_s24, 4   ;;  %s12320_s18 = smov %s9699_s19 }
 0x4f5   : > { %s12321_s19 = smov %s9703_s20  ;;  %s12322_s20 = smov %s9777_s27 }
 0x4f6   : > { %s12323_s21 = smov %s9766_s24  ;;  %17 = sbr.rel (!%p15_p2) target bundleno = 3 (0x3), region = 498 }
 0x4fb   :  { %6575 = vsyncpa [#allocation5], 1 }
 0x4fc   :  { %6577 = vsyncpa [#allocation5 + $0x1], 1 }

</bundles_post_ra>
